<compile_context>
chip_gen: v5e
topology: v5e:2x2
jax: 0.10.0
libtpu: 0.0.40
codegen_flags: <defaults>
</compile_context>

<pallas_src>
import jax
import jax.numpy as jnp
from jax.experimental import pallas as pl
from jax.experimental.pallas import tpu as pltpu


def _round_up(n, m):
    return ((n + m - 1) // m) * m


def _vmem_capacity_bytes():
    """Physical VMEM per TensorCore; conservative 64 MiB fallback (v7x)."""
    try:
        info = pltpu.get_tpu_info()
        cap = getattr(info, "vmem_capacity_bytes", None)
        if cap:
            return int(cap)
    except Exception:
        pass
    return 64 * 1024 * 1024


def _num_tensorcores_per_chip():
    """Only v7x has 2 TensorCores per chip; v5e/v6e have 1."""
    try:
        kind = jax.devices()[0].device_kind.lower()
    except Exception:
        return 1
    return 2 if ("v7" in kind or "7x" in kind) else 1


def _const_spec(shape):
    """BlockSpec for a grid-invariant (constant block index) operand.

    Single-buffered: the block index never changes, so double-buffering buys
    nothing but 2x VMEM. Falls back to the default pipelining if the
    pipeline_mode kwarg / pl.Buffered is unavailable.
    """
    idx_map = lambda b, c: (0,) * len(shape)
    try:
        return pl.BlockSpec(shape, idx_map, pipeline_mode=pl.Buffered(1))
    except Exception:
        return pl.BlockSpec(shape, idx_map)


def lstm_forward(x, params):
    """x: (seq, batch, input_dim) float32.  Returns (batch * output_dim,) f32."""
    seq, batch, in_dim = x.shape
    H = params["wh0"].shape[0]
    out_dim = params["wl"].shape[1]

    Hp = _round_up(H, 128)           # lane-aligned gate blocks
    Bp = _round_up(batch, 8)         # full sublanes
    Op = _round_up(out_dim, 128)     # lane-dense head output
    G = 4 * Hp

    # ---- megacore: only split batch across TCs on multi-TC chips (v7x).
    n_bshards = 2 if (_num_tensorcores_per_chip() >= 2
                      and Bp >= 16 and Bp % 16 == 0) else 1
    Bt = Bp // n_bshards

    # ---- VMEM budget -> chunk length T and vmem_limit_bytes.
    cap = _vmem_capacity_bytes()
    # weights (assume worst-case 2x in case Buffered(1) fell back to default)
    w_bytes = 3 * Hp * G * 2 + Hp * Op * 2 + G * 4 + Op * 4
    w_budget = 2 * w_bytes
    state_bytes = 4 * Bt * Hp * 4            # h0/c0/h1/c1 f32 scratch
    out_bytes = 2 * Bt * Op * 4              # (double-buffered) output block
    gx0_per_t = 2 * Bt * G * 4               # double-buffered gx0 per timestep
    avail = int(cap * 0.75) - w_budget - state_bytes - out_bytes
    t_cap = avail // gx0_per_t if avail > 0 else 1
    t_cap = max(1, min(128, t_cap))
    T = int(min(seq, t_cap))
    num_chunks = -(-seq // T)
    seq_pad = num_chunks * T
    ragged = (seq_pad != seq)

    needed = w_budget + T * gx0_per_t + state_bytes + out_bytes
    vmem_limit = int(min(cap, max(32 * 1024 * 1024, needed + 16 * 1024 * 1024)))

    # ---- zero-pad weights: per-gate column padding H->Hp, feature-row padding.
    def pad_gate_cols(w):
        lead = w.shape[:-1]
        w4 = w.reshape(*lead, 4, H)
        w4 = jnp.pad(w4, [(0, 0)] * len(lead) + [(0, 0), (0, Hp - H)])
        return w4.reshape(*lead, G)

    def pad_rows(w, rows_to):
        return jnp.pad(w, [(0, rows_to - w.shape[0]), (0, 0)])

    wx0 = pad_gate_cols(params["wx0"])                       # (in_dim, G)
    wh0 = pad_rows(pad_gate_cols(params["wh0"]), Hp)         # (Hp, G)
    b0 = pad_gate_cols(params["b0"])                         # (1, G)
    wx1 = pad_rows(pad_gate_cols(params["wx1"]), Hp)         # (Hp, G)
    wh1 = pad_rows(pad_gate_cols(params["wh1"]), Hp)         # (Hp, G)
    b1 = pad_gate_cols(params["b1"])                         # (1, G)
    wl = jnp.pad(params["wl"], [(0, Hp - H), (0, Op - out_dim)])   # (Hp, Op)
    bl = jnp.pad(params["bl"], [(0, 0), (0, Op - out_dim)])        # (1, Op)

    # ---- pad batch, hoist layer-0 input projection for ALL timesteps.
    xp = jnp.pad(x, [(0, 0), (0, Bp - batch), (0, 0)])
    gx0 = (jnp.dot(xp.reshape(seq * Bp, in_dim), wx0,
                   preferred_element_type=jnp.float32)
           + b0).reshape(seq, Bp, G)
    if ragged:
        gx0 = jnp.pad(gx0, [(0, seq_pad - seq), (0, 0), (0, 0)])

    # ---- bf16 MXU operands (f32 accumulation in-kernel).
    wh0_b = wh0.astype(jnp.bfloat16)
    wx1_b = wx1.astype(jnp.bfloat16)
    wh1_b = wh1.astype(jnp.bfloat16)
    wl_b = wl.astype(jnp.bfloat16)

    unroll = int(min(T, 8))

    def kernel(gx0_ref, wh0_ref, wx1_ref, wh1_ref, b1_ref, wl_ref, bl_ref,
               y_ref, h0_s, c0_s, h1_s, c1_s):
        c_idx = pl.program_id(1)

        @pl.when(c_idx == 0)
        def _():
            h0_s[...] = jnp.zeros_like(h0_s)
            c0_s[...] = jnp.zeros_like(c0_s)
            h1_s[...] = jnp.zeros_like(h1_s)
            c1_s[...] = jnp.zeros_like(c1_s)

        def gate_math(gates, c_prev):
            # Lane-aligned gate slices (Hp multiple of 128); all math in f32.
            i = jax.nn.sigmoid(gates[:, 0 * Hp:1 * Hp])
            f = jax.nn.sigmoid(gates[:, 1 * Hp:2 * Hp])
            g = jnp.tanh(gates[:, 2 * Hp:3 * Hp])
            o = jax.nn.sigmoid(gates[:, 3 * Hp:4 * Hp])
            c_new = f * c_prev + i * g
            h_new = o * jnp.tanh(c_new)
            return h_new, c_new

        def step(j, carry):
            h0, c0, h1, c1 = carry          # h*: bf16, c*: f32 (vreg-resident)

            # Layer-1 recurrent product first: depends only on previous-step
            # state, so it overlaps the layer-0 matmul instead of serializing.
            g1_h = jnp.dot(h1, wh1_ref[...],
                           preferred_element_type=jnp.float32)

            # Layer 0: x-projection precomputed; one recurrent matmul.
            g0 = gx0_ref[j] + jnp.dot(h0, wh0_ref[...],
                                      preferred_element_type=jnp.float32)
            h0_f, c0_n = gate_math(g0, c0)
            h0_n = h0_f.astype(jnp.bfloat16)

            # Layer 1: add the fresh h0 contribution and the (1, 4Hp) bias row.
            g1 = (g1_h
                  + jnp.dot(h0_n, wx1_ref[...],
                            preferred_element_type=jnp.float32)
                  + b1_ref[...])
            h1_f, c1_n = gate_math(g1, c1)
            h1_n = h1_f.astype(jnp.bfloat16)

            if ragged:
                # Freeze state on padded tail steps of the last chunk.
                valid = (c_idx * T + j) < seq
                h0_n = jnp.where(valid, h0_n, h0)
                c0_n = jnp.where(valid, c0_n, c0)
                h1_n = jnp.where(valid, h1_n, h1)
                c1_n = jnp.where(valid, c1_n, c1)
            return h0_n, c0_n, h1_n, c1_n

        carry0 = (h0_s[...].astype(jnp.bfloat16), c0_s[...],
                  h1_s[...].astype(jnp.bfloat16), c1_s[...])
        h0, c0, h1, c1 = jax.lax.fori_loop(0, T, step, carry0, unroll=unroll)

        # State only touches VMEM scratch once per chunk (entry/exit).
        h0_s[...] = h0.astype(jnp.float32)
        c0_s[...] = c0
        h1_s[...] = h1.astype(jnp.float32)
        c1_s[...] = c1

        # Linear head only on the final chunk (output block resident across c).
        @pl.when(c_idx == pl.num_programs(1) - 1)
        def _():
            y_ref[...] = (jnp.dot(h1, wl_ref[...],
                                  preferred_element_type=jnp.float32)
                          + bl_ref[...])

    y = pl.pallas_call(
        kernel,
        out_shape=jax.ShapeDtypeStruct((Bp, Op), jnp.float32),
        grid_spec=pltpu.PrefetchScalarGridSpec(
            num_scalar_prefetch=0,
            grid=(n_bshards, num_chunks),
            in_specs=[
                pl.BlockSpec((T, Bt, G), lambda b, c: (c, b, 0)),   # gx0 chunk
                _const_spec((Hp, G)),                               # wh0
                _const_spec((Hp, G)),                               # wx1
                _const_spec((Hp, G)),                               # wh1
                _const_spec((1, G)),                                # b1
                _const_spec((Hp, Op)),                              # wl
                _const_spec((1, Op)),                               # bl
            ],
            out_specs=pl.BlockSpec((Bt, Op), lambda b, c: (b, 0)),
            scratch_shapes=[
                pltpu.VMEM((Bt, Hp), jnp.float32),   # h0
                pltpu.VMEM((Bt, Hp), jnp.float32),   # c0
                pltpu.VMEM((Bt, Hp), jnp.float32),   # h1
                pltpu.VMEM((Bt, Hp), jnp.float32),   # c1
            ],
        ),
        compiler_params=pltpu.CompilerParams(
            dimension_semantics=("parallel", "arbitrary"),
            vmem_limit_bytes=vmem_limit,
        ),
    )(gx0, wh0_b, wx1_b, wh1_b, b1, wl_b, bl)

    return y[:batch, :out_dim].reshape(-1)


def init_params(key, input_dim, hidden_dim, output_dim):
    """Deterministic init mirroring PyTorch's uniform(-1/sqrt(H), 1/sqrt(H))."""
    H = hidden_dim
    k = 1.0 / jnp.sqrt(H)
    keys = jax.random.split(key, 8)

    def u(kk, shape, bound):
        return jax.random.uniform(kk, shape, jnp.float32, -bound, bound)

    return {
        # layer 0: weight_ih_l0^T, weight_hh_l0^T, (bias_ih + bias_hh) folded
        "wx0": u(keys[0], (input_dim, 4 * H), k),
        "wh0": u(keys[1], (H, 4 * H), k),
        "b0":  u(keys[2], (1, 4 * H), k) + u(keys[3], (1, 4 * H), k),
        # layer 1
        "wx1": u(keys[4], (H, 4 * H), k),
        "wh1": u(keys[5], (H, 4 * H), k),
        "b1":  u(keys[6], (1, 4 * H), k) + u(keys[7], (1, 4 * H), k),
        # linear head
        "wl": u(jax.random.fold_in(key, 100), (H, output_dim), k),
        "bl": u(jax.random.fold_in(key, 101), (1, output_dim), k),
    }


def lstm_forward_ref(x, params):
    """Pure-JAX reference mirroring the kernel's numerics (bf16 MXU operands,
    f32 accumulation and f32 c state / gate math)."""
    H = params["wh0"].shape[0]
    bf = lambda a: a.astype(jnp.bfloat16).astype(jnp.float32)

    wx0, b0 = params["wx0"], params["b0"]
    wh0 = bf(params["wh0"])
    wx1, wh1, b1 = bf(params["wx1"]), bf(params["wh1"]), params["b1"]
    wl, bl = bf(params["wl"]), params["bl"]

    def gate_math(gates, c):
        i = jax.nn.sigmoid(gates[:, 0 * H:1 * H])
        f = jax.nn.sigmoid(gates[:, 1 * H:2 * H])
        g = jnp.tanh(gates[:, 2 * H:3 * H])
        o = jax.nn.sigmoid(gates[:, 3 * H:4 * H])
        c_new = f * c + i * g
        return o * jnp.tanh(c_new), c_new

    batch = x.shape[1]
    zeros = jnp.zeros((batch, H), jnp.float32)

    def step(carry, x_t):
        h0, c0, h1, c1 = carry
        g0 = x_t @ wx0 + b0 + bf(h0) @ wh0
        h0, c0 = gate_math(g0, c0)
        g1 = bf(h0) @ wx1 + bf(h1) @ wh1 + b1
        h1, c1 = gate_math(g1, c1)
        return (h0, c0, h1, c1), None

    (_, _, h1, _), _ = jax.lax.scan(step, (zeros, zeros, zeros, zeros), x)
    return (bf(h1) @ wl + bl).reshape(-1)


if __name__ == "__main__":
    seq_len, batch, input_dim, hidden_dim, output_dim = 8, 2, 4, 32, 1

    key = jax.random.PRNGKey(0)
    k_x, k_p = jax.random.split(key)
    x = jax.random.normal(k_x, (seq_len, batch, input_dim), jnp.float32)
    params = init_params(k_p, input_dim, hidden_dim, output_dim)

    y = jax.block_until_ready(lstm_forward(x, params))
    y_ref = jax.block_until_ready(lstm_forward_ref(x, params))

    assert y.shape == (batch * output_dim,), y.shape
    assert jnp.allclose(y, y_ref, atol=2e-3, rtol=2e-3), (y, y_ref)
    print("KERNEL_OK")
</pallas_src>

<mosaic_0001>
module attributes {stable_mosaic.version = 11 : i64} {
  func.func @kernel(%arg0: i32, %arg1: i32, %arg2: memref<8x8x512xf32, #tpu.memory_space<vmem>>, %arg3: memref<128x512xbf16, #tpu.memory_space<vmem>>, %arg4: memref<128x512xbf16, #tpu.memory_space<vmem>>, %arg5: memref<128x512xbf16, #tpu.memory_space<vmem>>, %arg6: memref<1x512xf32, #tpu.memory_space<vmem>>, %arg7: memref<128x128xbf16, #tpu.memory_space<vmem>>, %arg8: memref<1x128xf32, #tpu.memory_space<vmem>>, %arg9: memref<8x128xf32, #tpu.memory_space<vmem>>, %arg10: memref<8x128xf32, #tpu.memory_space<vmem>>, %arg11: memref<8x128xf32, #tpu.memory_space<vmem>>, %arg12: memref<8x128xf32, #tpu.memory_space<vmem>>, %arg13: memref<8x128xf32, #tpu.memory_space<vmem>>) attributes {dimension_semantics = [#tpu.dimension_semantics<parallel>, #tpu.dimension_semantics<arbitrary>], iteration_bounds = array<i64: 1, 1>, scalar_prefetch = 0 : i64, scratch_operands = 4 : i64, tpu.core_type = #tpu.core_type<tc>, window_params = [{transform_indices = @transform_0, window_bounds = array<i64: 8, 8, 512>}, {pipeline_mode = #tpu.pipeline_mode<synchronous>, transform_indices = @transform_1, window_bounds = array<i64: 128, 512>}, {pipeline_mode = #tpu.pipeline_mode<synchronous>, transform_indices = @transform_2, window_bounds = array<i64: 128, 512>}, {pipeline_mode = #tpu.pipeline_mode<synchronous>, transform_indices = @transform_3, window_bounds = array<i64: 128, 512>}, {pipeline_mode = #tpu.pipeline_mode<synchronous>, transform_indices = @transform_4, window_bounds = array<i64: 1, 512>}, {pipeline_mode = #tpu.pipeline_mode<synchronous>, transform_indices = @transform_5, window_bounds = array<i64: 128, 128>}, {pipeline_mode = #tpu.pipeline_mode<synchronous>, transform_indices = @transform_6, window_bounds = array<i64: 1, 128>}, {transform_indices = @transform_7, window_bounds = array<i64: 8, 128>}]} {
    %c0_i32 = arith.constant 0 : i32
    %0 = arith.cmpi eq, %arg1, %c0_i32 : i32
    %1 = arith.extui %0 : i1 to i32
    %c0_i32_0 = arith.constant 0 : i32
    %2 = arith.cmpi ne, %1, %c0_i32_0 : i32
    scf.if %2 {
      %cst_170 = arith.constant 0.000000e+00 : f32
      %546 = vector.broadcast %cst_170 : f32 to vector<8x128xf32>
      %c0_171 = arith.constant 0 : index
      %c0_172 = arith.constant 0 : index
      %547 = vector.load %arg10[%c0_171, %c0_172] : memref<8x128xf32, #tpu.memory_space<vmem>>, vector<8x128xf32>
      tpu.vector_store %arg10[%c0_171, %c0_172], %546 {strides = array<i32>} : memref<8x128xf32, #tpu.memory_space<vmem>>, vector<8x128xf32>,
      %cst_173 = arith.constant 0.000000e+00 : f32
      %548 = vector.broadcast %cst_173 : f32 to vector<8x128xf32>
      %c0_174 = arith.constant 0 : index
      %c0_175 = arith.constant 0 : index
      %549 = vector.load %arg11[%c0_174, %c0_175] : memref<8x128xf32, #tpu.memory_space<vmem>>, vector<8x128xf32>
      tpu.vector_store %arg11[%c0_174, %c0_175], %548 {strides = array<i32>} : memref<8x128xf32, #tpu.memory_space<vmem>>, vector<8x128xf32>,
      %cst_176 = arith.constant 0.000000e+00 : f32
      %550 = vector.broadcast %cst_176 : f32 to vector<8x128xf32>
      %c0_177 = arith.constant 0 : index
      %c0_178 = arith.constant 0 : index
      %551 = vector.load %arg12[%c0_177, %c0_178] : memref<8x128xf32, #tpu.memory_space<vmem>>, vector<8x128xf32>
      tpu.vector_store %arg12[%c0_177, %c0_178], %550 {strides = array<i32>} : memref<8x128xf32, #tpu.memory_space<vmem>>, vector<8x128xf32>,
      %cst_179 = arith.constant 0.000000e+00 : f32
      %552 = vector.broadcast %cst_179 : f32 to vector<8x128xf32>
      %c0_180 = arith.constant 0 : index
      %c0_181 = arith.constant 0 : index
      %553 = vector.load %arg13[%c0_180, %c0_181] : memref<8x128xf32, #tpu.memory_space<vmem>>, vector<8x128xf32>
      tpu.vector_store %arg13[%c0_180, %c0_181], %552 {strides = array<i32>} : memref<8x128xf32, #tpu.memory_space<vmem>>, vector<8x128xf32>,
    } else {
    }
    %c0 = arith.constant 0 : index
    %c0_1 = arith.constant 0 : index
    %3 = vector.load %arg10[%c0, %c0_1] : memref<8x128xf32, #tpu.memory_space<vmem>>, vector<8x128xf32>
    %4 = arith.truncf %3 : vector<8x128xf32> to vector<8x128xbf16>
    %c0_2 = arith.constant 0 : index
    %c0_3 = arith.constant 0 : index
    %5 = vector.load %arg11[%c0_2, %c0_3] : memref<8x128xf32, #tpu.memory_space<vmem>>, vector<8x128xf32>
    %c0_4 = arith.constant 0 : index
    %c0_5 = arith.constant 0 : index
    %6 = vector.load %arg12[%c0_4, %c0_5] : memref<8x128xf32, #tpu.memory_space<vmem>>, vector<8x128xf32>
    %7 = arith.truncf %6 : vector<8x128xf32> to vector<8x128xbf16>
    %c0_6 = arith.constant 0 : index
    %c0_7 = arith.constant 0 : index
    %8 = vector.load %arg13[%c0_6, %c0_7] : memref<8x128xf32, #tpu.memory_space<vmem>>, vector<8x128xf32>
    %c0_i32_8 = arith.constant 0 : i32
    %c0_9 = arith.constant 0 : index
    %c0_10 = arith.constant 0 : index
    %9 = vector.load %arg5[%c0_9, %c0_10] : memref<128x512xbf16, #tpu.memory_space<vmem>>, vector<128x512xbf16>
    %cst = arith.constant dense<0.000000e+00> : vector<8x512xf32>
    %10 = tpu.matmul %7, %9, %cst {dimension_numbers = #tpu.dot_dimension_numbers<[1], [0], [0], [1], [0, 0, 1, 1], [], []>} : vector<8x128xbf16>, vector<128x512xbf16>, vector<8x512xf32> -> vector<8x512xf32>
    %11 = arith.index_cast %c0_i32_8 : i32 to index
    %c0_11 = arith.constant 0 : index
    %c0_12 = arith.constant 0 : index
    %12 = vector.load %arg2[%11, %c0_11, %c0_12] : memref<8x8x512xf32, #tpu.memory_space<vmem>>, vector<1x8x512xf32>
    %13 = vector.shape_cast %12 : vector<1x8x512xf32> to vector<8x512xf32>
    %c0_13 = arith.constant 0 : index
    %c0_14 = arith.constant 0 : index
    %14 = vector.load %arg3[%c0_13, %c0_14] : memref<128x512xbf16, #tpu.memory_space<vmem>>, vector<128x512xbf16>
    %cst_15 = arith.constant dense<0.000000e+00> : vector<8x512xf32>
    %15 = tpu.matmul %4, %14, %cst_15 {dimension_numbers = #tpu.dot_dimension_numbers<[1], [0], [0], [1], [0, 0, 1, 1], [], []>} : vector<8x128xbf16>, vector<128x512xbf16>, vector<8x512xf32> -> vector<8x512xf32>
    %16 = arith.addf %13, %15 : vector<8x512xf32>
    %17 = vector.extract_strided_slice %16 {offsets = [0, 0], sizes = [8, 128], strides = [1, 1]} : vector<8x512xf32> to vector<8x128xf32>
    %18 = arith.negf %17 : vector<8x128xf32>
    %19 = math.exp %18 : vector<8x128xf32>
    %cst_16 = arith.constant 1.000000e+00 : f32
    %20 = vector.broadcast %cst_16 : f32 to vector<8x128xf32>
    %21 = arith.addf %20, %19 : vector<8x128xf32>
    %22 = arith.divf %20, %21 : vector<8x128xf32>
    %23 = vector.extract_strided_slice %16 {offsets = [0, 128], sizes = [8, 128], strides = [1, 1]} : vector<8x512xf32> to vector<8x128xf32>
    %24 = arith.negf %23 : vector<8x128xf32>
    %25 = math.exp %24 : vector<8x128xf32>
    %cst_17 = arith.constant 1.000000e+00 : f32
    %26 = vector.broadcast %cst_17 : f32 to vector<8x128xf32>
    %27 = arith.addf %26, %25 : vector<8x128xf32>
    %28 = arith.divf %26, %27 : vector<8x128xf32>
    %29 = vector.extract_strided_slice %16 {offsets = [0, 256], sizes = [8, 128], strides = [1, 1]} : vector<8x512xf32> to vector<8x128xf32>
    %30 = math.tanh %29 : vector<8x128xf32>
    %31 = vector.extract_strided_slice %16 {offsets = [0, 384], sizes = [8, 128], strides = [1, 1]} : vector<8x512xf32> to vector<8x128xf32>
    %32 = arith.negf %31 : vector<8x128xf32>
    %33 = math.exp %32 : vector<8x128xf32>
    %cst_18 = arith.constant 1.000000e+00 : f32
    %34 = vector.broadcast %cst_18 : f32 to vector<8x128xf32>
    %35 = arith.addf %34, %33 : vector<8x128xf32>
    %36 = arith.divf %34, %35 : vector<8x128xf32>
    %37 = arith.mulf %28, %5 : vector<8x128xf32>
    %38 = arith.mulf %22, %30 : vector<8x128xf32>
    %39 = arith.addf %37, %38 : vector<8x128xf32>
    %40 = math.tanh %39 : vector<8x128xf32>
    %41 = arith.mulf %36, %40 : vector<8x128xf32>
    %42 = arith.truncf %41 : vector<8x128xf32> to vector<8x128xbf16>
    %c0_19 = arith.constant 0 : index
    %c0_20 = arith.constant 0 : index
    %43 = vector.load %arg4[%c0_19, %c0_20] : memref<128x512xbf16, #tpu.memory_space<vmem>>, vector<128x512xbf16>
    %cst_21 = arith.constant dense<0.000000e+00> : vector<8x512xf32>
    %44 = tpu.matmul %42, %43, %cst_21 {dimension_numbers = #tpu.dot_dimension_numbers<[1], [0], [0], [1], [0, 0, 1, 1], [], []>} : vector<8x128xbf16>, vector<128x512xbf16>, vector<8x512xf32> -> vector<8x512xf32>
    %45 = arith.addf %10, %44 : vector<8x512xf32>
    %c0_22 = arith.constant 0 : index
    %c0_23 = arith.constant 0 : index
    %46 = vector.load %arg6[%c0_22, %c0_23] : memref<1x512xf32, #tpu.memory_space<vmem>>, vector<1x512xf32>
    %47 = vector.broadcast %46 : vector<1x512xf32> to vector<8x512xf32>
    %48 = arith.addf %45, %47 : vector<8x512xf32>
    %49 = vector.extract_strided_slice %48 {offsets = [0, 0], sizes = [8, 128], strides = [1, 1]} : vector<8x512xf32> to vector<8x128xf32>
    %50 = arith.negf %49 : vector<8x128xf32>
    %51 = math.exp %50 : vector<8x128xf32>
    %cst_24 = arith.constant 1.000000e+00 : f32
    %52 = vector.broadcast %cst_24 : f32 to vector<8x128xf32>
    %53 = arith.addf %52, %51 : vector<8x128xf32>
    %54 = arith.divf %52, %53 : vector<8x128xf32>
    %55 = vector.extract_strided_slice %48 {offsets = [0, 128], sizes = [8, 128], strides = [1, 1]} : vector<8x512xf32> to vector<8x128xf32>
    %56 = arith.negf %55 : vector<8x128xf32>
    %57 = math.exp %56 : vector<8x128xf32>
    %cst_25 = arith.constant 1.000000e+00 : f32
    %58 = vector.broadcast %cst_25 : f32 to vector<8x128xf32>
    %59 = arith.addf %58, %57 : vector<8x128xf32>
    %60 = arith.divf %58, %59 : vector<8x128xf32>
    %61 = vector.extract_strided_slice %48 {offsets = [0, 256], sizes = [8, 128], strides = [1, 1]} : vector<8x512xf32> to vector<8x128xf32>
    %62 = math.tanh %61 : vector<8x128xf32>
    %63 = vector.extract_strided_slice %48 {offsets = [0, 384], sizes = [8, 128], strides = [1, 1]} : vector<8x512xf32> to vector<8x128xf32>
    %64 = arith.negf %63 : vector<8x128xf32>
    %65 = math.exp %64 : vector<8x128xf32>
    %cst_26 = arith.constant 1.000000e+00 : f32
    %66 = vector.broadcast %cst_26 : f32 to vector<8x128xf32>
    %67 = arith.addf %66, %65 : vector<8x128xf32>
    %68 = arith.divf %66, %67 : vector<8x128xf32>
    %69 = arith.mulf %60, %8 : vector<8x128xf32>
    %70 = arith.mulf %54, %62 : vector<8x128xf32>
    %71 = arith.addf %69, %70 : vector<8x128xf32>
    %72 = math.tanh %71 : vector<8x128xf32>
    %73 = arith.mulf %68, %72 : vector<8x128xf32>
    %74 = arith.truncf %73 : vector<8x128xf32> to vector<8x128xbf16>
    %c1_i32 = arith.constant 1 : i32
    %c0_27 = arith.constant 0 : index
    %c0_28 = arith.constant 0 : index
    %75 = vector.load %arg5[%c0_27, %c0_28] : memref<128x512xbf16, #tpu.memory_space<vmem>>, vector<128x512xbf16>
    %cst_29 = arith.constant dense<0.000000e+00> : vector<8x512xf32>
    %76 = tpu.matmul %74, %75, %cst_29 {dimension_numbers = #tpu.dot_dimension_numbers<[1], [0], [0], [1], [0, 0, 1, 1], [], []>} : vector<8x128xbf16>, vector<128x512xbf16>, vector<8x512xf32> -> vector<8x512xf32>
    %77 = arith.index_cast %c1_i32 : i32 to index
    %c0_30 = arith.constant 0 : index
    %c0_31 = arith.constant 0 : index
    %78 = vector.load %arg2[%77, %c0_30, %c0_31] : memref<8x8x512xf32, #tpu.memory_space<vmem>>, vector<1x8x512xf32>
    %79 = vector.shape_cast %78 : vector<1x8x512xf32> to vector<8x512xf32>
    %c0_32 = arith.constant 0 : index
    %c0_33 = arith.constant 0 : index
    %80 = vector.load %arg3[%c0_32, %c0_33] : memref<128x512xbf16, #tpu.memory_space<vmem>>, vector<128x512xbf16>
    %cst_34 = arith.constant dense<0.000000e+00> : vector<8x512xf32>
    %81 = tpu.matmul %42, %80, %cst_34 {dimension_numbers = #tpu.dot_dimension_numbers<[1], [0], [0], [1], [0, 0, 1, 1], [], []>} : vector<8x128xbf16>, vector<128x512xbf16>, vector<8x512xf32> -> vector<8x512xf32>
    %82 = arith.addf %79, %81 : vector<8x512xf32>
    %83 = vector.extract_strided_slice %82 {offsets = [0, 0], sizes = [8, 128], strides = [1, 1]} : vector<8x512xf32> to vector<8x128xf32>
    %84 = arith.negf %83 : vector<8x128xf32>
    %85 = math.exp %84 : vector<8x128xf32>
    %cst_35 = arith.constant 1.000000e+00 : f32
    %86 = vector.broadcast %cst_35 : f32 to vector<8x128xf32>
    %87 = arith.addf %86, %85 : vector<8x128xf32>
    %88 = arith.divf %86, %87 : vector<8x128xf32>
    %89 = vector.extract_strided_slice %82 {offsets = [0, 128], sizes = [8, 128], strides = [1, 1]} : vector<8x512xf32> to vector<8x128xf32>
    %90 = arith.negf %89 : vector<8x128xf32>
    %91 = math.exp %90 : vector<8x128xf32>
    %cst_36 = arith.constant 1.000000e+00 : f32
    %92 = vector.broadcast %cst_36 : f32 to vector<8x128xf32>
    %93 = arith.addf %92, %91 : vector<8x128xf32>
    %94 = arith.divf %92, %93 : vector<8x128xf32>
    %95 = vector.extract_strided_slice %82 {offsets = [0, 256], sizes = [8, 128], strides = [1, 1]} : vector<8x512xf32> to vector<8x128xf32>
    %96 = math.tanh %95 : vector<8x128xf32>
    %97 = vector.extract_strided_slice %82 {offsets = [0, 384], sizes = [8, 128], strides = [1, 1]} : vector<8x512xf32> to vector<8x128xf32>
    %98 = arith.negf %97 : vector<8x128xf32>
    %99 = math.exp %98 : vector<8x128xf32>
    %cst_37 = arith.constant 1.000000e+00 : f32
    %100 = vector.broadcast %cst_37 : f32 to vector<8x128xf32>
    %101 = arith.addf %100, %99 : vector<8x128xf32>
    %102 = arith.divf %100, %101 : vector<8x128xf32>
    %103 = arith.mulf %94, %39 : vector<8x128xf32>
    %104 = arith.mulf %88, %96 : vector<8x128xf32>
    %105 = arith.addf %103, %104 : vector<8x128xf32>
    %106 = math.tanh %105 : vector<8x128xf32>
    %107 = arith.mulf %102, %106 : vector<8x128xf32>
    %108 = arith.truncf %107 : vector<8x128xf32> to vector<8x128xbf16>
    %c0_38 = arith.constant 0 : index
    %c0_39 = arith.constant 0 : index
    %109 = vector.load %arg4[%c0_38, %c0_39] : memref<128x512xbf16, #tpu.memory_space<vmem>>, vector<128x512xbf16>
    %cst_40 = arith.constant dense<0.000000e+00> : vector<8x512xf32>
    %110 = tpu.matmul %108, %109, %cst_40 {dimension_numbers = #tpu.dot_dimension_numbers<[1], [0], [0], [1], [0, 0, 1, 1], [], []>} : vector<8x128xbf16>, vector<128x512xbf16>, vector<8x512xf32> -> vector<8x512xf32>
    %111 = arith.addf %76, %110 : vector<8x512xf32>
    %c0_41 = arith.constant 0 : index
    %c0_42 = arith.constant 0 : index
    %112 = vector.load %arg6[%c0_41, %c0_42] : memref<1x512xf32, #tpu.memory_space<vmem>>, vector<1x512xf32>
    %113 = vector.broadcast %112 : vector<1x512xf32> to vector<8x512xf32>
    %114 = arith.addf %111, %113 : vector<8x512xf32>
    %115 = vector.extract_strided_slice %114 {offsets = [0, 0], sizes = [8, 128], strides = [1, 1]} : vector<8x512xf32> to vector<8x128xf32>
    %116 = arith.negf %115 : vector<8x128xf32>
    %117 = math.exp %116 : vector<8x128xf32>
    %cst_43 = arith.constant 1.000000e+00 : f32
    %118 = vector.broadcast %cst_43 : f32 to vector<8x128xf32>
    %119 = arith.addf %118, %117 : vector<8x128xf32>
    %120 = arith.divf %118, %119 : vector<8x128xf32>
    %121 = vector.extract_strided_slice %114 {offsets = [0, 128], sizes = [8, 128], strides = [1, 1]} : vector<8x512xf32> to vector<8x128xf32>
    %122 = arith.negf %121 : vector<8x128xf32>
    %123 = math.exp %122 : vector<8x128xf32>
    %cst_44 = arith.constant 1.000000e+00 : f32
    %124 = vector.broadcast %cst_44 : f32 to vector<8x128xf32>
    %125 = arith.addf %124, %123 : vector<8x128xf32>
    %126 = arith.divf %124, %125 : vector<8x128xf32>
    %127 = vector.extract_strided_slice %114 {offsets = [0, 256], sizes = [8, 128], strides = [1, 1]} : vector<8x512xf32> to vector<8x128xf32>
    %128 = math.tanh %127 : vector<8x128xf32>
    %129 = vector.extract_strided_slice %114 {offsets = [0, 384], sizes = [8, 128], strides = [1, 1]} : vector<8x512xf32> to vector<8x128xf32>
    %130 = arith.negf %129 : vector<8x128xf32>
    %131 = math.exp %130 : vector<8x128xf32>
    %cst_45 = arith.constant 1.000000e+00 : f32
    %132 = vector.broadcast %cst_45 : f32 to vector<8x128xf32>
    %133 = arith.addf %132, %131 : vector<8x128xf32>
    %134 = arith.divf %132, %133 : vector<8x128xf32>
    %135 = arith.mulf %126, %71 : vector<8x128xf32>
    %136 = arith.mulf %120, %128 : vector<8x128xf32>
    %137 = arith.addf %135, %136 : vector<8x128xf32>
    %138 = math.tanh %137 : vector<8x128xf32>
    %139 = arith.mulf %134, %138 : vector<8x128xf32>
    %140 = arith.truncf %139 : vector<8x128xf32> to vector<8x128xbf16>
    %c2_i32 = arith.constant 2 : i32
    %c0_46 = arith.constant 0 : index
    %c0_47 = arith.constant 0 : index
    %141 = vector.load %arg5[%c0_46, %c0_47] : memref<128x512xbf16, #tpu.memory_space<vmem>>, vector<128x512xbf16>
    %cst_48 = arith.constant dense<0.000000e+00> : vector<8x512xf32>
    %142 = tpu.matmul %140, %141, %cst_48 {dimension_numbers = #tpu.dot_dimension_numbers<[1], [0], [0], [1], [0, 0, 1, 1], [], []>} : vector<8x128xbf16>, vector<128x512xbf16>, vector<8x512xf32> -> vector<8x512xf32>
    %143 = arith.index_cast %c2_i32 : i32 to index
    %c0_49 = arith.constant 0 : index
    %c0_50 = arith.constant 0 : index
    %144 = vector.load %arg2[%143, %c0_49, %c0_50] : memref<8x8x512xf32, #tpu.memory_space<vmem>>, vector<1x8x512xf32>
    %145 = vector.shape_cast %144 : vector<1x8x512xf32> to vector<8x512xf32>
    %c0_51 = arith.constant 0 : index
    %c0_52 = arith.constant 0 : index
    %146 = vector.load %arg3[%c0_51, %c0_52] : memref<128x512xbf16, #tpu.memory_space<vmem>>, vector<128x512xbf16>
    %cst_53 = arith.constant dense<0.000000e+00> : vector<8x512xf32>
    %147 = tpu.matmul %108, %146, %cst_53 {dimension_numbers = #tpu.dot_dimension_numbers<[1], [0], [0], [1], [0, 0, 1, 1], [], []>} : vector<8x128xbf16>, vector<128x512xbf16>, vector<8x512xf32> -> vector<8x512xf32>
    %148 = arith.addf %145, %147 : vector<8x512xf32>
    %149 = vector.extract_strided_slice %148 {offsets = [0, 0], sizes = [8, 128], strides = [1, 1]} : vector<8x512xf32> to vector<8x128xf32>
    %150 = arith.negf %149 : vector<8x128xf32>
    %151 = math.exp %150 : vector<8x128xf32>
    %cst_54 = arith.constant 1.000000e+00 : f32
    %152 = vector.broadcast %cst_54 : f32 to vector<8x128xf32>
    %153 = arith.addf %152, %151 : vector<8x128xf32>
    %154 = arith.divf %152, %153 : vector<8x128xf32>
    %155 = vector.extract_strided_slice %148 {offsets = [0, 128], sizes = [8, 128], strides = [1, 1]} : vector<8x512xf32> to vector<8x128xf32>
    %156 = arith.negf %155 : vector<8x128xf32>
    %157 = math.exp %156 : vector<8x128xf32>
    %cst_55 = arith.constant 1.000000e+00 : f32
    %158 = vector.broadcast %cst_55 : f32 to vector<8x128xf32>
    %159 = arith.addf %158, %157 : vector<8x128xf32>
    %160 = arith.divf %158, %159 : vector<8x128xf32>
    %161 = vector.extract_strided_slice %148 {offsets = [0, 256], sizes = [8, 128], strides = [1, 1]} : vector<8x512xf32> to vector<8x128xf32>
    %162 = math.tanh %161 : vector<8x128xf32>
    %163 = vector.extract_strided_slice %148 {offsets = [0, 384], sizes = [8, 128], strides = [1, 1]} : vector<8x512xf32> to vector<8x128xf32>
    %164 = arith.negf %163 : vector<8x128xf32>
    %165 = math.exp %164 : vector<8x128xf32>
    %cst_56 = arith.constant 1.000000e+00 : f32
    %166 = vector.broadcast %cst_56 : f32 to vector<8x128xf32>
    %167 = arith.addf %166, %165 : vector<8x128xf32>
    %168 = arith.divf %166, %167 : vector<8x128xf32>
    %169 = arith.mulf %160, %105 : vector<8x128xf32>
    %170 = arith.mulf %154, %162 : vector<8x128xf32>
    %171 = arith.addf %169, %170 : vector<8x128xf32>
    %172 = math.tanh %171 : vector<8x128xf32>
    %173 = arith.mulf %168, %172 : vector<8x128xf32>
    %174 = arith.truncf %173 : vector<8x128xf32> to vector<8x128xbf16>
    %c0_57 = arith.constant 0 : index
    %c0_58 = arith.constant 0 : index
    %175 = vector.load %arg4[%c0_57, %c0_58] : memref<128x512xbf16, #tpu.memory_space<vmem>>, vector<128x512xbf16>
    %cst_59 = arith.constant dense<0.000000e+00> : vector<8x512xf32>
    %176 = tpu.matmul %174, %175, %cst_59 {dimension_numbers = #tpu.dot_dimension_numbers<[1], [0], [0], [1], [0, 0, 1, 1], [], []>} : vector<8x128xbf16>, vector<128x512xbf16>, vector<8x512xf32> -> vector<8x512xf32>
    %177 = arith.addf %142, %176 : vector<8x512xf32>
    %c0_60 = arith.constant 0 : index
    %c0_61 = arith.constant 0 : index
    %178 = vector.load %arg6[%c0_60, %c0_61] : memref<1x512xf32, #tpu.memory_space<vmem>>, vector<1x512xf32>
    %179 = vector.broadcast %178 : vector<1x512xf32> to vector<8x512xf32>
    %180 = arith.addf %177, %179 : vector<8x512xf32>
    %181 = vector.extract_strided_slice %180 {offsets = [0, 0], sizes = [8, 128], strides = [1, 1]} : vector<8x512xf32> to vector<8x128xf32>
    %182 = arith.negf %181 : vector<8x128xf32>
    %183 = math.exp %182 : vector<8x128xf32>
    %cst_62 = arith.constant 1.000000e+00 : f32
    %184 = vector.broadcast %cst_62 : f32 to vector<8x128xf32>
    %185 = arith.addf %184, %183 : vector<8x128xf32>
    %186 = arith.divf %184, %185 : vector<8x128xf32>
    %187 = vector.extract_strided_slice %180 {offsets = [0, 128], sizes = [8, 128], strides = [1, 1]} : vector<8x512xf32> to vector<8x128xf32>
    %188 = arith.negf %187 : vector<8x128xf32>
    %189 = math.exp %188 : vector<8x128xf32>
    %cst_63 = arith.constant 1.000000e+00 : f32
    %190 = vector.broadcast %cst_63 : f32 to vector<8x128xf32>
    %191 = arith.addf %190, %189 : vector<8x128xf32>
    %192 = arith.divf %190, %191 : vector<8x128xf32>
    %193 = vector.extract_strided_slice %180 {offsets = [0, 256], sizes = [8, 128], strides = [1, 1]} : vector<8x512xf32> to vector<8x128xf32>
    %194 = math.tanh %193 : vector<8x128xf32>
    %195 = vector.extract_strided_slice %180 {offsets = [0, 384], sizes = [8, 128], strides = [1, 1]} : vector<8x512xf32> to vector<8x128xf32>
    %196 = arith.negf %195 : vector<8x128xf32>
    %197 = math.exp %196 : vector<8x128xf32>
    %cst_64 = arith.constant 1.000000e+00 : f32
    %198 = vector.broadcast %cst_64 : f32 to vector<8x128xf32>
    %199 = arith.addf %198, %197 : vector<8x128xf32>
    %200 = arith.divf %198, %199 : vector<8x128xf32>
    %201 = arith.mulf %192, %137 : vector<8x128xf32>
    %202 = arith.mulf %186, %194 : vector<8x128xf32>
    %203 = arith.addf %201, %202 : vector<8x128xf32>
    %204 = math.tanh %203 : vector<8x128xf32>
    %205 = arith.mulf %200, %204 : vector<8x128xf32>
    %206 = arith.truncf %205 : vector<8x128xf32> to vector<8x128xbf16>
    %c3_i32 = arith.constant 3 : i32
    %c0_65 = arith.constant 0 : index
    %c0_66 = arith.constant 0 : index
    %207 = vector.load %arg5[%c0_65, %c0_66] : memref<128x512xbf16, #tpu.memory_space<vmem>>, vector<128x512xbf16>
    %cst_67 = arith.constant dense<0.000000e+00> : vector<8x512xf32>
    %208 = tpu.matmul %206, %207, %cst_67 {dimension_numbers = #tpu.dot_dimension_numbers<[1], [0], [0], [1], [0, 0, 1, 1], [], []>} : vector<8x128xbf16>, vector<128x512xbf16>, vector<8x512xf32> -> vector<8x512xf32>
    %209 = arith.index_cast %c3_i32 : i32 to index
    %c0_68 = arith.constant 0 : index
    %c0_69 = arith.constant 0 : index
    %210 = vector.load %arg2[%209, %c0_68, %c0_69] : memref<8x8x512xf32, #tpu.memory_space<vmem>>, vector<1x8x512xf32>
    %211 = vector.shape_cast %210 : vector<1x8x512xf32> to vector<8x512xf32>
    %c0_70 = arith.constant 0 : index
    %c0_71 = arith.constant 0 : index
    %212 = vector.load %arg3[%c0_70, %c0_71] : memref<128x512xbf16, #tpu.memory_space<vmem>>, vector<128x512xbf16>
    %cst_72 = arith.constant dense<0.000000e+00> : vector<8x512xf32>
    %213 = tpu.matmul %174, %212, %cst_72 {dimension_numbers = #tpu.dot_dimension_numbers<[1], [0], [0], [1], [0, 0, 1, 1], [], []>} : vector<8x128xbf16>, vector<128x512xbf16>, vector<8x512xf32> -> vector<8x512xf32>
    %214 = arith.addf %211, %213 : vector<8x512xf32>
    %215 = vector.extract_strided_slice %214 {offsets = [0, 0], sizes = [8, 128], strides = [1, 1]} : vector<8x512xf32> to vector<8x128xf32>
    %216 = arith.negf %215 : vector<8x128xf32>
    %217 = math.exp %216 : vector<8x128xf32>
    %cst_73 = arith.constant 1.000000e+00 : f32
    %218 = vector.broadcast %cst_73 : f32 to vector<8x128xf32>
    %219 = arith.addf %218, %217 : vector<8x128xf32>
    %220 = arith.divf %218, %219 : vector<8x128xf32>
    %221 = vector.extract_strided_slice %214 {offsets = [0, 128], sizes = [8, 128], strides = [1, 1]} : vector<8x512xf32> to vector<8x128xf32>
    %222 = arith.negf %221 : vector<8x128xf32>
    %223 = math.exp %222 : vector<8x128xf32>
    %cst_74 = arith.constant 1.000000e+00 : f32
    %224 = vector.broadcast %cst_74 : f32 to vector<8x128xf32>
    %225 = arith.addf %224, %223 : vector<8x128xf32>
    %226 = arith.divf %224, %225 : vector<8x128xf32>
    %227 = vector.extract_strided_slice %214 {offsets = [0, 256], sizes = [8, 128], strides = [1, 1]} : vector<8x512xf32> to vector<8x128xf32>
    %228 = math.tanh %227 : vector<8x128xf32>
    %229 = vector.extract_strided_slice %214 {offsets = [0, 384], sizes = [8, 128], strides = [1, 1]} : vector<8x512xf32> to vector<8x128xf32>
    %230 = arith.negf %229 : vector<8x128xf32>
    %231 = math.exp %230 : vector<8x128xf32>
    %cst_75 = arith.constant 1.000000e+00 : f32
    %232 = vector.broadcast %cst_75 : f32 to vector<8x128xf32>
    %233 = arith.addf %232, %231 : vector<8x128xf32>
    %234 = arith.divf %232, %233 : vector<8x128xf32>
    %235 = arith.mulf %226, %171 : vector<8x128xf32>
    %236 = arith.mulf %220, %228 : vector<8x128xf32>
    %237 = arith.addf %235, %236 : vector<8x128xf32>
    %238 = math.tanh %237 : vector<8x128xf32>
    %239 = arith.mulf %234, %238 : vector<8x128xf32>
    %240 = arith.truncf %239 : vector<8x128xf32> to vector<8x128xbf16>
    %c0_76 = arith.constant 0 : index
    %c0_77 = arith.constant 0 : index
    %241 = vector.load %arg4[%c0_76, %c0_77] : memref<128x512xbf16, #tpu.memory_space<vmem>>, vector<128x512xbf16>
    %cst_78 = arith.constant dense<0.000000e+00> : vector<8x512xf32>
    %242 = tpu.matmul %240, %241, %cst_78 {dimension_numbers = #tpu.dot_dimension_numbers<[1], [0], [0], [1], [0, 0, 1, 1], [], []>} : vector<8x128xbf16>, vector<128x512xbf16>, vector<8x512xf32> -> vector<8x512xf32>
    %243 = arith.addf %208, %242 : vector<8x512xf32>
    %c0_79 = arith.constant 0 : index
    %c0_80 = arith.constant 0 : index
    %244 = vector.load %arg6[%c0_79, %c0_80] : memref<1x512xf32, #tpu.memory_space<vmem>>, vector<1x512xf32>
    %245 = vector.broadcast %244 : vector<1x512xf32> to vector<8x512xf32>
    %246 = arith.addf %243, %245 : vector<8x512xf32>
    %247 = vector.extract_strided_slice %246 {offsets = [0, 0], sizes = [8, 128], strides = [1, 1]} : vector<8x512xf32> to vector<8x128xf32>
    %248 = arith.negf %247 : vector<8x128xf32>
    %249 = math.exp %248 : vector<8x128xf32>
    %cst_81 = arith.constant 1.000000e+00 : f32
    %250 = vector.broadcast %cst_81 : f32 to vector<8x128xf32>
    %251 = arith.addf %250, %249 : vector<8x128xf32>
    %252 = arith.divf %250, %251 : vector<8x128xf32>
    %253 = vector.extract_strided_slice %246 {offsets = [0, 128], sizes = [8, 128], strides = [1, 1]} : vector<8x512xf32> to vector<8x128xf32>
    %254 = arith.negf %253 : vector<8x128xf32>
    %255 = math.exp %254 : vector<8x128xf32>
    %cst_82 = arith.constant 1.000000e+00 : f32
    %256 = vector.broadcast %cst_82 : f32 to vector<8x128xf32>
    %257 = arith.addf %256, %255 : vector<8x128xf32>
    %258 = arith.divf %256, %257 : vector<8x128xf32>
    %259 = vector.extract_strided_slice %246 {offsets = [0, 256], sizes = [8, 128], strides = [1, 1]} : vector<8x512xf32> to vector<8x128xf32>
    %260 = math.tanh %259 : vector<8x128xf32>
    %261 = vector.extract_strided_slice %246 {offsets = [0, 384], sizes = [8, 128], strides = [1, 1]} : vector<8x512xf32> to vector<8x128xf32>
    %262 = arith.negf %261 : vector<8x128xf32>
    %263 = math.exp %262 : vector<8x128xf32>
    %cst_83 = arith.constant 1.000000e+00 : f32
    %264 = vector.broadcast %cst_83 : f32 to vector<8x128xf32>
    %265 = arith.addf %264, %263 : vector<8x128xf32>
    %266 = arith.divf %264, %265 : vector<8x128xf32>
    %267 = arith.mulf %258, %203 : vector<8x128xf32>
    %268 = arith.mulf %252, %260 : vector<8x128xf32>
    %269 = arith.addf %267, %268 : vector<8x128xf32>
    %270 = math.tanh %269 : vector<8x128xf32>
    %271 = arith.mulf %266, %270 : vector<8x128xf32>
    %272 = arith.truncf %271 : vector<8x128xf32> to vector<8x128xbf16>
    %c4_i32 = arith.constant 4 : i32
    %c0_84 = arith.constant 0 : index
    %c0_85 = arith.constant 0 : index
    %273 = vector.load %arg5[%c0_84, %c0_85] : memref<128x512xbf16, #tpu.memory_space<vmem>>, vector<128x512xbf16>
    %cst_86 = arith.constant dense<0.000000e+00> : vector<8x512xf32>
    %274 = tpu.matmul %272, %273, %cst_86 {dimension_numbers = #tpu.dot_dimension_numbers<[1], [0], [0], [1], [0, 0, 1, 1], [], []>} : vector<8x128xbf16>, vector<128x512xbf16>, vector<8x512xf32> -> vector<8x512xf32>
    %275 = arith.index_cast %c4_i32 : i32 to index
    %c0_87 = arith.constant 0 : index
    %c0_88 = arith.constant 0 : index
    %276 = vector.load %arg2[%275, %c0_87, %c0_88] : memref<8x8x512xf32, #tpu.memory_space<vmem>>, vector<1x8x512xf32>
    %277 = vector.shape_cast %276 : vector<1x8x512xf32> to vector<8x512xf32>
    %c0_89 = arith.constant 0 : index
    %c0_90 = arith.constant 0 : index
    %278 = vector.load %arg3[%c0_89, %c0_90] : memref<128x512xbf16, #tpu.memory_space<vmem>>, vector<128x512xbf16>
    %cst_91 = arith.constant dense<0.000000e+00> : vector<8x512xf32>
    %279 = tpu.matmul %240, %278, %cst_91 {dimension_numbers = #tpu.dot_dimension_numbers<[1], [0], [0], [1], [0, 0, 1, 1], [], []>} : vector<8x128xbf16>, vector<128x512xbf16>, vector<8x512xf32> -> vector<8x512xf32>
    %280 = arith.addf %277, %279 : vector<8x512xf32>
    %281 = vector.extract_strided_slice %280 {offsets = [0, 0], sizes = [8, 128], strides = [1, 1]} : vector<8x512xf32> to vector<8x128xf32>
    %282 = arith.negf %281 : vector<8x128xf32>
    %283 = math.exp %282 : vector<8x128xf32>
    %cst_92 = arith.constant 1.000000e+00 : f32
    %284 = vector.broadcast %cst_92 : f32 to vector<8x128xf32>
    %285 = arith.addf %284, %283 : vector<8x128xf32>
    %286 = arith.divf %284, %285 : vector<8x128xf32>
    %287 = vector.extract_strided_slice %280 {offsets = [0, 128], sizes = [8, 128], strides = [1, 1]} : vector<8x512xf32> to vector<8x128xf32>
    %288 = arith.negf %287 : vector<8x128xf32>
    %289 = math.exp %288 : vector<8x128xf32>
    %cst_93 = arith.constant 1.000000e+00 : f32
    %290 = vector.broadcast %cst_93 : f32 to vector<8x128xf32>
    %291 = arith.addf %290, %289 : vector<8x128xf32>
    %292 = arith.divf %290, %291 : vector<8x128xf32>
    %293 = vector.extract_strided_slice %280 {offsets = [0, 256], sizes = [8, 128], strides = [1, 1]} : vector<8x512xf32> to vector<8x128xf32>
    %294 = math.tanh %293 : vector<8x128xf32>
    %295 = vector.extract_strided_slice %280 {offsets = [0, 384], sizes = [8, 128], strides = [1, 1]} : vector<8x512xf32> to vector<8x128xf32>
    %296 = arith.negf %295 : vector<8x128xf32>
    %297 = math.exp %296 : vector<8x128xf32>
    %cst_94 = arith.constant 1.000000e+00 : f32
    %298 = vector.broadcast %cst_94 : f32 to vector<8x128xf32>
    %299 = arith.addf %298, %297 : vector<8x128xf32>
    %300 = arith.divf %298, %299 : vector<8x128xf32>
    %301 = arith.mulf %292, %237 : vector<8x128xf32>
    %302 = arith.mulf %286, %294 : vector<8x128xf32>
    %303 = arith.addf %301, %302 : vector<8x128xf32>
    %304 = math.tanh %303 : vector<8x128xf32>
    %305 = arith.mulf %300, %304 : vector<8x128xf32>
    %306 = arith.truncf %305 : vector<8x128xf32> to vector<8x128xbf16>
    %c0_95 = arith.constant 0 : index
    %c0_96 = arith.constant 0 : index
    %307 = vector.load %arg4[%c0_95, %c0_96] : memref<128x512xbf16, #tpu.memory_space<vmem>>, vector<128x512xbf16>
    %cst_97 = arith.constant dense<0.000000e+00> : vector<8x512xf32>
    %308 = tpu.matmul %306, %307, %cst_97 {dimension_numbers = #tpu.dot_dimension_numbers<[1], [0], [0], [1], [0, 0, 1, 1], [], []>} : vector<8x128xbf16>, vector<128x512xbf16>, vector<8x512xf32> -> vector<8x512xf32>
    %309 = arith.addf %274, %308 : vector<8x512xf32>
    %c0_98 = arith.constant 0 : index
    %c0_99 = arith.constant 0 : index
    %310 = vector.load %arg6[%c0_98, %c0_99] : memref<1x512xf32, #tpu.memory_space<vmem>>, vector<1x512xf32>
    %311 = vector.broadcast %310 : vector<1x512xf32> to vector<8x512xf32>
    %312 = arith.addf %309, %311 : vector<8x512xf32>
    %313 = vector.extract_strided_slice %312 {offsets = [0, 0], sizes = [8, 128], strides = [1, 1]} : vector<8x512xf32> to vector<8x128xf32>
    %314 = arith.negf %313 : vector<8x128xf32>
    %315 = math.exp %314 : vector<8x128xf32>
    %cst_100 = arith.constant 1.000000e+00 : f32
    %316 = vector.broadcast %cst_100 : f32 to vector<8x128xf32>
    %317 = arith.addf %316, %315 : vector<8x128xf32>
    %318 = arith.divf %316, %317 : vector<8x128xf32>
    %319 = vector.extract_strided_slice %312 {offsets = [0, 128], sizes = [8, 128], strides = [1, 1]} : vector<8x512xf32> to vector<8x128xf32>
    %320 = arith.negf %319 : vector<8x128xf32>
    %321 = math.exp %320 : vector<8x128xf32>
    %cst_101 = arith.constant 1.000000e+00 : f32
    %322 = vector.broadcast %cst_101 : f32 to vector<8x128xf32>
    %323 = arith.addf %322, %321 : vector<8x128xf32>
    %324 = arith.divf %322, %323 : vector<8x128xf32>
    %325 = vector.extract_strided_slice %312 {offsets = [0, 256], sizes = [8, 128], strides = [1, 1]} : vector<8x512xf32> to vector<8x128xf32>
    %326 = math.tanh %325 : vector<8x128xf32>
    %327 = vector.extract_strided_slice %312 {offsets = [0, 384], sizes = [8, 128], strides = [1, 1]} : vector<8x512xf32> to vector<8x128xf32>
    %328 = arith.negf %327 : vector<8x128xf32>
    %329 = math.exp %328 : vector<8x128xf32>
    %cst_102 = arith.constant 1.000000e+00 : f32
    %330 = vector.broadcast %cst_102 : f32 to vector<8x128xf32>
    %331 = arith.addf %330, %329 : vector<8x128xf32>
    %332 = arith.divf %330, %331 : vector<8x128xf32>
    %333 = arith.mulf %324, %269 : vector<8x128xf32>
    %334 = arith.mulf %318, %326 : vector<8x128xf32>
    %335 = arith.addf %333, %334 : vector<8x128xf32>
    %336 = math.tanh %335 : vector<8x128xf32>
    %337 = arith.mulf %332, %336 : vector<8x128xf32>
    %338 = arith.truncf %337 : vector<8x128xf32> to vector<8x128xbf16>
    %c5_i32 = arith.constant 5 : i32
    %c0_103 = arith.constant 0 : index
    %c0_104 = arith.constant 0 : index
    %339 = vector.load %arg5[%c0_103, %c0_104] : memref<128x512xbf16, #tpu.memory_space<vmem>>, vector<128x512xbf16>
    %cst_105 = arith.constant dense<0.000000e+00> : vector<8x512xf32>
    %340 = tpu.matmul %338, %339, %cst_105 {dimension_numbers = #tpu.dot_dimension_numbers<[1], [0], [0], [1], [0, 0, 1, 1], [], []>} : vector<8x128xbf16>, vector<128x512xbf16>, vector<8x512xf32> -> vector<8x512xf32>
    %341 = arith.index_cast %c5_i32 : i32 to index
    %c0_106 = arith.constant 0 : index
    %c0_107 = arith.constant 0 : index
    %342 = vector.load %arg2[%341, %c0_106, %c0_107] : memref<8x8x512xf32, #tpu.memory_space<vmem>>, vector<1x8x512xf32>
    %343 = vector.shape_cast %342 : vector<1x8x512xf32> to vector<8x512xf32>
    %c0_108 = arith.constant 0 : index
    %c0_109 = arith.constant 0 : index
    %344 = vector.load %arg3[%c0_108, %c0_109] : memref<128x512xbf16, #tpu.memory_space<vmem>>, vector<128x512xbf16>
    %cst_110 = arith.constant dense<0.000000e+00> : vector<8x512xf32>
    %345 = tpu.matmul %306, %344, %cst_110 {dimension_numbers = #tpu.dot_dimension_numbers<[1], [0], [0], [1], [0, 0, 1, 1], [], []>} : vector<8x128xbf16>, vector<128x512xbf16>, vector<8x512xf32> -> vector<8x512xf32>
    %346 = arith.addf %343, %345 : vector<8x512xf32>
    %347 = vector.extract_strided_slice %346 {offsets = [0, 0], sizes = [8, 128], strides = [1, 1]} : vector<8x512xf32> to vector<8x128xf32>
    %348 = arith.negf %347 : vector<8x128xf32>
    %349 = math.exp %348 : vector<8x128xf32>
    %cst_111 = arith.constant 1.000000e+00 : f32
    %350 = vector.broadcast %cst_111 : f32 to vector<8x128xf32>
    %351 = arith.addf %350, %349 : vector<8x128xf32>
    %352 = arith.divf %350, %351 : vector<8x128xf32>
    %353 = vector.extract_strided_slice %346 {offsets = [0, 128], sizes = [8, 128], strides = [1, 1]} : vector<8x512xf32> to vector<8x128xf32>
    %354 = arith.negf %353 : vector<8x128xf32>
    %355 = math.exp %354 : vector<8x128xf32>
    %cst_112 = arith.constant 1.000000e+00 : f32
    %356 = vector.broadcast %cst_112 : f32 to vector<8x128xf32>
    %357 = arith.addf %356, %355 : vector<8x128xf32>
    %358 = arith.divf %356, %357 : vector<8x128xf32>
    %359 = vector.extract_strided_slice %346 {offsets = [0, 256], sizes = [8, 128], strides = [1, 1]} : vector<8x512xf32> to vector<8x128xf32>
    %360 = math.tanh %359 : vector<8x128xf32>
    %361 = vector.extract_strided_slice %346 {offsets = [0, 384], sizes = [8, 128], strides = [1, 1]} : vector<8x512xf32> to vector<8x128xf32>
    %362 = arith.negf %361 : vector<8x128xf32>
    %363 = math.exp %362 : vector<8x128xf32>
    %cst_113 = arith.constant 1.000000e+00 : f32
    %364 = vector.broadcast %cst_113 : f32 to vector<8x128xf32>
    %365 = arith.addf %364, %363 : vector<8x128xf32>
    %366 = arith.divf %364, %365 : vector<8x128xf32>
    %367 = arith.mulf %358, %303 : vector<8x128xf32>
    %368 = arith.mulf %352, %360 : vector<8x128xf32>
    %369 = arith.addf %367, %368 : vector<8x128xf32>
    %370 = math.tanh %369 : vector<8x128xf32>
    %371 = arith.mulf %366, %370 : vector<8x128xf32>
    %372 = arith.truncf %371 : vector<8x128xf32> to vector<8x128xbf16>
    %c0_114 = arith.constant 0 : index
    %c0_115 = arith.constant 0 : index
    %373 = vector.load %arg4[%c0_114, %c0_115] : memref<128x512xbf16, #tpu.memory_space<vmem>>, vector<128x512xbf16>
    %cst_116 = arith.constant dense<0.000000e+00> : vector<8x512xf32>
    %374 = tpu.matmul %372, %373, %cst_116 {dimension_numbers = #tpu.dot_dimension_numbers<[1], [0], [0], [1], [0, 0, 1, 1], [], []>} : vector<8x128xbf16>, vector<128x512xbf16>, vector<8x512xf32> -> vector<8x512xf32>
    %375 = arith.addf %340, %374 : vector<8x512xf32>
    %c0_117 = arith.constant 0 : index
    %c0_118 = arith.constant 0 : index
    %376 = vector.load %arg6[%c0_117, %c0_118] : memref<1x512xf32, #tpu.memory_space<vmem>>, vector<1x512xf32>
    %377 = vector.broadcast %376 : vector<1x512xf32> to vector<8x512xf32>
    %378 = arith.addf %375, %377 : vector<8x512xf32>
    %379 = vector.extract_strided_slice %378 {offsets = [0, 0], sizes = [8, 128], strides = [1, 1]} : vector<8x512xf32> to vector<8x128xf32>
    %380 = arith.negf %379 : vector<8x128xf32>
    %381 = math.exp %380 : vector<8x128xf32>
    %cst_119 = arith.constant 1.000000e+00 : f32
    %382 = vector.broadcast %cst_119 : f32 to vector<8x128xf32>
    %383 = arith.addf %382, %381 : vector<8x128xf32>
    %384 = arith.divf %382, %383 : vector<8x128xf32>
    %385 = vector.extract_strided_slice %378 {offsets = [0, 128], sizes = [8, 128], strides = [1, 1]} : vector<8x512xf32> to vector<8x128xf32>
    %386 = arith.negf %385 : vector<8x128xf32>
    %387 = math.exp %386 : vector<8x128xf32>
    %cst_120 = arith.constant 1.000000e+00 : f32
    %388 = vector.broadcast %cst_120 : f32 to vector<8x128xf32>
    %389 = arith.addf %388, %387 : vector<8x128xf32>
    %390 = arith.divf %388, %389 : vector<8x128xf32>
    %391 = vector.extract_strided_slice %378 {offsets = [0, 256], sizes = [8, 128], strides = [1, 1]} : vector<8x512xf32> to vector<8x128xf32>
    %392 = math.tanh %391 : vector<8x128xf32>
    %393 = vector.extract_strided_slice %378 {offsets = [0, 384], sizes = [8, 128], strides = [1, 1]} : vector<8x512xf32> to vector<8x128xf32>
    %394 = arith.negf %393 : vector<8x128xf32>
    %395 = math.exp %394 : vector<8x128xf32>
    %cst_121 = arith.constant 1.000000e+00 : f32
    %396 = vector.broadcast %cst_121 : f32 to vector<8x128xf32>
    %397 = arith.addf %396, %395 : vector<8x128xf32>
    %398 = arith.divf %396, %397 : vector<8x128xf32>
    %399 = arith.mulf %390, %335 : vector<8x128xf32>
    %400 = arith.mulf %384, %392 : vector<8x128xf32>
    %401 = arith.addf %399, %400 : vector<8x128xf32>
    %402 = math.tanh %401 : vector<8x128xf32>
    %403 = arith.mulf %398, %402 : vector<8x128xf32>
    %404 = arith.truncf %403 : vector<8x128xf32> to vector<8x128xbf16>
    %c6_i32 = arith.constant 6 : i32
    %c0_122 = arith.constant 0 : index
    %c0_123 = arith.constant 0 : index
    %405 = vector.load %arg5[%c0_122, %c0_123] : memref<128x512xbf16, #tpu.memory_space<vmem>>, vector<128x512xbf16>
    %cst_124 = arith.constant dense<0.000000e+00> : vector<8x512xf32>
    %406 = tpu.matmul %404, %405, %cst_124 {dimension_numbers = #tpu.dot_dimension_numbers<[1], [0], [0], [1], [0, 0, 1, 1], [], []>} : vector<8x128xbf16>, vector<128x512xbf16>, vector<8x512xf32> -> vector<8x512xf32>
    %407 = arith.index_cast %c6_i32 : i32 to index
    %c0_125 = arith.constant 0 : index
    %c0_126 = arith.constant 0 : index
    %408 = vector.load %arg2[%407, %c0_125, %c0_126] : memref<8x8x512xf32, #tpu.memory_space<vmem>>, vector<1x8x512xf32>
    %409 = vector.shape_cast %408 : vector<1x8x512xf32> to vector<8x512xf32>
    %c0_127 = arith.constant 0 : index
    %c0_128 = arith.constant 0 : index
    %410 = vector.load %arg3[%c0_127, %c0_128] : memref<128x512xbf16, #tpu.memory_space<vmem>>, vector<128x512xbf16>
    %cst_129 = arith.constant dense<0.000000e+00> : vector<8x512xf32>
    %411 = tpu.matmul %372, %410, %cst_129 {dimension_numbers = #tpu.dot_dimension_numbers<[1], [0], [0], [1], [0, 0, 1, 1], [], []>} : vector<8x128xbf16>, vector<128x512xbf16>, vector<8x512xf32> -> vector<8x512xf32>
    %412 = arith.addf %409, %411 : vector<8x512xf32>
    %413 = vector.extract_strided_slice %412 {offsets = [0, 0], sizes = [8, 128], strides = [1, 1]} : vector<8x512xf32> to vector<8x128xf32>
    %414 = arith.negf %413 : vector<8x128xf32>
    %415 = math.exp %414 : vector<8x128xf32>
    %cst_130 = arith.constant 1.000000e+00 : f32
    %416 = vector.broadcast %cst_130 : f32 to vector<8x128xf32>
    %417 = arith.addf %416, %415 : vector<8x128xf32>
    %418 = arith.divf %416, %417 : vector<8x128xf32>
    %419 = vector.extract_strided_slice %412 {offsets = [0, 128], sizes = [8, 128], strides = [1, 1]} : vector<8x512xf32> to vector<8x128xf32>
    %420 = arith.negf %419 : vector<8x128xf32>
    %421 = math.exp %420 : vector<8x128xf32>
    %cst_131 = arith.constant 1.000000e+00 : f32
    %422 = vector.broadcast %cst_131 : f32 to vector<8x128xf32>
    %423 = arith.addf %422, %421 : vector<8x128xf32>
    %424 = arith.divf %422, %423 : vector<8x128xf32>
    %425 = vector.extract_strided_slice %412 {offsets = [0, 256], sizes = [8, 128], strides = [1, 1]} : vector<8x512xf32> to vector<8x128xf32>
    %426 = math.tanh %425 : vector<8x128xf32>
    %427 = vector.extract_strided_slice %412 {offsets = [0, 384], sizes = [8, 128], strides = [1, 1]} : vector<8x512xf32> to vector<8x128xf32>
    %428 = arith.negf %427 : vector<8x128xf32>
    %429 = math.exp %428 : vector<8x128xf32>
    %cst_132 = arith.constant 1.000000e+00 : f32
    %430 = vector.broadcast %cst_132 : f32 to vector<8x128xf32>
    %431 = arith.addf %430, %429 : vector<8x128xf32>
    %432 = arith.divf %430, %431 : vector<8x128xf32>
    %433 = arith.mulf %424, %369 : vector<8x128xf32>
    %434 = arith.mulf %418, %426 : vector<8x128xf32>
    %435 = arith.addf %433, %434 : vector<8x128xf32>
    %436 = math.tanh %435 : vector<8x128xf32>
    %437 = arith.mulf %432, %436 : vector<8x128xf32>
    %438 = arith.truncf %437 : vector<8x128xf32> to vector<8x128xbf16>
    %c0_133 = arith.constant 0 : index
    %c0_134 = arith.constant 0 : index
    %439 = vector.load %arg4[%c0_133, %c0_134] : memref<128x512xbf16, #tpu.memory_space<vmem>>, vector<128x512xbf16>
    %cst_135 = arith.constant dense<0.000000e+00> : vector<8x512xf32>
    %440 = tpu.matmul %438, %439, %cst_135 {dimension_numbers = #tpu.dot_dimension_numbers<[1], [0], [0], [1], [0, 0, 1, 1], [], []>} : vector<8x128xbf16>, vector<128x512xbf16>, vector<8x512xf32> -> vector<8x512xf32>
    %441 = arith.addf %406, %440 : vector<8x512xf32>
    %c0_136 = arith.constant 0 : index
    %c0_137 = arith.constant 0 : index
    %442 = vector.load %arg6[%c0_136, %c0_137] : memref<1x512xf32, #tpu.memory_space<vmem>>, vector<1x512xf32>
    %443 = vector.broadcast %442 : vector<1x512xf32> to vector<8x512xf32>
    %444 = arith.addf %441, %443 : vector<8x512xf32>
    %445 = vector.extract_strided_slice %444 {offsets = [0, 0], sizes = [8, 128], strides = [1, 1]} : vector<8x512xf32> to vector<8x128xf32>
    %446 = arith.negf %445 : vector<8x128xf32>
    %447 = math.exp %446 : vector<8x128xf32>
    %cst_138 = arith.constant 1.000000e+00 : f32
    %448 = vector.broadcast %cst_138 : f32 to vector<8x128xf32>
    %449 = arith.addf %448, %447 : vector<8x128xf32>
    %450 = arith.divf %448, %449 : vector<8x128xf32>
    %451 = vector.extract_strided_slice %444 {offsets = [0, 128], sizes = [8, 128], strides = [1, 1]} : vector<8x512xf32> to vector<8x128xf32>
    %452 = arith.negf %451 : vector<8x128xf32>
    %453 = math.exp %452 : vector<8x128xf32>
    %cst_139 = arith.constant 1.000000e+00 : f32
    %454 = vector.broadcast %cst_139 : f32 to vector<8x128xf32>
    %455 = arith.addf %454, %453 : vector<8x128xf32>
    %456 = arith.divf %454, %455 : vector<8x128xf32>
    %457 = vector.extract_strided_slice %444 {offsets = [0, 256], sizes = [8, 128], strides = [1, 1]} : vector<8x512xf32> to vector<8x128xf32>
    %458 = math.tanh %457 : vector<8x128xf32>
    %459 = vector.extract_strided_slice %444 {offsets = [0, 384], sizes = [8, 128], strides = [1, 1]} : vector<8x512xf32> to vector<8x128xf32>
    %460 = arith.negf %459 : vector<8x128xf32>
    %461 = math.exp %460 : vector<8x128xf32>
    %cst_140 = arith.constant 1.000000e+00 : f32
    %462 = vector.broadcast %cst_140 : f32 to vector<8x128xf32>
    %463 = arith.addf %462, %461 : vector<8x128xf32>
    %464 = arith.divf %462, %463 : vector<8x128xf32>
    %465 = arith.mulf %456, %401 : vector<8x128xf32>
    %466 = arith.mulf %450, %458 : vector<8x128xf32>
    %467 = arith.addf %465, %466 : vector<8x128xf32>
    %468 = math.tanh %467 : vector<8x128xf32>
    %469 = arith.mulf %464, %468 : vector<8x128xf32>
    %470 = arith.truncf %469 : vector<8x128xf32> to vector<8x128xbf16>
    %c7_i32 = arith.constant 7 : i32
    %c0_141 = arith.constant 0 : index
    %c0_142 = arith.constant 0 : index
    %471 = vector.load %arg5[%c0_141, %c0_142] : memref<128x512xbf16, #tpu.memory_space<vmem>>, vector<128x512xbf16>
    %cst_143 = arith.constant dense<0.000000e+00> : vector<8x512xf32>
    %472 = tpu.matmul %470, %471, %cst_143 {dimension_numbers = #tpu.dot_dimension_numbers<[1], [0], [0], [1], [0, 0, 1, 1], [], []>} : vector<8x128xbf16>, vector<128x512xbf16>, vector<8x512xf32> -> vector<8x512xf32>
    %473 = arith.index_cast %c7_i32 : i32 to index
    %c0_144 = arith.constant 0 : index
    %c0_145 = arith.constant 0 : index
    %474 = vector.load %arg2[%473, %c0_144, %c0_145] : memref<8x8x512xf32, #tpu.memory_space<vmem>>, vector<1x8x512xf32>
    %475 = vector.shape_cast %474 : vector<1x8x512xf32> to vector<8x512xf32>
    %c0_146 = arith.constant 0 : index
    %c0_147 = arith.constant 0 : index
    %476 = vector.load %arg3[%c0_146, %c0_147] : memref<128x512xbf16, #tpu.memory_space<vmem>>, vector<128x512xbf16>
    %cst_148 = arith.constant dense<0.000000e+00> : vector<8x512xf32>
    %477 = tpu.matmul %438, %476, %cst_148 {dimension_numbers = #tpu.dot_dimension_numbers<[1], [0], [0], [1], [0, 0, 1, 1], [], []>} : vector<8x128xbf16>, vector<128x512xbf16>, vector<8x512xf32> -> vector<8x512xf32>
    %478 = arith.addf %475, %477 : vector<8x512xf32>
    %479 = vector.extract_strided_slice %478 {offsets = [0, 0], sizes = [8, 128], strides = [1, 1]} : vector<8x512xf32> to vector<8x128xf32>
    %480 = arith.negf %479 : vector<8x128xf32>
    %481 = math.exp %480 : vector<8x128xf32>
    %cst_149 = arith.constant 1.000000e+00 : f32
    %482 = vector.broadcast %cst_149 : f32 to vector<8x128xf32>
    %483 = arith.addf %482, %481 : vector<8x128xf32>
    %484 = arith.divf %482, %483 : vector<8x128xf32>
    %485 = vector.extract_strided_slice %478 {offsets = [0, 128], sizes = [8, 128], strides = [1, 1]} : vector<8x512xf32> to vector<8x128xf32>
    %486 = arith.negf %485 : vector<8x128xf32>
    %487 = math.exp %486 : vector<8x128xf32>
    %cst_150 = arith.constant 1.000000e+00 : f32
    %488 = vector.broadcast %cst_150 : f32 to vector<8x128xf32>
    %489 = arith.addf %488, %487 : vector<8x128xf32>
    %490 = arith.divf %488, %489 : vector<8x128xf32>
    %491 = vector.extract_strided_slice %478 {offsets = [0, 256], sizes = [8, 128], strides = [1, 1]} : vector<8x512xf32> to vector<8x128xf32>
    %492 = math.tanh %491 : vector<8x128xf32>
    %493 = vector.extract_strided_slice %478 {offsets = [0, 384], sizes = [8, 128], strides = [1, 1]} : vector<8x512xf32> to vector<8x128xf32>
    %494 = arith.negf %493 : vector<8x128xf32>
    %495 = math.exp %494 : vector<8x128xf32>
    %cst_151 = arith.constant 1.000000e+00 : f32
    %496 = vector.broadcast %cst_151 : f32 to vector<8x128xf32>
    %497 = arith.addf %496, %495 : vector<8x128xf32>
    %498 = arith.divf %496, %497 : vector<8x128xf32>
    %499 = arith.mulf %490, %435 : vector<8x128xf32>
    %500 = arith.mulf %484, %492 : vector<8x128xf32>
    %501 = arith.addf %499, %500 : vector<8x128xf32>
    %502 = math.tanh %501 : vector<8x128xf32>
    %503 = arith.mulf %498, %502 : vector<8x128xf32>
    %504 = arith.truncf %503 : vector<8x128xf32> to vector<8x128xbf16>
    %c0_152 = arith.constant 0 : index
    %c0_153 = arith.constant 0 : index
    %505 = vector.load %arg4[%c0_152, %c0_153] : memref<128x512xbf16, #tpu.memory_space<vmem>>, vector<128x512xbf16>
    %cst_154 = arith.constant dense<0.000000e+00> : vector<8x512xf32>
    %506 = tpu.matmul %504, %505, %cst_154 {dimension_numbers = #tpu.dot_dimension_numbers<[1], [0], [0], [1], [0, 0, 1, 1], [], []>} : vector<8x128xbf16>, vector<128x512xbf16>, vector<8x512xf32> -> vector<8x512xf32>
    %507 = arith.addf %472, %506 : vector<8x512xf32>
    %c0_155 = arith.constant 0 : index
    %c0_156 = arith.constant 0 : index
    %508 = vector.load %arg6[%c0_155, %c0_156] : memref<1x512xf32, #tpu.memory_space<vmem>>, vector<1x512xf32>
    %509 = vector.broadcast %508 : vector<1x512xf32> to vector<8x512xf32>
    %510 = arith.addf %507, %509 : vector<8x512xf32>
    %511 = vector.extract_strided_slice %510 {offsets = [0, 0], sizes = [8, 128], strides = [1, 1]} : vector<8x512xf32> to vector<8x128xf32>
    %512 = arith.negf %511 : vector<8x128xf32>
    %513 = math.exp %512 : vector<8x128xf32>
    %cst_157 = arith.constant 1.000000e+00 : f32
    %514 = vector.broadcast %cst_157 : f32 to vector<8x128xf32>
    %515 = arith.addf %514, %513 : vector<8x128xf32>
    %516 = arith.divf %514, %515 : vector<8x128xf32>
    %517 = vector.extract_strided_slice %510 {offsets = [0, 128], sizes = [8, 128], strides = [1, 1]} : vector<8x512xf32> to vector<8x128xf32>
    %518 = arith.negf %517 : vector<8x128xf32>
    %519 = math.exp %518 : vector<8x128xf32>
    %cst_158 = arith.constant 1.000000e+00 : f32
    %520 = vector.broadcast %cst_158 : f32 to vector<8x128xf32>
    %521 = arith.addf %520, %519 : vector<8x128xf32>
    %522 = arith.divf %520, %521 : vector<8x128xf32>
    %523 = vector.extract_strided_slice %510 {offsets = [0, 256], sizes = [8, 128], strides = [1, 1]} : vector<8x512xf32> to vector<8x128xf32>
    %524 = math.tanh %523 : vector<8x128xf32>
    %525 = vector.extract_strided_slice %510 {offsets = [0, 384], sizes = [8, 128], strides = [1, 1]} : vector<8x512xf32> to vector<8x128xf32>
    %526 = arith.negf %525 : vector<8x128xf32>
    %527 = math.exp %526 : vector<8x128xf32>
    %cst_159 = arith.constant 1.000000e+00 : f32
    %528 = vector.broadcast %cst_159 : f32 to vector<8x128xf32>
    %529 = arith.addf %528, %527 : vector<8x128xf32>
    %530 = arith.divf %528, %529 : vector<8x128xf32>
    %531 = arith.mulf %522, %467 : vector<8x128xf32>
    %532 = arith.mulf %516, %524 : vector<8x128xf32>
    %533 = arith.addf %531, %532 : vector<8x128xf32>
    %534 = math.tanh %533 : vector<8x128xf32>
    %535 = arith.mulf %530, %534 : vector<8x128xf32>
    %536 = arith.truncf %535 : vector<8x128xf32> to vector<8x128xbf16>
    %c8_i32 = arith.constant 8 : i32
    %537 = arith.extf %504 : vector<8x128xbf16> to vector<8x128xf32>
    %c0_160 = arith.constant 0 : index
    %c0_161 = arith.constant 0 : index
    %538 = vector.load %arg10[%c0_160, %c0_161] : memref<8x128xf32, #tpu.memory_space<vmem>>, vector<8x128xf32>
    tpu.vector_store %arg10[%c0_160, %c0_161], %537 {strides = array<i32>} : memref<8x128xf32, #tpu.memory_space<vmem>>, vector<8x128xf32>,
    %c0_162 = arith.constant 0 : index
    %c0_163 = arith.constant 0 : index
    %539 = vector.load %arg11[%c0_162, %c0_163] : memref<8x128xf32, #tpu.memory_space<vmem>>, vector<8x128xf32>
    tpu.vector_store %arg11[%c0_162, %c0_163], %501 {strides = array<i32>} : memref<8x128xf32, #tpu.memory_space<vmem>>, vector<8x128xf32>,
    %540 = arith.extf %536 : vector<8x128xbf16> to vector<8x128xf32>
    %c0_164 = arith.constant 0 : index
    %c0_165 = arith.constant 0 : index
    %541 = vector.load %arg12[%c0_164, %c0_165] : memref<8x128xf32, #tpu.memory_space<vmem>>, vector<8x128xf32>
    tpu.vector_store %arg12[%c0_164, %c0_165], %540 {strides = array<i32>} : memref<8x128xf32, #tpu.memory_space<vmem>>, vector<8x128xf32>,
    %c0_166 = arith.constant 0 : index
    %c0_167 = arith.constant 0 : index
    %542 = vector.load %arg13[%c0_166, %c0_167] : memref<8x128xf32, #tpu.memory_space<vmem>>, vector<8x128xf32>
    tpu.vector_store %arg13[%c0_166, %c0_167], %533 {strides = array<i32>} : memref<8x128xf32, #tpu.memory_space<vmem>>, vector<8x128xf32>,
    %c0_i32_168 = arith.constant 0 : i32
    %543 = arith.cmpi eq, %arg1, %c0_i32_168 : i32
    %544 = arith.extui %543 : i1 to i32
    %c0_i32_169 = arith.constant 0 : i32
    %545 = arith.cmpi ne, %544, %c0_i32_169 : i32
    scf.if %545 {
      %c0_170 = arith.constant 0 : index
      %c0_171 = arith.constant 0 : index
      %546 = vector.load %arg7[%c0_170, %c0_171] : memref<128x128xbf16, #tpu.memory_space<vmem>>, vector<128x128xbf16>
      %cst_172 = arith.constant dense<0.000000e+00> : vector<8x128xf32>
      %547 = tpu.matmul %536, %546, %cst_172 {dimension_numbers = #tpu.dot_dimension_numbers<[1], [0], [0], [1], [0, 0, 1, 1], [], []>} : vector<8x128xbf16>, vector<128x128xbf16>, vector<8x128xf32> -> vector<8x128xf32>
      %c0_173 = arith.constant 0 : index
      %c0_174 = arith.constant 0 : index
      %548 = vector.load %arg8[%c0_173, %c0_174] : memref<1x128xf32, #tpu.memory_space<vmem>>, vector<1x128xf32>
      %549 = vector.broadcast %548 : vector<1x128xf32> to vector<8x128xf32>
      %550 = arith.addf %547, %549 : vector<8x128xf32>
      %c0_175 = arith.constant 0 : index
      %c0_176 = arith.constant 0 : index
      %551 = vector.load %arg9[%c0_175, %c0_176] : memref<8x128xf32, #tpu.memory_space<vmem>>, vector<8x128xf32>
      tpu.vector_store %arg9[%c0_175, %c0_176], %550 {strides = array<i32>} : memref<8x128xf32, #tpu.memory_space<vmem>>, vector<8x128xf32>,
    } else {
    }
    return
  }
  func.func @transform_0(%arg0: i32, %arg1: i32) -> (i32, i32, i32) {
    %c0_i32 = arith.constant 0 : i32
    %c0_i32_0 = arith.constant 0 : i32
    return %arg1, %arg0, %c0_i32 : i32, i32, i32
  }
  func.func @transform_1(%arg0: i32, %arg1: i32) -> (i32, i32) {
    %c0_i32 = arith.constant 0 : i32
    %c0_i32_0 = arith.constant 0 : i32
    %c0_i32_1 = arith.constant 0 : i32
    return %c0_i32, %c0_i32_0 : i32, i32
  }
  func.func @transform_2(%arg0: i32, %arg1: i32) -> (i32, i32) {
    %c0_i32 = arith.constant 0 : i32
    %c0_i32_0 = arith.constant 0 : i32
    %c0_i32_1 = arith.constant 0 : i32
    return %c0_i32, %c0_i32_0 : i32, i32
  }
  func.func @transform_3(%arg0: i32, %arg1: i32) -> (i32, i32) {
    %c0_i32 = arith.constant 0 : i32
    %c0_i32_0 = arith.constant 0 : i32
    %c0_i32_1 = arith.constant 0 : i32
    return %c0_i32, %c0_i32_0 : i32, i32
  }
  func.func @transform_4(%arg0: i32, %arg1: i32) -> (i32, i32) {
    %c0_i32 = arith.constant 0 : i32
    %c0_i32_0 = arith.constant 0 : i32
    %c0_i32_1 = arith.constant 0 : i32
    return %c0_i32, %c0_i32_0 : i32, i32
  }
  func.func @transform_5(%arg0: i32, %arg1: i32) -> (i32, i32) {
    %c0_i32 = arith.constant 0 : i32
    %c0_i32_0 = arith.constant 0 : i32
    %c0_i32_1 = arith.constant 0 : i32
    return %c0_i32, %c0_i32_0 : i32, i32
  }
  func.func @transform_6(%arg0: i32, %arg1: i32) -> (i32, i32) {
    %c0_i32 = arith.constant 0 : i32
    %c0_i32_0 = arith.constant 0 : i32
    %c0_i32_1 = arith.constant 0 : i32
    return %c0_i32, %c0_i32_0 : i32, i32
  }
  func.func @transform_7(%arg0: i32, %arg1: i32) -> (i32, i32) {
    %c0_i32 = arith.constant 0 : i32
    %c0_i32_0 = arith.constant 0 : i32
    return %arg0, %c0_i32 : i32, i32
  }
}

</mosaic_0001>

<bundles_post_ra>
// kernel: tpu_custom_call.1
= control target key start
LH: loop header
LB: loop body
LE: loop exit
PB: predicated region body
PF: predicated region fallthrough
CT: control target
= control target key end

     0   :  { %12 = vsyncpa [#allocation7], 0  ;;  %s5811_s0 = inlined_call_operand.hbm [shape: f32[8,8,512], index: 0, kind: input, shape index: {}]   ;;  %s5812_s1 = inlined_call_operand.hbm [shape: bf16[128,512], index: 1, kind: input, shape index: {}]   ;;  %s5813_s2 = inlined_call_operand.hbm [shape: bf16[128,512], index: 2, kind: input, shape index: {}]   ;;  %s5814_s3 = inlined_call_operand.hbm [shape: bf16[128,512], index: 3, kind: input, shape index: {}]   ;;  %s5815_s4 = inlined_call_operand.hbm [shape: f32[1,512], index: 4, kind: input, shape index: {}]   ;;  %s5816_s5 = inlined_call_operand.hbm [shape: bf16[128,128], index: 5, kind: input, shape index: {}]   ;;  %s5817_s6 = inlined_call_operand.vmem [shape: f32[1,128], index: 6, kind: input, shape index: {}]   ;;  %s5818_s7 = inlined_call_operand.hbm [shape: f32[8,128], index: 7, kind: output, shape index: {}]  }
   0x1   :  { %13 = vsyncpa [#allocation10], 0 }
   0x2   :  { %14 = vsyncpa [#allocation13], 0 }
   0x3   :  { %15 = vsyncpa [#allocation16], 0  ;;  %s34_s26 = sshll.u32 %s5812_s1, 4  ;;  %s35_s26 = int_to_ptr.hbm [resolvable:$true] %s34_s26 }
   0x4   :  { %16 = vsyncpa [#allocation8], 0  ;;  %s4222_s27 = smov [#allocation9]   ;;  %s60_s8 = sshll.u32 %s5814_s3, 4  ;;  %s61_s8 = int_to_ptr.hbm [resolvable:$true] %s60_s8 }
   0x5   :  { %s36_s28 = sshll.u32 %s4222_s27, 4  ;;  %s4223_s9 = smov 256   ;;  %s37_s28 = int_to_ptr.vmem [resolvable:$true] %s36_s28 }
   0x6   :  { %s4224_s10 = smov 16   ;;  %s4225_s11 = smov [#allocation12]  }
   0x7   :  { %42 = dma.hbm_to_vmem [thread:$0]  %s35_s26, 4096, %s37_s28, [#allocation10], %s4223_s9, %s4223_s9, %s4224_s10  }
   0x8   :  { %s62_s12 = sshll.u32 %s4225_s11, 4  ;;  %s21_s15 = sshll.u32 %s5811_s0, 4  ;;  %s63_s12 = int_to_ptr.vmem [resolvable:$true] %s62_s12  ;;  %s22_s15 = int_to_ptr.hbm [resolvable:$true] %s21_s15 }
   0x9   :  { %68 = dma.hbm_to_vmem [thread:$0]  %s61_s8, 4096, %s63_s12, [#allocation13], %s4223_s9, %s4223_s9, %s4224_s10  }
   0xa   :  { %s4226_s1 = smov [#allocation6]   ;;  %s47_s3 = sshll.u32 %s5813_s2, 4  ;;  %s48_s3 = int_to_ptr.hbm [resolvable:$true] %s47_s3 }
   0xb   :  { %s23_s16 = sshll.u32 %s4226_s1, 4  ;;  %s4227_s19 = smov 512   ;;  %s24_s16 = int_to_ptr.vmem [resolvable:$true] %s23_s16 }
   0xc   :  { %s4228_s20 = smov 32   ;;  %s4229_s21 = smov [#allocation11]  }
   0xd   :  { %29 = dma.hbm_to_vmem [thread:$0]  %s22_s15, 4096, %s24_s16, [#allocation7], %s4227_s19, %s4227_s19, %s4228_s20  }
   0xe   :  { %s49_s22 = sshll.u32 %s4229_s21, 4  ;;  %s74_s0 = sshll.u32 %s5815_s4, 4  ;;  %s50_s22 = int_to_ptr.vmem [resolvable:$true] %s49_s22  ;;  %s75_s0 = int_to_ptr.hbm [resolvable:$true] %s74_s0 }
   0xf   :  { %55 = dma.hbm_to_vmem [thread:$0]  %s48_s3, 4096, %s50_s22, [#allocation10], %s4223_s9, %s4223_s9, %s4224_s10  }
  0x10   :  { %s84_s27 = sshll.u32 %s5816_s5, 4  ;;  %s4230_s28 = smov [#allocation14]   ;;  %s85_s27 = int_to_ptr.hbm [resolvable:$true] %s84_s27 }
  0x11   :  { %s76_s29 = sshll.u32 %s4230_s28, 4  ;;  %s4231_s2 = smov [#allocation15]   ;;  %s77_s29 = int_to_ptr.vmem [resolvable:$true] %s76_s29 }
  0x12   :  { %79 = dma.hbm_to_vmem [thread:$0]  %s75_s0, 64, %s77_s29, [#allocation13]  }
  0x13   :  { %s86_s30 = sshll.u32 %s4231_s2, 4  ;;  %s4232_s8 = smov 64   ;;  %s87_s30 = int_to_ptr.vmem [resolvable:$true] %s86_s30 }
  0x14   :  { %s4233_s11 = smov 4  }
  0x15   :  { %92 = dma.hbm_to_vmem [thread:$0]  %s85_s27, 1024, %s87_s30, [#allocation16], %s4232_s8, %s4232_s8, %s4233_s11  }
  0x16   :  { %4212 = dma.done.wait [#allocation7], 4096  }
  0x17   :  { %4213 = vsyncadd [#allocation7], 4294963200 }
  0x18   :  { %4214 = dma.done.wait [#allocation10], 8192  }
  0x19   :  { %4215 = vsyncadd [#allocation10], 4294959104 }
  0x1a   :  { %4216 = dma.done.wait [#allocation13], 4160  }
  0x1b   :  { %4217 = vsyncadd [#allocation13], 4294963136 }
  0x1c   :  { %4218 = dma.done.wait [#allocation16], 1024  }
  0x1d   :  { %4219 = vsyncadd [#allocation16], 4294966272  ;;  %v3319_v0 = vld [vmem:[#allocation9 + $0xe0] sm:$0xf]  ;;  %v3731_v1 = vld [vmem:[#allocation9 + $0xec] sm:$0xf0] }
  0x1e   :  { %v3729_v2 = vld [vmem:[#allocation9 + $0xe4] sm:$0xf]  ;;  %v4294_v3 = vor.u32 %v3731_v1, %v3319_v0  ;;  %v3321_v4 = vld [vmem:[#allocation9 + $0xf0] sm:$0xf0]  ;;  %v3730_v5 = vld [vmem:[#allocation9 + $0xec] sm:$0xf] }
  0x1f   :  { %v3329_v6 = vld [vmem:[#allocation9 + $0xf8] sm:$0xf0]  ;;  %v4296_v7 = vor.u32 %v3729_v2, %v3321_v4  ;;  %v3303_v9 = vld [vmem:[#allocation9 + $0xc0] sm:$0xf]  ;;  %v3727_v10 = vld [vmem:[#allocation9 + $0xcc] sm:$0xf0] }
  0x20   :  { %v4298_v8 = vor.u32 %v3730_v5, %v3329_v6  ;;  %v3725_v11 = vld [vmem:[#allocation9 + $0xc4] sm:$0xf]  ;;  %361 = vmatpush.bf16.msra.mxu0 %v4294_v3  ;;  %v4301_v12 = vor.u32 %v3727_v10, %v3303_v9  ;;  %v3305_v13 = vld [vmem:[#allocation9 + $0xd0] sm:$0xf0]  ;;  %v3726_v14 = vld [vmem:[#allocation9 + $0xcc] sm:$0xf] }
  0x21   :  { %v3313_v15 = vld [vmem:[#allocation9 + $0xd8] sm:$0xf0]  ;;  %374 = vmatpush.bf16.msra.mxu1 %v4296_v7  ;;  %v4305_v16 = vor.u32 %v3725_v11, %v3305_v13  ;;  %v3327_v18 = vld [vmem:[#allocation9 + $0xe8] sm:$0xf]  ;;  %v3732_v19 = vld [vmem:[#allocation9 + $0xf4] sm:$0xf0] }
  0x22   :  { %400 = vmatpush.bf16.msra.mxu3 %v4298_v8  ;;  %v4307_v17 = vor.u32 %v3726_v14, %v3313_v15  ;;  %v3287_v20 = vld [vmem:[#allocation9 + $0xa0] sm:$0xf]  ;;  %v4309_v21 = vor.u32 %v3732_v19, %v3327_v18  ;;  %v3723_v22 = vld [vmem:[#allocation9 + $0xac] sm:$0xf0]  ;;  %v3721_v23 = vld [vmem:[#allocation9 + $0xa4] sm:$0xf] }
  0x23   :  { %v3289_v24 = vld [vmem:[#allocation9 + $0xb0] sm:$0xf0]  ;;  %v3722_v25 = vld [vmem:[#allocation9 + $0xac] sm:$0xf]  ;;  %v3297_v26 = vld [vmem:[#allocation9 + $0xb8] sm:$0xf0]  ;;  %v4313_v28 = vor.u32 %v3723_v22, %v3287_v20 }
  0x24   :  { %v3311_v27 = vld [vmem:[#allocation9 + $0xc8] sm:$0xf]  ;;  %362 = vmatpush.bf16.msra.mxu0 %v4301_v12  ;;  %387 = vmatpush.bf16.msra.mxu2 %v4309_v21  ;;  %v3728_v29 = vld [vmem:[#allocation9 + $0xd4] sm:$0xf0]  ;;  %v3271_v30 = vld [vmem:[#allocation9 + $0x80] sm:$0xf]  ;;  %v4317_v32 = vor.u32 %v3721_v23, %v3289_v24  ;;  %v4319_v33 = vor.u32 %v3722_v25, %v3297_v26 }
  0x25   :  { %v3719_v31 = vld [vmem:[#allocation9 + $0x8c] sm:$0xf0]  ;;  %375 = vmatpush.bf16.msra.mxu1 %v4305_v16  ;;  %v4321_v34 = vor.u32 %v3728_v29, %v3311_v27  ;;  %v3717_v35 = vld [vmem:[#allocation9 + $0x84] sm:$0xf]  ;;  %v3273_v36 = vld [vmem:[#allocation9 + $0x90] sm:$0xf0] }
  0x26   :  { %401 = vmatpush.bf16.msra.mxu3 %v4307_v17  ;;  %v3718_v37 = vld [vmem:[#allocation9 + $0x8c] sm:$0xf]  ;;  %v3281_v38 = vld [vmem:[#allocation9 + $0x98] sm:$0xf0]  ;;  %v3295_v39 = vld [vmem:[#allocation9 + $0xa8] sm:$0xf]  ;;  %v4325_v41 = vor.u32 %v3719_v31, %v3271_v30  ;;  %v4331_v45 = vor.u32 %v3717_v35, %v3273_v36 }
  0x27   :  { %v3724_v40 = vld [vmem:[#allocation9 + $0xb4] sm:$0xf0]  ;;  %v3255_v43 = vld [vmem:[#allocation9 + $0x60] sm:$0xf]  ;;  %v3715_v44 = vld [vmem:[#allocation9 + $0x6c] sm:$0xf0]  ;;  %v4333_v46 = vor.u32 %v3718_v37, %v3281_v38 }
  0x28   :  { %363 = vmatpush.bf16.msra.mxu0 %v4313_v28  ;;  %388 = vmatpush.bf16.msra.mxu2 %v4321_v34  ;;  %v4327_v42 = vor.u32 %v3724_v40, %v3295_v39  ;;  %v3713_v47 = vld [vmem:[#allocation9 + $0x64] sm:$0xf]  ;;  %v3279_v48 = vld [vmem:[#allocation9 + $0x88] sm:$0xf]  ;;  %v3720_v49 = vld [vmem:[#allocation9 + $0x94] sm:$0xf0]  ;;  %v4337_v53 = vor.u32 %v3715_v44, %v3255_v43 }
  0x29   :  { %376 = vmatpush.bf16.msra.mxu1 %v4317_v32  ;;  %v3257_v50 = vld [vmem:[#allocation9 + $0x70] sm:$0xf0]  ;;  %v3714_v51 = vld [vmem:[#allocation9 + $0x6c] sm:$0xf]  ;;  %v3265_v52 = vld [vmem:[#allocation9 + $0x78] sm:$0xf0]  ;;  %v4339_v54 = vor.u32 %v3720_v49, %v3279_v48 }
  0x2a   :  { %402 = vmatpush.bf16.msra.mxu3 %v4319_v33  ;;  %v3239_v55 = vld [vmem:[#allocation9 + $0x40] sm:$0xf]  ;;  %v3711_v56 = vld [vmem:[#allocation9 + $0x4c] sm:$0xf0]  ;;  %v4343_v57 = vor.u32 %v3713_v47, %v3257_v50  ;;  %v4345_v58 = vor.u32 %v3714_v51, %v3265_v52  ;;  %v3709_v59 = vld [vmem:[#allocation9 + $0x44] sm:$0xf] }
  0x2b   :  { %v3263_v60 = vld [vmem:[#allocation9 + $0x68] sm:$0xf]  ;;  %v3716_v61 = vld [vmem:[#allocation9 + $0x74] sm:$0xf0]  ;;  %v3241_v62 = vld [vmem:[#allocation9 + $0x50] sm:$0xf0]  ;;  %v4349_v1 = vor.u32 %v3711_v56, %v3239_v55 }
  0x2c   :  { %364 = vmatpush.bf16.msra.mxu0 %v4325_v41  ;;  %389 = vmatpush.bf16.msra.mxu2 %v4327_v42  ;;  %v3710_v63 = vld [vmem:[#allocation9 + $0x4c] sm:$0xf]  ;;  %v3249_v0 = vld [vmem:[#allocation9 + $0x58] sm:$0xf0]  ;;  %v4351_v2 = vor.u32 %v3716_v61, %v3263_v60  ;;  %v3223_v4 = vld [vmem:[#allocation9 + $0x20] sm:$0xf]  ;;  %v4355_v6 = vor.u32 %v3709_v59, %v3241_v62 }
  0x2d   :  { %377 = vmatpush.bf16.msra.mxu1 %v4331_v45  ;;  %v3707_v5 = vld [vmem:[#allocation9 + $0x2c] sm:$0xf0]  ;;  %v4357_v9 = vor.u32 %v3710_v63, %v3249_v0  ;;  %v3705_v10 = vld [vmem:[#allocation9 + $0x24] sm:$0xf]  ;;  %v3247_v11 = vld [vmem:[#allocation9 + $0x48] sm:$0xf] }
  0x2e   :  { %403 = vmatpush.bf16.msra.mxu3 %v4333_v46  ;;  %v3712_v13 = vld [vmem:[#allocation9 + $0x54] sm:$0xf0]  ;;  %v3225_v14 = vld [vmem:[#allocation9 + $0x30] sm:$0xf0]  ;;  %v3706_v15 = vld [vmem:[#allocation9 + $0x2c] sm:$0xf]  ;;  %v4361_v19 = vor.u32 %v3707_v5, %v3223_v4 }
  0x2f   :  { %v3233_v18 = vld [vmem:[#allocation9 + $0x38] sm:$0xf0]  ;;  %v4363_v20 = vor.u32 %v3712_v13, %v3247_v11  ;;  %v3207_v22 = vld [vmem:[#allocation9] sm:$0xf]  ;;  %v3703_v23 = vld [vmem:[#allocation9 + $0xc] sm:$0xf0]  ;;  %v4367_v25 = vor.u32 %v3705_v10, %v3225_v14 }
  0x30   :  { %365 = vmatpush.bf16.msra.mxu0 %v4337_v53  ;;  %390 = vmatpush.bf16.msra.mxu2 %v4339_v54  ;;  %v3701_v24 = vld [vmem:[#allocation9 + $0x4] sm:$0xf]  ;;  %v4369_v26 = vor.u32 %v3706_v15, %v3233_v18  ;;  %v3209_v27 = vld [vmem:[#allocation9 + $0x10] sm:$0xf0]  ;;  %v3231_v29 = vld [vmem:[#allocation9 + $0x28] sm:$0xf]  ;;  %v4373_v40 = vor.u32 %v3703_v23, %v3207_v22 }
  0x31   :  { %378 = vmatpush.bf16.msra.mxu1 %v4343_v57  ;;  %v3708_v30 = vld [vmem:[#allocation9 + $0x34] sm:$0xf0]  ;;  %v3702_v31 = vld [vmem:[#allocation9 + $0xc] sm:$0xf]  ;;  %v3217_v35 = vld [vmem:[#allocation9 + $0x18] sm:$0xf0]  ;;  %v4379_v48 = vor.u32 %v3701_v24, %v3209_v27 }
  0x32   :  { %404 = vmatpush.bf16.msra.mxu3 %v4345_v58  ;;  %v3450_v36 = vld [vmem:[#allocation11 + $0xe0] sm:$0xf]  ;;  %v3763_v37 = vld [vmem:[#allocation11 + $0xec] sm:$0xf0]  ;;  %v3761_v38 = vld [vmem:[#allocation11 + $0xe4] sm:$0xf]  ;;  %v4375_v43 = vor.u32 %v3708_v30, %v3231_v29  ;;  %v4381_v49 = vor.u32 %v3702_v31, %v3217_v35 }
  0x33   :  { %v3452_v39 = vld [vmem:[#allocation11 + $0xf0] sm:$0xf0]  ;;  %v3762_v44 = vld [vmem:[#allocation11 + $0xec] sm:$0xf]  ;;  %v3460_v47 = vld [vmem:[#allocation11 + $0xf8] sm:$0xf0]  ;;  %v4383_v52 = vor.u32 %v3763_v37, %v3450_v36 }
  0x34   :  { %366 = vmatpush.bf16.msra.mxu0 %v4349_v1  ;;  %391 = vmatpush.bf16.msra.mxu2 %v4351_v2  ;;  %5959 = vst [vmem:[#allocation23_spill] sm:$0xff] %v4381_v49  ;;  %v3215_v50 = vld [vmem:[#allocation9 + $0x8] sm:$0xf]  ;;  %v3704_v51 = vld [vmem:[#allocation9 + $0x14] sm:$0xf0]  ;;  %v4385_v55 = vor.u32 %v3761_v38, %v3452_v39  ;;  %v4387_v60 = vor.u32 %v3762_v44, %v3460_v47  ;;  %v5819_v18 = vmov 0.0|0.0  }
  0x35   :  { %379 = vmatpush.bf16.msra.mxu1 %v4355_v6  ;;  %5960 = vst [vmem:[#allocation24_spill] sm:$0xff] %v4383_v52  ;;  %v3458_v56 = vld [vmem:[#allocation11 + $0xe8] sm:$0xf]  ;;  %v3764_v59 = vld [vmem:[#allocation11 + $0xf4] sm:$0xf0]  ;;  %v4393_v10 = vor.u32 %v3704_v51, %v3215_v50  ;;  %s4235_s9 = smov [#allocation17]  }
  0x36   :  { %405 = vmatpush.bf16.msra.mxu3 %v4357_v9  ;;  %5961 = vst [vmem:[#allocation25_spill] sm:$0xff] %v4385_v55  ;;  %v3434_v61 = vld [vmem:[#allocation11 + $0xc0] sm:$0xf]  ;;  %v3759_v62 = vld [vmem:[#allocation11 + $0xcc] sm:$0xf0]  ;;  %v4397_v11 = vor.u32 %v3764_v59, %v3458_v56  ;;  %s3190_s10 = sshll.u32 %s4235_s9, 4  ;;  %s3191_s10 = int_to_ptr.vmem [resolvable:$true] %s3190_s10 }
  0x37   :  { %5962 = vst [vmem:[#allocation26_spill] sm:$0xff] %v4387_v60  ;;  %v3757_v63 = vld [vmem:[#allocation11 + $0xc4] sm:$0xf]  ;;  %v3436_v0 = vld [vmem:[#allocation11 + $0xd0] sm:$0xf0]  ;;  %v4399_v13 = vor.u32 %v3759_v62, %v3434_v61  ;;  %s3192_s14 = sshll.u32 %s5818_s7, 4  ;;  %s3193_s14 = int_to_ptr.hbm [resolvable:$true] %s3192_s14 }
  0x38   :  { %367 = vmatpush.bf16.msra.mxu0 %v4361_v19  ;;  %392 = vmatpush.bf16.msra.mxu2 %v4363_v20  ;;  %v3758_v4 = vld [vmem:[#allocation11 + $0xcc] sm:$0xf]  ;;  %v3444_v5 = vld [vmem:[#allocation11 + $0xd8] sm:$0xf0]  ;;  %5963 = vst [vmem:[#allocation27_spill] sm:$0xff] %v4397_v11  ;;  %v4403_v22 = vor.u32 %v3757_v63, %v3436_v0 }
  0x39   :  { %380 = vmatpush.bf16.msra.mxu1 %v4367_v25  ;;  %5964 = vst [vmem:[#allocation28_spill] sm:$0xff] %v4399_v13  ;;  %v3442_v14 = vld [vmem:[#allocation11 + $0xc8] sm:$0xf]  ;;  %v3760_v15 = vld [vmem:[#allocation11 + $0xd4] sm:$0xf0]  ;;  %v4405_v23 = vor.u32 %v3758_v4, %v3444_v5 }
  0x3a   :  { %406 = vmatpush.bf16.msra.mxu3 %v4369_v26  ;;  %5965 = vst [vmem:[#allocation29_spill] sm:$0xff] %v4403_v22  ;;  %v3418_v24 = vld [vmem:[#allocation11 + $0xa0] sm:$0xf]  ;;  %v3755_v27 = vld [vmem:[#allocation11 + $0xac] sm:$0xf0]  ;;  %v4412_v36 = vor.u32 %v3760_v15, %v3442_v14 }
  0x3b   :  { %5966 = vst [vmem:[#allocation30_spill] sm:$0xff] %v4405_v23  ;;  %v3753_v29 = vld [vmem:[#allocation11 + $0xa4] sm:$0xf]  ;;  %v3420_v30 = vld [vmem:[#allocation11 + $0xb0] sm:$0xf0]  ;;  %v4414_v37 = vor.u32 %v3755_v27, %v3418_v24 }
  0x3c   :  { %368 = vmatpush.bf16.msra.mxu0 %v4373_v40  ;;  %393 = vmatpush.bf16.msra.mxu2 %v4375_v43  ;;  %v3754_v31 = vld [vmem:[#allocation11 + $0xac] sm:$0xf]  ;;  %v3428_v35 = vld [vmem:[#allocation11 + $0xb8] sm:$0xf0]  ;;  %5967 = vst [vmem:[#allocation31_spill] sm:$0xff] %v4412_v36  ;;  %v4418_v38 = vor.u32 %v3753_v29, %v3420_v30 }
  0x3d   :  { %381 = vmatpush.bf16.msra.mxu1 %v4379_v48  ;;  %5968 = vst [vmem:[#allocation32_spill] sm:$0xff] %v4414_v37  ;;  %v3426_v39 = vld [vmem:[#allocation11 + $0xa8] sm:$0xf]  ;;  %v3756_v44 = vld [vmem:[#allocation11 + $0xb4] sm:$0xf0]  ;;  %v4420_v47 = vor.u32 %v3754_v31, %v3428_v35 }
  0x3e   :  { %407 = vmatpush.bf16.msra.mxu3 %v4381_v49  ;;  %5969 = vst [vmem:[#allocation33_spill] sm:$0xff] %v4418_v38  ;;  %v4425_v50 = vor.u32 %v3756_v44, %v3426_v39  ;;  %v3402_v51 = vld [vmem:[#allocation11 + $0x80] sm:$0xf]  ;;  %v3751_v56 = vld [vmem:[#allocation11 + $0x8c] sm:$0xf0] }
  0x3f   :  { %369 = vmatmul.bf16.vlgmr.msra.gmra.mxu0 %v5819_v18  ;;  %5970 = vst [vmem:[#allocation34_spill] sm:$0xff] %v4420_v47  ;;  %v3749_v59 = vld [vmem:[#allocation11 + $0x84] sm:$0xf]  ;;  %v4430_v61 = vor.u32 %v3751_v56, %v3402_v51  ;;  %v3404_v62 = vld [vmem:[#allocation11 + $0x90] sm:$0xf0] }
  0x40   :  { %673 = vmatpush.bf16.msrb.mxu0 %v4383_v52  ;;  %382 = vmatmul.bf16.vlgmr.msra.gmra.mxu1 %v5819_v18  ;;  %5971 = vst [vmem:[#allocation35_spill] sm:$0xff] %v4425_v50  ;;  %v3410_v63 = vld [vmem:[#allocation11 + $0x88] sm:$0xf]  ;;  %v3752_v0 = vld [vmem:[#allocation11 + $0x94] sm:$0xf0]  ;;  %v4432_v4 = vor.u32 %v3749_v59, %v3404_v62 }
  0x41   :  { %686 = vmatpush.bf16.msrb.mxu1 %v4385_v55  ;;  %408 = vmatmul.bf16.vlgmr.msra.gmra.mxu3 %v5819_v18  ;;  %5972 = vst [vmem:[#allocation36_spill] sm:$0xff] %v4430_v61  ;;  %v4434_v5 = vor.u32 %v3752_v0, %v3410_v63  ;;  %v3750_v14 = vld [vmem:[#allocation11 + $0x8c] sm:$0xf]  ;;  %v3412_v15 = vld [vmem:[#allocation11 + $0x98] sm:$0xf0] }
  0x42   :  { %712 = vmatpush.bf16.msrb.mxu3 %v4387_v60  ;;  %394 = vmatpush.bf16.msra.mxu2 %v4393_v10  ;;  %5973 = vst [vmem:[#allocation37_spill] sm:$0xff] %v4432_v4  ;;  %v4437_v24 = vor.u32 %v3750_v14, %v3412_v15  ;;  %v3386_v27 = vld [vmem:[#allocation11 + $0x60] sm:$0xf]  ;;  %v3747_v29 = vld [vmem:[#allocation11 + $0x6c] sm:$0xf0] }
  0x43   :  { %5974 = vst [vmem:[#allocation38_spill] sm:$0xff] %v4434_v5  ;;  %v3745_v30 = vld [vmem:[#allocation11 + $0x64] sm:$0xf]  ;;  %v4442_v31 = vor.u32 %v3747_v29, %v3386_v27  ;;  %v3388_v35 = vld [vmem:[#allocation11 + $0x70] sm:$0xf0] }
  0x44   :  { %674 = vmatpush.bf16.msrb.mxu0 %v4399_v13  ;;  %5975 = vst [vmem:[#allocation39_spill] sm:$0xff] %v4437_v24  ;;  %v3394_v39 = vld [vmem:[#allocation11 + $0x68] sm:$0xf]  ;;  %v3748_v44 = vld [vmem:[#allocation11 + $0x74] sm:$0xf0]  ;;  %v4444_v51 = vor.u32 %v3745_v30, %v3388_v35 }
  0x45   :  { %687 = vmatpush.bf16.msrb.mxu1 %v4403_v22  ;;  %395 = vmatmul.bf16.vlgmr.msra.gmra.mxu2 %v5819_v18  ;;  %5976 = vst [vmem:[#allocation40_spill] sm:$0xff] %v4442_v31  ;;  %v4446_v56 = vor.u32 %v3748_v44, %v3394_v39  ;;  %v3746_v59 = vld [vmem:[#allocation11 + $0x6c] sm:$0xf]  ;;  %v3396_v62 = vld [vmem:[#allocation11 + $0x78] sm:$0xf0] }
  0x46   :  { %699 = vmatpush.bf16.msrb.mxu2 %v4397_v11  ;;  %713 = vmatpush.bf16.msrb.mxu3 %v4405_v23  ;;  %5977 = vst [vmem:[#allocation41_spill] sm:$0xff] %v4444_v51  ;;  %v4449_v63 = vor.u32 %v3746_v59, %v3396_v62  ;;  %v3370_v0 = vld [vmem:[#allocation11 + $0x40] sm:$0xf]  ;;  %v3743_v14 = vld [vmem:[#allocation11 + $0x4c] sm:$0xf0] }
  0x47   :  { %5978 = vst [vmem:[#allocation42_spill] sm:$0xff] %v4446_v56  ;;  %v4454_v15 = vor.u32 %v3743_v14, %v3370_v0  ;;  %v3741_v27 = vld [vmem:[#allocation11 + $0x44] sm:$0xf]  ;;  %v3372_v29 = vld [vmem:[#allocation11 + $0x50] sm:$0xf0] }
  0x48   :  { %675 = vmatpush.bf16.msrb.mxu0 %v4414_v37  ;;  %5979 = vst [vmem:[#allocation43_spill] sm:$0xff] %v4449_v63  ;;  %v3378_v30 = vld [vmem:[#allocation11 + $0x48] sm:$0xf]  ;;  %v4456_v35 = vor.u32 %v3741_v27, %v3372_v29  ;;  %v3744_v39 = vld [vmem:[#allocation11 + $0x54] sm:$0xf0] }
  0x49   :  { %688 = vmatpush.bf16.msrb.mxu1 %v4418_v38  ;;  %5980 = vst [vmem:[#allocation44_spill] sm:$0xff] %v4454_v15  ;;  %v3742_v44 = vld [vmem:[#allocation11 + $0x4c] sm:$0xf]  ;;  %v3380_v18 = vld [vmem:[#allocation11 + $0x58] sm:$0xf0]  ;;  %v4459_v59 = vor.u32 %v3744_v39, %v3378_v30 }
  0x4a   :  { %700 = vmatpush.bf16.msrb.mxu2 %v4412_v36  ;;  %714 = vmatpush.bf16.msrb.mxu3 %v4420_v47  ;;  %5981 = vst [vmem:[#allocation45_spill] sm:$0xff] %v4456_v35  ;;  %v4461_v62 = vor.u32 %v3742_v44, %v3380_v18  ;;  %v3354_v0 = vld [vmem:[#allocation11 + $0x20] sm:$0xf]  ;;  %v3739_v14 = vld [vmem:[#allocation11 + $0x2c] sm:$0xf0] }
  0x4b   :  { %5982 = vst [vmem:[#allocation46_spill] sm:$0xff] %v4459_v59  ;;  %v4466_v27 = vor.u32 %v3739_v14, %v3354_v0  ;;  %v3356_v29 = vld [vmem:[#allocation11 + $0x30] sm:$0xf0]  ;;  %v3738_v18 = vld [vmem:[#allocation11 + $0x2c] sm:$0xf] }
  0x4c   :  { %676 = vmatpush.bf16.msrb.mxu0 %v4430_v61  ;;  %5983 = vst [vmem:[#allocation47_spill] sm:$0xff] %v4461_v62  ;;  %v3364_v39 = vld [vmem:[#allocation11 + $0x38] sm:$0xf0]  ;;  %v3735_v0 = vld [vmem:[#allocation11 + $0xc] sm:$0xf0] }
  0x4d   :  { %689 = vmatpush.bf16.msrb.mxu1 %v4432_v4  ;;  %5984 = vst [vmem:[#allocation48_spill] sm:$0xff] %v4466_v27  ;;  %v4473_v44 = vor.u32 %v3738_v18, %v3364_v39  ;;  %v3733_v14 = vld [vmem:[#allocation11 + $0x4] sm:$0xf]  ;;  %v3734_v18 = vld [vmem:[#allocation11 + $0xc] sm:$0xf] }
  0x4e   :  { %701 = vmatpush.bf16.msrb.mxu2 %v4425_v50  ;;  %715 = vmatpush.bf16.msrb.mxu3 %v4437_v24  ;;  %v3348_v39 = vld [vmem:[#allocation11 + $0x18] sm:$0xf0]  ;;  %v3580_v24 = vld [vmem:[#allocation12 + $0xf0] sm:$0xf0]  ;;  %v3683_v4 = vld [vmem:[#allocation12 + $0x6c] sm:$0xf0] }
  0x4f   :  { %5987 = vst [vmem:[#allocation51_spill] sm:$0xff] %v4473_v44  ;;  %v3681_v61 = vld [vmem:[#allocation12 + $0x64] sm:$0xf] }
  0x50   :  { %677 = vmatpush.bf16.msrb.mxu0 %v4442_v31 }
  0x51   :  { %690 = vmatpush.bf16.msrb.mxu1 %v4444_v51  ;;  %v3740_v51 = vld [vmem:[#allocation11 + $0x34] sm:$0xf0] }
  0x52   :  { %702 = vmatpush.bf16.msrb.mxu2 %v4434_v5  ;;  %716 = vmatpush.bf16.msrb.mxu3 %v4449_v63  ;;  %v3737_v63 = vld [vmem:[#allocation11 + $0x24] sm:$0xf] }
  0x53   :  { %v4468_v31 = vor.u32 %v3737_v63, %v3356_v29  ;;  %v3340_v63 = vld [vmem:[#allocation11 + $0x10] sm:$0xf0] }
  0x54   :  { %678 = vmatpush.bf16.msrb.mxu0 %v4454_v15  ;;  %v4480_v29 = vor.u32 %v3733_v14, %v3340_v63  ;;  %v3697_v15 = vld [vmem:[#allocation12 + $0xe4] sm:$0xf]  ;;  %v3586_v14 = vld [vmem:[#allocation12 + $0xe8] sm:$0xf]  ;;  %v3700_v63 = vld [vmem:[#allocation12 + $0xf4] sm:$0xf0] }
  0x55   :  { %691 = vmatpush.bf16.msrb.mxu1 %v4456_v35  ;;  %5985 = vst [vmem:[#allocation49_spill] sm:$0xff] %v4468_v31 }
  0x56   :  { %703 = vmatpush.bf16.msrb.mxu2 %v4446_v56  ;;  %717 = vmatpush.bf16.msrb.mxu3 %v4461_v62  ;;  %v3362_v56 = vld [vmem:[#allocation11 + $0x28] sm:$0xf]  ;;  %v3338_v62 = vld [vmem:[#allocation11] sm:$0xf]  ;;  %5989 = vst [vmem:[#allocation53_spill] sm:$0xff] %v4480_v29 }
  0x57   :  { %v4470_v30 = vor.u32 %v3740_v51, %v3362_v56  ;;  %v3346_v51 = vld [vmem:[#allocation11 + $0x8] sm:$0xf]  ;;  %v3736_v56 = vld [vmem:[#allocation11 + $0x14] sm:$0xf0] }
  0x58   :  { %679 = vmatpush.bf16.msrb.mxu0 %v4466_v27  ;;  %v4482_v35 = vor.u32 %v3736_v56, %v3346_v51  ;;  %v3578_v27 = vld [vmem:[#allocation12 + $0xe0] sm:$0xf]  ;;  %v3698_v51 = vld [vmem:[#allocation12 + $0xec] sm:$0xf]  ;;  %v4494_v56 = vor.u32 %v3700_v63, %v3586_v14  ;;  %v3696_v14 = vld [vmem:[#allocation12 + $0xd4] sm:$0xf0] }
  0x59   :  { %5986 = vst [vmem:[#allocation50_spill] sm:$0xff] %v4470_v30  ;;  %692 = vmatpush.bf16.msrb.mxu1 %v4468_v31  ;;  %v3699_v31 = vld [vmem:[#allocation12 + $0xec] sm:$0xf0]  ;;  %v3694_v63 = vld [vmem:[#allocation12 + $0xcc] sm:$0xf] }
  0x5a   :  { %704 = vmatpush.bf16.msrb.mxu2 %v4459_v59  ;;  %718 = vmatpush.bf16.msrb.mxu3 %v4473_v44  ;;  %v4478_v59 = vor.u32 %v3735_v0, %v3338_v62  ;;  %5990 = vst [vmem:[#allocation54_spill] sm:$0xff] %v4482_v35  ;;  %v4489_v62 = vor.u32 %v3699_v31, %v3578_v27 }
  0x5b   :  { %v4491_v0 = vor.u32 %v3697_v15, %v3580_v24  ;;  %5994 = vst [vmem:[#allocation58_spill] sm:$0xff] %v4494_v56  ;;  %v3693_v24 = vld [vmem:[#allocation12 + $0xc4] sm:$0xf]  ;;  %v3564_v15 = vld [vmem:[#allocation12 + $0xd0] sm:$0xf0] }
  0x5c   :  { %5988 = vst [vmem:[#allocation52_spill] sm:$0xff] %v4478_v59  ;;  %680 = vmatpush.bf16.msrb.mxu0 %v4478_v59  ;;  %v3695_v59 = vld [vmem:[#allocation12 + $0xcc] sm:$0xf0]  ;;  %v4503_v27 = vor.u32 %v3693_v24, %v3564_v15  ;;  %v3548_v24 = vld [vmem:[#allocation12 + $0xb0] sm:$0xf0] }
  0x5d   :  { %693 = vmatpush.bf16.msrb.mxu1 %v4480_v29  ;;  %5992 = vst [vmem:[#allocation56_spill] sm:$0xff] %v4489_v62  ;;  %v3554_v15 = vld [vmem:[#allocation12 + $0xa8] sm:$0xf] }
  0x5e   :  { %705 = vmatpush.bf16.msrb.mxu2 %v4470_v30  ;;  %v4485_v30 = vor.u32 %v3734_v18, %v3348_v39  ;;  %5993 = vst [vmem:[#allocation57_spill] sm:$0xff] %v4491_v0  ;;  %v3588_v18 = vld [vmem:[#allocation12 + $0xf8] sm:$0xf0]  ;;  %v3562_v39 = vld [vmem:[#allocation12 + $0xc0] sm:$0xf] }
  0x5f   :  { %v4498_v29 = vor.u32 %v3698_v51, %v3588_v18  ;;  %v4500_v31 = vor.u32 %v3695_v59, %v3562_v39  ;;  %5997 = vst [vmem:[#allocation61_spill] sm:$0xff] %v4503_v27  ;;  %v3546_v51 = vld [vmem:[#allocation12 + $0xa0] sm:$0xf]  ;;  %v3691_v18 = vld [vmem:[#allocation12 + $0xac] sm:$0xf0] }
  0x60   :  { %5991 = vst [vmem:[#allocation55_spill] sm:$0xff] %v4485_v30  ;;  %719 = vmatpush.bf16.msrb.mxu3 %v4485_v30  ;;  %885 = vmatpush.bf16.msra.mxu0 %v4489_v62  ;;  %v3570_v30 = vld [vmem:[#allocation12 + $0xc8] sm:$0xf]  ;;  %v3572_v62 = vld [vmem:[#allocation12 + $0xd8] sm:$0xf0]  ;;  %v4512_v39 = vor.u32 %v3691_v18, %v3546_v51 }
  0x61   :  { %898 = vmatpush.bf16.msra.mxu1 %v4491_v0  ;;  %5995 = vst [vmem:[#allocation59_spill] sm:$0xff] %v4498_v29  ;;  %v4508_v44 = vor.u32 %v3694_v63, %v3572_v62  ;;  %v3689_v59 = vld [vmem:[#allocation12 + $0xa4] sm:$0xf]  ;;  %v3690_v62 = vld [vmem:[#allocation12 + $0xac] sm:$0xf] }
  0x62   :  { %706 = vmatpush.bf16.msrb.mxu2 %v4482_v35  ;;  %5996 = vst [vmem:[#allocation60_spill] sm:$0xff] %v4500_v31  ;;  %v4506_v35 = vor.u32 %v3696_v14, %v3570_v30  ;;  %v3556_v14 = vld [vmem:[#allocation12 + $0xb8] sm:$0xf0]  ;;  %v165_v63 = vld [vmem:[#allocation6] sm:$0xff] }
  0x63   :  { %5999 = vst [vmem:[#allocation63_spill] sm:$0xff] %v4508_v44  ;;  %v4520_v0 = vor.u32 %v3690_v62, %v3556_v14  ;;  %v3685_v51 = vld [vmem:[#allocation12 + $0x84] sm:$0xf]  ;;  %v3686_v62 = vld [vmem:[#allocation12 + $0x8c] sm:$0xf] }
  0x64   :  { %924 = vmatpush.bf16.msra.mxu3 %v4498_v29  ;;  %5998 = vst [vmem:[#allocation62_spill] sm:$0xff] %v4506_v35  ;;  %886 = vmatpush.bf16.msra.mxu0 %v4500_v31  ;;  %v4515_v29 = vor.u32 %v3689_v59, %v3548_v24  ;;  %v3530_v31 = vld [vmem:[#allocation12 + $0x80] sm:$0xf]  ;;  %v3532_v59 = vld [vmem:[#allocation12 + $0x90] sm:$0xf0] }
  0x65   :  { %899 = vmatpush.bf16.msra.mxu1 %v4503_v27  ;;  %6000 = vst [vmem:[#allocation64_spill] sm:$0xff] %v4512_v39  ;;  %v3687_v27 = vld [vmem:[#allocation12 + $0x8c] sm:$0xf0]  ;;  %v3538_v24 = vld [vmem:[#allocation12 + $0x88] sm:$0xf] }
  0x66   :  { %911 = vmatpush.bf16.msra.mxu2 %v4494_v56  ;;  %v3692_v56 = vld [vmem:[#allocation12 + $0xb4] sm:$0xf0]  ;;  %6001 = vst [vmem:[#allocation65_spill] sm:$0xff] %v4515_v29  ;;  %v4524_v18 = vor.u32 %v3687_v27, %v3530_v31  ;;  %v3540_v14 = vld [vmem:[#allocation12 + $0x98] sm:$0xf0] }
  0x67   :  { %v4517_v30 = vor.u32 %v3692_v56, %v3554_v15  ;;  %6003 = vst [vmem:[#allocation67_spill] sm:$0xff] %v4520_v0  ;;  %v3688_v56 = vld [vmem:[#allocation12 + $0x94] sm:$0xf0]  ;;  %v166_v15 = vld [vmem:[#allocation6 + $0x8] sm:$0xff]  ;;  %v3514_v27 = vld [vmem:[#allocation12 + $0x60] sm:$0xf] }
  0x68   :  { %925 = vmatpush.bf16.msra.mxu3 %v4508_v44  ;;  %887 = vmatpush.bf16.msra.mxu0 %v4512_v39  ;;  %6004 = vst [vmem:[#allocation68_spill] sm:$0xff] %v4524_v18  ;;  %v4529_v44 = vor.u32 %v3688_v56, %v3538_v24  ;;  %v4532_v39 = vor.u32 %v3686_v62, %v3540_v14  ;;  %v3522_v24 = vld [vmem:[#allocation12 + $0x68] sm:$0xf]  ;;  %v3684_v56 = vld [vmem:[#allocation12 + $0x74] sm:$0xf0] }
  0x69   :  { %6002 = vst [vmem:[#allocation66_spill] sm:$0xff] %v4517_v30  ;;  %900 = vmatpush.bf16.msra.mxu1 %v4515_v29  ;;  %v3524_v14 = vld [vmem:[#allocation12 + $0x78] sm:$0xf0] }
  0x6a   :  { %912 = vmatpush.bf16.msra.mxu2 %v4506_v35  ;;  %v4527_v35 = vor.u32 %v3685_v51, %v3532_v59  ;;  %6006 = vst [vmem:[#allocation70_spill] sm:$0xff] %v4529_v44  ;;  %v4536_v51 = vor.u32 %v3683_v4, %v3514_v27  ;;  %v3516_v59 = vld [vmem:[#allocation12 + $0x70] sm:$0xf0]  ;;  %v3498_v4 = vld [vmem:[#allocation12 + $0x40] sm:$0xf] }
  0x6b   :  { %6007 = vst [vmem:[#allocation71_spill] sm:$0xff] %v4532_v39  ;;  %v4539_v62 = vor.u32 %v3681_v61, %v3516_v59  ;;  %v3679_v27 = vld [vmem:[#allocation12 + $0x4c] sm:$0xf0]  ;;  %v3506_v59 = vld [vmem:[#allocation12 + $0x48] sm:$0xf] }
  0x6c   :  { %6005 = vst [vmem:[#allocation69_spill] sm:$0xff] %v4527_v35  ;;  %926 = vmatpush.bf16.msra.mxu3 %v4520_v0  ;;  %888 = vmatpush.bf16.msra.mxu0 %v4524_v18  ;;  %v4548_v61 = vor.u32 %v3679_v27, %v3498_v4  ;;  %v3482_v27 = vld [vmem:[#allocation12 + $0x20] sm:$0xf] }
  0x6d   :  { %901 = vmatpush.bf16.msra.mxu1 %v4527_v35  ;;  %6008 = vst [vmem:[#allocation72_spill] sm:$0xff] %v4536_v51  ;;  %v3677_v35 = vld [vmem:[#allocation12 + $0x44] sm:$0xf] }
  0x6e   :  { %913 = vmatpush.bf16.msra.mxu2 %v4517_v30  ;;  %6009 = vst [vmem:[#allocation73_spill] sm:$0xff] %v4539_v62 }
  0x6f   :  { %6012 = vst [vmem:[#allocation76_spill] sm:$0xff] %v4548_v61 }
  0x70   :  { %927 = vmatpush.bf16.msra.mxu3 %v4532_v39  ;;  %889 = vmatpush.bf16.msra.mxu0 %v4536_v51 }
  0x71   :  { %902 = vmatpush.bf16.msra.mxu1 %v4539_v62  ;;  %v3675_v62 = vld [vmem:[#allocation12 + $0x2c] sm:$0xf0] }
  0x72   :  { %914 = vmatpush.bf16.msra.mxu2 %v4529_v44  ;;  %v3673_v44 = vld [vmem:[#allocation12 + $0x24] sm:$0xf] }
  0x74   :  { %890 = vmatpush.bf16.msra.mxu0 %v4548_v61  ;;  %v3671_v61 = vld [vmem:[#allocation12 + $0xc] sm:$0xf0] }
  0xbc   :  { %v370_v5 = vpop.f32.mrf.mxu0 }
  0xbd   :  { %v413_v29 = vadd.f32 %v370_v5, %v165_v63  ;;  %v383_v31 = vpop.f32.mrf.mxu1  ;;  %v4541_v5 = vor.u32 %v3684_v56, %v3522_v24  ;;  %v3682_v63 = vld [vmem:[#allocation12 + $0x6c] sm:$0xf]  ;;  %v3680_v24 = vld [vmem:[#allocation12 + $0x54] sm:$0xf0] }
  0xbe   :  { %v414_v47 = vadd.f32 %v383_v31, %v166_v15  ;;  %v168_v15 = vld [vmem:[#allocation6 + $0x18] sm:$0xff]  ;;  %v4544_v31 = vor.u32 %v3682_v63, %v3524_v14  ;;  %v4553_v63 = vor.u32 %v3680_v24, %v3506_v59  ;;  %v3490_v59 = vld [vmem:[#allocation12 + $0x28] sm:$0xf] }
  0xbf   :  { %v3333_v30 = vmul.f32 -1.442695, %v413_v29  ;;  %6010 = vst [vmem:[#allocation74_spill] sm:$0xff] %v4541_v5  ;;  %v3500_v29 = vld [vmem:[#allocation12 + $0x50] sm:$0xf0]  ;;  %915 = vmatpush.bf16.msra.mxu2 %v4541_v5 }
  0xc0   :  { %v3334_v0 = vmul.f32 -1.442695, %v414_v47  ;;  %6011 = vst [vmem:[#allocation75_spill] sm:$0xff] %v4544_v31  ;;  %v4551_v56 = vor.u32 %v3677_v35, %v3500_v29  ;;  %v3508_v14 = vld [vmem:[#allocation12 + $0x58] sm:$0xf0]  ;;  %928 = vmatpush.bf16.msra.mxu3 %v4544_v31  ;;  %v4560_v35 = vor.u32 %v3675_v62, %v3482_v27 }
  0xc1   :  { %3788 = vpow2.f32 %v3333_v30  ;;  %6014 = vst [vmem:[#allocation78_spill] sm:$0xff] %v4553_v63  ;;  %v3678_v30 = vld [vmem:[#allocation12 + $0x4c] sm:$0xf]  ;;  %v3484_v29 = vld [vmem:[#allocation12 + $0x30] sm:$0xf0] }
  0xc2   :  { %3790 = vpow2.f32 %v3334_v0  ;;  %6013 = vst [vmem:[#allocation77_spill] sm:$0xff] %v4551_v56  ;;  %v4556_v51 = vor.u32 %v3678_v30, %v3508_v14  ;;  %903 = vmatpush.bf16.msra.mxu1 %v4551_v56  ;;  %v3676_v30 = vld [vmem:[#allocation12 + $0x34] sm:$0xf0]  ;;  %v3674_v14 = vld [vmem:[#allocation12 + $0x2c] sm:$0xf]  ;;  %891 = vmatpush.bf16.msra.mxu0 %v4560_v35 }
  0xc3   :  { %6016 = vst [vmem:[#allocation80_spill] sm:$0xff] %v4560_v35  ;;  %916 = vmatpush.bf16.msra.mxu2 %v4553_v63  ;;  %v3466_v56 = vld [vmem:[#allocation12] sm:$0xf]  ;;  %v3670_v35 = vld [vmem:[#allocation12 + $0xc] sm:$0xf] }
  0xc4   :  { %v409_v47 = vpop.f32.mrf.mxu3  ;;  %v372_v0 = vpop.f32.mrf.mxu0  ;;  %6015 = vst [vmem:[#allocation79_spill] sm:$0xff] %v4556_v51  ;;  %929 = vmatpush.bf16.msra.mxu3 %v4556_v51 }
  0xc5   :  { %v416_v39 = vadd.f32 %v409_v47, %v168_v15  ;;  %v385_v4 = vpop.f32.mrf.mxu1  ;;  %v4563_v47 = vor.u32 %v3673_v44, %v3484_v29  ;;  %v3492_v0 = vld [vmem:[#allocation12 + $0x38] sm:$0xf0]  ;;  %v3669_v44 = vld [vmem:[#allocation12 + $0x4] sm:$0xf]  ;;  %v167_v29 = vld [vmem:[#allocation6 + $0x10] sm:$0xff] }
  0xc6   :  { %v4570_v27 = vor.u32 %v3674_v14, %v3492_v0  ;;  %v3672_v14 = vld [vmem:[#allocation12 + $0x14] sm:$0xf0] }
  0xc7   :  { %v3335_v18 = vmul.f32 -1.442695, %v416_v39  ;;  %v3789_v24 = vpop.eup %3788  ;;  %6017 = vst [vmem:[#allocation81_spill] sm:$0xff] %v4563_v47  ;;  %v4566_v39 = vor.u32 %v3676_v30, %v3490_v59  ;;  %904 = vmatpush.bf16.msra.mxu1 %v4563_v47  ;;  %v3468_v59 = vld [vmem:[#allocation12 + $0x10] sm:$0xf0] }
  0xc8   :  { %v396_v15 = vpop.f32.mrf.mxu2  ;;  %v3791_v4 = vpop.eup %3790  ;;  %v420_v31 = vadd.f32 1.0, %v3789_v24  ;;  %6019 = vst [vmem:[#allocation83_spill] sm:$0xff] %v4570_v27  ;;  %930 = vmatpush.bf16.msra.mxu3 %v4570_v27  ;;  %v4577_v24 = vor.u32 %v3671_v61, %v3466_v56  ;;  %v3474_v30 = vld [vmem:[#allocation12 + $0x8] sm:$0xf]  ;;  %v4579_v0 = vor.u32 %v3669_v44, %v3468_v59  ;;  %v3476_v47 = vld [vmem:[#allocation12 + $0x18] sm:$0xf0] }
  0xc9   :  { %3792 = vpow2.f32 %v3335_v18  ;;  %6018 = vst [vmem:[#allocation82_spill] sm:$0xff] %v4566_v39  ;;  %v4568_v62 = vadd.f32 1.0, %v3791_v4  ;;  %917 = vmatpush.bf16.msra.mxu2 %v4566_v39  ;;  %v4581_v4 = vor.u32 %v3672_v14, %v3474_v30  ;;  %v415_v63 = vadd.f32 %v396_v15, %v167_v29 }
  0xca   :  { %3794 = vrcp.f32 %v420_v31  ;;  %6020 = vst [vmem:[#allocation84_spill] sm:$0xff] %v4577_v24  ;;  %892 = vmatpush.bf16.msra.mxu0 %v4577_v24  ;;  %v432_v30 = vand.u32 2147483648, %v420_v31  ;;  %vm426_vm2 = vweird.f32 %v420_v31 }
  0xcb   :  { %3796 = vrcp.f32 %v4568_v62  ;;  %6021 = vst [vmem:[#allocation85_spill] sm:$0xff] %v4579_v0  ;;  %905 = vmatpush.bf16.msra.mxu1 %v4579_v0  ;;  %v449_v14 = vand.u32 2147483647, %v4568_v62  ;;  %vm445_vm3 = vweird.f32 %v4568_v62 }
  0xcc   :  { %v411_v18 = vpop.f32.mrf.mxu3  ;;  %6022 = vst [vmem:[#allocation86_spill] sm:$0xff] %v4581_v4 }
  0xcd   :  { %v4584_v18 = vor.u32 %v3670_v35, %v3476_v47  ;;  %918 = vmatpush.bf16.msra.mxu2 %v4581_v4  ;;  %v451_v35 = vand.u32 2147483648, %v4568_v62  ;;  %vm450_vm7 = vcmp.eq.f32.partialorder %v449_v14, 8.507059e+37  ;;  %v6034_v14 = vld [vmem:[#allocation39_spill] sm:$0xff] }
  0xcf   :  { %v3793_v51 = vpop.eup %3792  ;;  %6023 = vst [vmem:[#allocation87_spill] sm:$0xff] %v4584_v18  ;;  %931 = vmatpush.bf16.msra.mxu3 %v4584_v18 }
  0xd0   :  { %v459_v39 = vadd.f32 1.0, %v3793_v51  ;;  %v398_v5 = vpop.f32.mrf.mxu2  ;;  %v3795_v61 = vpop.eup %3794 }
  0xd1   :  { %v3797_v56 = vpop.eup %3796  ;;  %v422_v44 = vmul.f32 %v3795_v61, %v420_v31  ;;  %vm427_vm0 = vweird.f32 %v3795_v61  ;;  %v430_v5 = vand.u32 2147483647, %v420_v31 }
  0xd2   :  { %3798 = vrcp.f32 %v459_v39  ;;  %v441_v59 = vmul.f32 %v3797_v56, %v4568_v62  ;;  %vm446_vm1 = vweird.f32 %v3797_v56  ;;  %vm428_vm4 = vmor %vm426_vm2, %vm427_vm0  ;;  %v471_v62 = vand.u32 2147483648, %v459_v39 }
  0xd3   :  { %3800 = vtanh.f32 %v415_v63  ;;  %v423_v15 = vsub.f32 1.0, %v422_v44  ;;  %v433_v63 = vor.u32 1.1754944e-38, %v432_v30  ;;  %vm431_vm5 = vcmp.eq.f32.partialorder %v430_v5, 8.507059e+37  ;;  %vm447_vm6 = vmor %vm445_vm3, %vm446_vm1  ;;  %v6032_v5 = vld [vmem:[#allocation37_spill] sm:$0xff] }
  0xd4   :  { %v442_v29 = vsub.f32 1.0, %v441_v59  ;;  %v452_v59 = vor.u32 1.1754944e-38, %v451_v35  ;;  %vm465_vm9 = vweird.f32 %v459_v39  ;;  %v469_v30 = vand.u32 2147483647, %v459_v39 }
  0xd5   :  { %v424_v51 = vmul.f32 %v3795_v61, %v423_v15 }
  0xd6   :  { %v443_v47 = vmul.f32 %v3797_v56, %v442_v29  ;;  %vm470_vm11 = vcmp.eq.f32.partialorder %v469_v30, 8.507059e+37  ;;  %v6042_v30 = vld [vmem:[#allocation47_spill] sm:$0xff] }
  0xd7   :  { %v425_v18 = vadd.f32 %v3795_v61, %v424_v51 }
  0xd8   :  { %v3799_v4 = vpop.eup %3798  ;;  %v444_v44 = vadd.f32 %v3797_v56, %v443_v47  ;;  %v6033_v47 = vld [vmem:[#allocation38_spill] sm:$0xff] }
  0xd9   :  { %v3801_v0 = vpop.eup %3800  ;;  %v461_v24 = vmul.f32 %v3799_v4, %v459_v39  ;;  %v429_v27 = vsel %vm428_vm4, %v3795_v61, %v425_v18  ;;  %vm466_vm8 = vweird.f32 %v3799_v4  ;;  %v472_v61 = vor.u32 1.1754944e-38, %v471_v62  ;;  %v6029_v39 = vld [vmem:[#allocation35_spill] sm:$0xff]  ;;  %v6041_v62 = vld [vmem:[#allocation46_spill] sm:$0xff] }
  0xda   :  { %v434_v50 = vsel %vm431_vm5, %v433_v63, %v429_v27  ;;  %v448_v29 = vsel %vm447_vm6, %v3797_v56, %v444_v44  ;;  %vm467_vm10 = vmor %vm465_vm9, %vm466_vm8  ;;  %v6035_v63 = vld [vmem:[#allocation40_spill] sm:$0xff]  ;;  %v6036_v44 = vld [vmem:[#allocation41_spill] sm:$0xff] }
  0xdb   :  { %v462_v15 = vsub.f32 1.0, %v461_v24  ;;  %v453_v38 = vsel %vm450_vm7, %v452_v59, %v448_v29  ;;  %v476_v37 = vmul.f32 %v3801_v0, %v434_v50  ;;  %v6028_v50 = vld [vmem:[#allocation33_spill] sm:$0xff]  ;;  %v6030_v0 = vld [vmem:[#allocation34_spill] sm:$0xff]  ;;  %v6039_v29 = vld [vmem:[#allocation44_spill] sm:$0xff] }
  0xdc   :  { %v475_v51 = vmul.f32 0.0, %v453_v38  ;;  %v6027_v38 = vld [vmem:[#allocation32_spill] sm:$0xff]  ;;  %v6037_v59 = vld [vmem:[#allocation42_spill] sm:$0xff] }
  0xdd   :  { %v463_v23 = vmul.f32 %v3799_v4, %v462_v15  ;;  %v6038_v15 = vld [vmem:[#allocation43_spill] sm:$0xff] }
  0xde   :  { %v4593_v31 = vadd.f32 %v476_v37, %v475_v51  ;;  %v6026_v37 = vld [vmem:[#allocation30_spill] sm:$0xff]  ;;  %v6040_v51 = vld [vmem:[#allocation45_spill] sm:$0xff] }
  0xdf   :  { %v464_v36 = vadd.f32 %v3799_v4, %v463_v23  ;;  %v6024_v23 = vmov 0.0|0.0  }
  0xe0   :  { %3802 = vtanh.f32 %v4593_v31 }
  0xe1   :  { %v468_v18 = vsel %vm467_vm10, %v3799_v4, %v464_v36  ;;  %v6025_v36 = vld [vmem:[#allocation31_spill] sm:$0xff]  ;;  %v6031_v4 = vld [vmem:[#allocation36_spill] sm:$0xff] }
  0xe2   :  { %v473_v24 = vsel %vm470_vm11, %v472_v61, %v468_v18  ;;  %v6043_v18 = vld [vmem:[#allocation48_spill] sm:$0xff]  ;;  %v6044_v61 = vld [vmem:[#allocation49_spill] sm:$0xff] }
  0xe6   :  { %v3803_v27 = vpop.eup %3802 }
  0xe7   :  { %v479_v56 = vmul.f32 %v3803_v27, %v473_v24  ;;  %v6045_v27 = vld [vmem:[#allocation50_spill] sm:$0xff]  ;;  %v6046_v24 = vld [vmem:[#allocation51_spill] sm:$0xff] }
  0xe9   :  { %v480_v35 = vpack.c.bf16 %v479_v56, %v479_v56  ;;  %v6047_v56 = vld [vmem:[#allocation52_spill] sm:$0xff] }
  0xeb   :  { %681 = vmatmul.bf16.vlgmr.msrb.gmra.mxu0 %v480_v35  ;;  %694 = vmatmul.bf16.vlgmr.msrb.gmra.mxu1 %v480_v35 }
  0xec   :  { %707 = vmatmul.bf16.vlgmr.msrb.gmra.mxu2 %v480_v35  ;;  %720 = vmatmul.bf16.vlgmr.msrb.gmra.mxu3 %v480_v35 }
  0xed   :  { %1020 = vmatpush.bf16.msrb.mxu0 %v4294_v3  ;;  %1033 = vmatpush.bf16.msrb.mxu1 %v4296_v7 }
  0xee   :  { %1046 = vmatpush.bf16.msrb.mxu2 %v4309_v21  ;;  %1059 = vmatpush.bf16.msrb.mxu3 %v4298_v8 }
  0xf1   :  { %1021 = vmatpush.bf16.msrb.mxu0 %v4301_v12  ;;  %1034 = vmatpush.bf16.msrb.mxu1 %v4305_v16 }
  0xf2   :  { %1047 = vmatpush.bf16.msrb.mxu2 %v4321_v34  ;;  %1060 = vmatpush.bf16.msrb.mxu3 %v4307_v17 }
  0xf5   :  { %1022 = vmatpush.bf16.msrb.mxu0 %v4313_v28  ;;  %1035 = vmatpush.bf16.msrb.mxu1 %v4317_v32 }
  0xf6   :  { %1048 = vmatpush.bf16.msrb.mxu2 %v4327_v42  ;;  %1061 = vmatpush.bf16.msrb.mxu3 %v4319_v33 }
  0xf9   :  { %1023 = vmatpush.bf16.msrb.mxu0 %v4325_v41  ;;  %1036 = vmatpush.bf16.msrb.mxu1 %v4331_v45 }
  0xfa   :  { %1049 = vmatpush.bf16.msrb.mxu2 %v4339_v54  ;;  %1062 = vmatpush.bf16.msrb.mxu3 %v4333_v46 }
  0xfb   :  { %893 = vmatmul.bf16.vlgmr.msra.gmra.mxu0 %v6024_v23  ;;  %906 = vmatmul.bf16.vlgmr.msra.gmra.mxu1 %v6024_v23 }
  0xfc   :  { %919 = vmatmul.bf16.vlgmr.msra.gmra.mxu2 %v6024_v23  ;;  %932 = vmatmul.bf16.vlgmr.msra.gmra.mxu3 %v6024_v23  ;;  %v6049_v23 = vld [vmem:[#allocation56_spill] sm:$0xff] }
  0xfd   :  { %1024 = vmatpush.bf16.msrb.mxu0 %v4337_v53  ;;  %1037 = vmatpush.bf16.msrb.mxu1 %v4343_v57 }
  0xfe   :  { %1050 = vmatpush.bf16.msrb.mxu2 %v4351_v2  ;;  %1063 = vmatpush.bf16.msrb.mxu3 %v4345_v58 }
 0x101   :  { %1025 = vmatpush.bf16.msrb.mxu0 %v4349_v1  ;;  %1038 = vmatpush.bf16.msrb.mxu1 %v4355_v6 }
 0x102   :  { %1051 = vmatpush.bf16.msrb.mxu2 %v4363_v20  ;;  %1064 = vmatpush.bf16.msrb.mxu3 %v4357_v9 }
 0x105   :  { %1026 = vmatpush.bf16.msrb.mxu0 %v4361_v19  ;;  %1039 = vmatpush.bf16.msrb.mxu1 %v4367_v25 }
 0x106   :  { %1052 = vmatpush.bf16.msrb.mxu2 %v4375_v43  ;;  %1065 = vmatpush.bf16.msrb.mxu3 %v4369_v26 }
 0x109   :  { %1027 = vmatpush.bf16.msrb.mxu0 %v4373_v40  ;;  %1040 = vmatpush.bf16.msrb.mxu1 %v4379_v48 }
 0x10a   :  { %1053 = vmatpush.bf16.msrb.mxu2 %v4393_v10  ;;  %1066 = vmatpush.bf16.msrb.mxu3 %v4381_v49 }
 0x10c   :  { %1028 = vmatmul.bf16.vlgmr.msrb.gmra.mxu0 %v480_v35  ;;  %1041 = vmatmul.bf16.vlgmr.msrb.gmra.mxu1 %v480_v35 }
 0x10d   :  { %1140 = vmatpush.bf16.msra.mxu0 %v4383_v52  ;;  %1153 = vmatpush.bf16.msra.mxu1 %v4385_v55 }
 0x10e   :  { %1054 = vmatmul.bf16.vlgmr.msrb.gmra.mxu2 %v480_v35  ;;  %1067 = vmatmul.bf16.vlgmr.msrb.gmra.mxu3 %v480_v35  ;;  %v6048_v35 = vld [vmem:[#allocation53_spill] sm:$0xff] }
 0x10f   :  { %1166 = vmatpush.bf16.msra.mxu2 %v4397_v11  ;;  %1179 = vmatpush.bf16.msra.mxu3 %v4387_v60 }
 0x111   :  { %1141 = vmatpush.bf16.msra.mxu0 %v4399_v13  ;;  %1154 = vmatpush.bf16.msra.mxu1 %v4403_v22 }
 0x113   :  { %1167 = vmatpush.bf16.msra.mxu2 %v6025_v36  ;;  %1180 = vmatpush.bf16.msra.mxu3 %v6026_v37 }
 0x115   :  { %1142 = vmatpush.bf16.msra.mxu0 %v6027_v38  ;;  %1155 = vmatpush.bf16.msra.mxu1 %v6028_v50  ;;  %v1016_v50 = vld [vmem:[#allocation6 + $0x20] sm:$0xff] }
 0x117   :  { %1168 = vmatpush.bf16.msra.mxu2 %v6029_v39  ;;  %1181 = vmatpush.bf16.msra.mxu3 %v6030_v0 }
 0x119   :  { %1143 = vmatpush.bf16.msra.mxu0 %v6031_v4  ;;  %1156 = vmatpush.bf16.msra.mxu1 %v6032_v5 }
 0x11b   :  { %1169 = vmatpush.bf16.msra.mxu2 %v6033_v47  ;;  %1182 = vmatpush.bf16.msra.mxu3 %v6034_v14 }
 0x11d   :  { %1144 = vmatpush.bf16.msra.mxu0 %v6035_v63  ;;  %1157 = vmatpush.bf16.msra.mxu1 %v6036_v44 }
 0x11f   :  { %1170 = vmatpush.bf16.msra.mxu2 %v6037_v59  ;;  %1183 = vmatpush.bf16.msra.mxu3 %v6038_v15 }
 0x121   :  { %1145 = vmatpush.bf16.msra.mxu0 %v6039_v29  ;;  %1158 = vmatpush.bf16.msra.mxu1 %v6040_v51  ;;  %v6050_v29 = vld [vmem:[#allocation57_spill] sm:$0xff]  ;;  %v6051_v51 = vld [vmem:[#allocation54_spill] sm:$0xff] }
 0x123   :  { %1171 = vmatpush.bf16.msra.mxu2 %v6041_v62  ;;  %1184 = vmatpush.bf16.msra.mxu3 %v6042_v30  ;;  %v6052_v62 = vld [vmem:[#allocation55_spill] sm:$0xff]  ;;  %v6053_v30 = vld [vmem:[#allocation58_spill] sm:$0xff] }
 0x125   :  { %1146 = vmatpush.bf16.msra.mxu0 %v6043_v18  ;;  %1159 = vmatpush.bf16.msra.mxu1 %v6044_v61  ;;  %v6054_v18 = vld [vmem:[#allocation59_spill] sm:$0xff]  ;;  %v6055_v61 = vld [vmem:[#allocation60_spill] sm:$0xff] }
 0x127   :  { %1172 = vmatpush.bf16.msra.mxu2 %v6045_v27  ;;  %1185 = vmatpush.bf16.msra.mxu3 %v6046_v24  ;;  %v6056_v27 = vld [vmem:[#allocation61_spill] sm:$0xff]  ;;  %v6057_v24 = vld [vmem:[#allocation62_spill] sm:$0xff] }
 0x129   :  { %1147 = vmatpush.bf16.msra.mxu0 %v6047_v56  ;;  %1160 = vmatpush.bf16.msra.mxu1 %v6048_v35  ;;  %v6058_v56 = vld [vmem:[#allocation63_spill] sm:$0xff]  ;;  %v6059_v35 = vld [vmem:[#allocation64_spill] sm:$0xff] }
 0x12b   :  { %1173 = vmatpush.bf16.msra.mxu2 %v6051_v51  ;;  %1186 = vmatpush.bf16.msra.mxu3 %v6052_v62  ;;  %v6062_v51 = vld [vmem:[#allocation67_spill] sm:$0xff]  ;;  %v6063_v62 = vld [vmem:[#allocation68_spill] sm:$0xff] }
 0x12d   :  { %1192 = vmatpush.bf16.msrb.mxu0 %v6049_v23  ;;  %1205 = vmatpush.bf16.msrb.mxu1 %v6050_v29  ;;  %v6060_v23 = vld [vmem:[#allocation65_spill] sm:$0xff]  ;;  %v6061_v29 = vld [vmem:[#allocation66_spill] sm:$0xff] }
 0x12f   :  { %1218 = vmatpush.bf16.msrb.mxu2 %v6053_v30  ;;  %1231 = vmatpush.bf16.msrb.mxu3 %v6054_v18  ;;  %v6064_v30 = vld [vmem:[#allocation69_spill] sm:$0xff]  ;;  %v6065_v18 = vld [vmem:[#allocation70_spill] sm:$0xff] }
 0x131   :  { %1193 = vmatpush.bf16.msrb.mxu0 %v6055_v61  ;;  %1206 = vmatpush.bf16.msrb.mxu1 %v6056_v27  ;;  %v6066_v61 = vld [vmem:[#allocation71_spill] sm:$0xff]  ;;  %v6067_v27 = vld [vmem:[#allocation72_spill] sm:$0xff] }
 0x133   :  { %1219 = vmatpush.bf16.msrb.mxu2 %v6057_v24  ;;  %1232 = vmatpush.bf16.msrb.mxu3 %v6058_v56  ;;  %v6068_v24 = vld [vmem:[#allocation73_spill] sm:$0xff]  ;;  %v6069_v56 = vld [vmem:[#allocation74_spill] sm:$0xff] }
 0x135   :  { %1194 = vmatpush.bf16.msrb.mxu0 %v6059_v35  ;;  %1207 = vmatpush.bf16.msrb.mxu1 %v6060_v23  ;;  %v6070_v35 = vld [vmem:[#allocation75_spill] sm:$0xff]  ;;  %v6071_v23 = vld [vmem:[#allocation76_spill] sm:$0xff] }
 0x137   :  { %1220 = vmatpush.bf16.msrb.mxu2 %v6061_v29  ;;  %1233 = vmatpush.bf16.msrb.mxu3 %v6062_v51  ;;  %v6072_v29 = vld [vmem:[#allocation77_spill] sm:$0xff]  ;;  %v6073_v51 = vld [vmem:[#allocation78_spill] sm:$0xff] }
 0x139   :  { %1195 = vmatpush.bf16.msrb.mxu0 %v6063_v62  ;;  %1208 = vmatpush.bf16.msrb.mxu1 %v6064_v30  ;;  %v6074_v62 = vld [vmem:[#allocation79_spill] sm:$0xff]  ;;  %v6075_v30 = vld [vmem:[#allocation80_spill] sm:$0xff] }
 0x13b   :  { %1221 = vmatpush.bf16.msrb.mxu2 %v6065_v18  ;;  %1234 = vmatpush.bf16.msrb.mxu3 %v6066_v61  ;;  %v6076_v18 = vld [vmem:[#allocation81_spill] sm:$0xff]  ;;  %v6077_v61 = vld [vmem:[#allocation82_spill] sm:$0xff] }
 0x13d   :  { %1196 = vmatpush.bf16.msrb.mxu0 %v6067_v27  ;;  %1209 = vmatpush.bf16.msrb.mxu1 %v6068_v24  ;;  %v6078_v27 = vld [vmem:[#allocation83_spill] sm:$0xff]  ;;  %v6079_v24 = vld [vmem:[#allocation84_spill] sm:$0xff] }
 0x13f   :  { %1222 = vmatpush.bf16.msrb.mxu2 %v6069_v56  ;;  %1235 = vmatpush.bf16.msrb.mxu3 %v6070_v35  ;;  %v6080_v56 = vld [vmem:[#allocation85_spill] sm:$0xff]  ;;  %v6081_v35 = vld [vmem:[#allocation86_spill] sm:$0xff] }
 0x141   :  { %1197 = vmatpush.bf16.msrb.mxu0 %v6071_v23  ;;  %1210 = vmatpush.bf16.msrb.mxu1 %v6072_v29  ;;  %v6082_v23 = vld [vmem:[#allocation87_spill] sm:$0xff] }
 0x143   :  { %1223 = vmatpush.bf16.msrb.mxu2 %v6073_v51  ;;  %1236 = vmatpush.bf16.msrb.mxu3 %v6074_v62 }
 0x145   :  { %1198 = vmatpush.bf16.msrb.mxu0 %v6075_v30  ;;  %1211 = vmatpush.bf16.msrb.mxu1 %v6076_v18  ;;  %v4698_v18 = vld [vmem:[#allocation14] sm:$0xf] }
 0x147   :  { %1224 = vmatpush.bf16.msrb.mxu2 %v6077_v61  ;;  %1237 = vmatpush.bf16.msrb.mxu3 %v6078_v27 }
 0x149   :  { %1199 = vmatpush.bf16.msrb.mxu0 %v6079_v24  ;;  %1212 = vmatpush.bf16.msrb.mxu1 %v6080_v56  ;;  %v4701_v24 = vperm.slane %v4698_v18, 0 }
 0x14b   :  { %1225 = vmatpush.bf16.msrb.mxu2 %v6081_v35  ;;  %1238 = vmatpush.bf16.msrb.mxu3 %v6082_v23  ;;  %6083 = vst [vmem:[#allocation88_spill] sm:$0xff] %v4701_v24  ;;  %v4704_v23 = vperm.slane %v4698_v18, 1 }
 0x14d   :  { %6084 = vst [vmem:[#allocation89_spill] sm:$0xff] %v4704_v23 }
 0x168   :  { %v682_v29 = vpop.f32.mrf.mxu0  ;;  %v695_v51 = vpop.f32.mrf.mxu1 }
 0x16f   :  { %v4696_v15 = vpop.f32.mrf.mxu2  ;;  %v721_v62 = vpop.f32.mrf.mxu3 }
 0x170   :  { %v684_v30 = vpop.f32.mrf.mxu0  ;;  %v697_v59 = vpop.f32.mrf.mxu1 }
 0x177   :  { %v710_v61 = vpop.f32.mrf.mxu2  ;;  %v723_v44 = vpop.f32.mrf.mxu3 }
 0x178   :  { %v894_v27 = vpop.f32.mrf.mxu0  ;;  %v907_v56 = vpop.f32.mrf.mxu1 }
 0x179   :  { %v895_v63 = vadd.f32 %v894_v27, %v682_v29  ;;  %v908_v35 = vadd.f32 %v907_v56, %v695_v51  ;;  %v1017_v29 = vld [vmem:[#allocation6 + $0x28] sm:$0xff] }
 0x17b   :  { %v947_v14 = vadd.f32 %v4701_v24, %v895_v63  ;;  %v948_v47 = vadd.f32 %v4704_v23, %v908_v35  ;;  %v4709_v35 = vperm.slane %v4698_v18, 3 }
 0x17d   :  { %v3592_v5 = vmul.f32 -1.442695, %v947_v14  ;;  %v3593_v44 = vmul.f32 -1.442695, %v948_v47  ;;  %6085 = vst [vmem:[#allocation90_spill] sm:$0xff] %v4709_v35 }
 0x17f   :  { %v920_v30 = vpop.f32.mrf.mxu2  ;;  %v933_v59 = vpop.f32.mrf.mxu3  ;;  %3804 = vpow2.f32 %v3592_v5 }
 0x180   :  { %v896_v4 = vpop.f32.mrf.mxu0  ;;  %v909_v61 = vpop.f32.mrf.mxu1  ;;  %3806 = vpow2.f32 %v3593_v44  ;;  %v934_v24 = vadd.f32 %v933_v59, %v721_v62 }
 0x185   :  { %v3805_v56 = vpop.eup %3804 }
 0x186   :  { %v3807_v63 = vpop.eup %3806  ;;  %v4711_v61 = vadd.f32 1.0, %v3805_v56 }
 0x187   :  { %v922_v0 = vpop.f32.mrf.mxu2  ;;  %v935_v39 = vpop.f32.mrf.mxu3  ;;  %v4713_v5 = vadd.f32 1.0, %v3807_v63 }
 0x188   :  { %v1019_v39 = vld [vmem:[#allocation6 + $0x38] sm:$0xff]  ;;  %v950_v0 = vadd.f32 %v4709_v35, %v934_v24  ;;  %v964_v22 = vand.u32 2147483647, %v4711_v61  ;;  %vm960_vm6 = vweird.f32 %v4711_v61 }
 0x189   :  { %v1029_v51 = vpop.f32.mrf.mxu0  ;;  %v1042_v27 = vpop.f32.mrf.mxu1  ;;  %vm979_vm7 = vweird.f32 %v4713_v5 }
 0x18a   :  { %v1072_v38 = vadd.f32 %v1029_v51, %v1016_v50  ;;  %v1073_v37 = vadd.f32 %v1042_v27, %v1017_v29  ;;  %v3594_v29 = vmul.f32 -1.442695, %v950_v0  ;;  %vm965_vm10 = vcmp.eq.f32.partialorder %v964_v22, 8.507059e+37 }
 0x18c   :  { %v3595_v14 = vmul.f32 -1.442695, %v1072_v38  ;;  %v3596_v4 = vmul.f32 -1.442695, %v1073_v37 }
 0x18e   :  { %3808 = vpow2.f32 %v3595_v14 }
 0x18f   :  { %3810 = vpow2.f32 %v3596_v4 }
 0x190   :  { %3812 = vrcp.f32 %v4711_v61 }
 0x191   :  { %v1055_v47 = vpop.f32.mrf.mxu2  ;;  %v1068_v44 = vpop.f32.mrf.mxu3  ;;  %3814 = vrcp.f32 %v4713_v5 }
 0x192   :  { %v1075_v50 = vadd.f32 %v1068_v44, %v1019_v39  ;;  %v1031_v62 = vpop.f32.mrf.mxu0  ;;  %v1044_v59 = vpop.f32.mrf.mxu1  ;;  %v1018_v39 = vld [vmem:[#allocation6 + $0x30] sm:$0xff] }
 0x193   :  { %v921_v62 = vadd.f32 %v920_v30, %v4696_v15  ;;  %v4728_v59 = vperm.slane %v4698_v18, 2 }
 0x194   :  { %v3597_v38 = vmul.f32 -1.442695, %v1075_v50  ;;  %v3809_v37 = vpop.eup %3808 }
 0x195   :  { %v1079_v51 = vadd.f32 1.0, %v3809_v37  ;;  %v3811_v27 = vpop.eup %3810  ;;  %6086 = vst [vmem:[#allocation91_spill] sm:$0xff] %v4728_v59  ;;  %v949_v36 = vadd.f32 %v4728_v59, %v921_v62 }
 0x196   :  { %3816 = vpow2.f32 %v3597_v38  ;;  %v4718_v56 = vpop.eup %3812  ;;  %v1098_v24 = vadd.f32 1.0, %v3811_v27 }
 0x197   :  { %3818 = vrcp.f32 %v1079_v51  ;;  %v4720_v63 = vpop.eup %3814  ;;  %v956_v50 = vmul.f32 %v4718_v56, %v4711_v61  ;;  %vm961_vm12 = vweird.f32 %v4718_v56  ;;  %v1091_v30 = vand.u32 2147483648, %v1079_v51 }
 0x198   :  { %3820 = vpow2.f32 %v3594_v29  ;;  %v975_v0 = vmul.f32 %v4720_v63, %v4713_v5  ;;  %v1074_v29 = vadd.f32 %v1055_v47, %v1018_v39  ;;  %v1110_v60 = vand.u32 2147483648, %v1098_v24  ;;  %vm4752_vm8 = vmor %vm960_vm6, %vm961_vm12 }
 0x199   :  { %v1057_v14 = vpop.f32.mrf.mxu2  ;;  %v1070_v4 = vpop.f32.mrf.mxu3  ;;  %3822 = vrcp.f32 %v1098_v24  ;;  %v957_v35 = vsub.f32 1.0, %v956_v50  ;;  %vm1085_vm14 = vweird.f32 %v1079_v51  ;;  %v1108_v59 = vand.u32 2147483647, %v1098_v24 }
 0x19a   :  { %v976_v23 = vsub.f32 1.0, %v975_v0  ;;  %vm980_vm0 = vweird.f32 %v4720_v63  ;;  %vm1104_vm1 = vweird.f32 %v1098_v24 }
 0x19b   :  { %v958_v0 = vmul.f32 %v4718_v56, %v957_v35  ;;  %vm1109_vm5 = vcmp.eq.f32.partialorder %v1108_v59, 8.507059e+37  ;;  %vm4760_vm9 = vmor %vm979_vm7, %vm980_vm0 }
 0x19c   :  { %v3817_v44 = vpop.eup %3816  ;;  %v977_v50 = vmul.f32 %v4720_v63, %v976_v23 }
 0x19d   :  { %v4730_v38 = vadd.f32 1.0, %v3817_v44  ;;  %v3819_v37 = vpop.eup %3818  ;;  %v1089_v44 = vand.u32 2147483647, %v1079_v51 }
 0x19e   :  { %v3821_v27 = vpop.eup %3820  ;;  %v1081_v14 = vmul.f32 %v3819_v37, %v1079_v51  ;;  %vm1086_vm13 = vweird.f32 %v3819_v37  ;;  %v959_v51 = vadd.f32 %v4718_v56, %v958_v0 }
 0x19f   :  { %v3823_v4 = vpop.eup %3822  ;;  %3824 = vrcp.f32 %v4730_v38  ;;  %v4736_v18 = vadd.f32 1.0, %v3821_v27  ;;  %vm1087_vm2 = vmor %vm1085_vm14, %vm1086_vm13  ;;  %vm1090_vm3 = vcmp.eq.f32.partialorder %v1089_v44, 8.507059e+37  ;;  %vm1124_vm13 = vweird.f32 %v4730_v38 }
 0x1a0   :  { %v1082_v13 = vsub.f32 1.0, %v1081_v14  ;;  %v1100_v15 = vmul.f32 %v3823_v4, %v1098_v24  ;;  %3826 = vtanh.f32 %v1074_v29  ;;  %vm1105_vm15 = vweird.f32 %v3823_v4 }
 0x1a1   :  { %3828 = vrcp.f32 %v4736_v18  ;;  %vm1106_vm4 = vmor %vm1104_vm1, %vm1105_vm15  ;;  %v1128_v22 = vand.u32 2147483647, %v4730_v38  ;;  %vm999_vm1 = vweird.f32 %v4736_v18 }
 0x1a2   :  { %v1101_v47 = vsub.f32 1.0, %v1100_v15  ;;  %v1083_v39 = vmul.f32 %v3819_v37, %v1082_v13  ;;  %v1092_v13 = vor.u32 1.1754944e-38, %v1091_v30  ;;  %v978_v15 = vadd.f32 %v4720_v63, %v977_v50 }
 0x1a3   :  { %v985_v30 = vand.u32 2147483648, %v4713_v5  ;;  %3830 = vtanh.f32 %v949_v36  ;;  %v1130_v36 = vand.u32 2147483648, %v4730_v38  ;;  %vm1129_vm15 = vcmp.eq.f32.partialorder %v1128_v22, 8.507059e+37  ;;  %v6100_v22 = vld [vmem:[#allocation33_spill] sm:$0xff] }
 0x1a4   :  { %v1102_v62 = vmul.f32 %v3823_v4, %v1101_v47  ;;  %v1084_v14 = vadd.f32 %v3819_v37, %v1083_v39  ;;  %v1111_v47 = vor.u32 1.1754944e-38, %v1110_v60  ;;  %v983_v60 = vand.u32 2147483647, %v4713_v5 }
 0x1a5   :  { %v3825_v11 = vpop.eup %3824  ;;  %v1003_v50 = vand.u32 2147483647, %v4736_v18 }
 0x1a6   :  { %v1088_v29 = vsel %vm1087_vm2, %v3819_v37, %v1084_v14  ;;  %v1103_v27 = vadd.f32 %v3823_v4, %v1102_v62  ;;  %v1120_v23 = vmul.f32 %v3825_v11, %v4730_v38  ;;  %v3827_v35 = vpop.eup %3826  ;;  %v966_v37 = vand.u32 2147483648, %v4711_v61 }
 0x1a7   :  { %v1093_v39 = vsel %vm1090_vm3, %v1092_v13, %v1088_v29  ;;  %v3829_v0 = vpop.eup %3828  ;;  %v982_v61 = vsel %vm4760_vm9, %v4720_v63, %v978_v15  ;;  %vm1125_vm11 = vweird.f32 %v3825_v11  ;;  %vm984_vm12 = vcmp.eq.f32.partialorder %v983_v60, 8.507059e+37 }
 0x1a8   :  { %v1107_v55 = vsel %vm1106_vm4, %v3823_v4, %v1103_v27  ;;  %v1135_v52 = vmul.f32 %v3827_v35, %v1093_v39  ;;  %v1121_v24 = vsub.f32 1.0, %v1120_v23  ;;  %v967_v14 = vor.u32 1.1754944e-38, %v966_v37  ;;  %vm1126_vm14 = vmor %vm1124_vm13, %vm1125_vm11 }
 0x1a9   :  { %v1112_v44 = vsel %vm1109_vm5, %v1111_v47, %v1107_v55  ;;  %v963_v55 = vsel %vm4752_vm8, %v4718_v56, %v959_v51  ;;  %v995_v29 = vmul.f32 %v3829_v0, %v4736_v18  ;;  %v1131_v51 = vor.u32 1.1754944e-38, %v1130_v36  ;;  %v6097_v36 = vld [vmem:[#allocation31_spill] sm:$0xff] }
 0x1aa   :  { %v1134_v59 = vmul.f32 %v1112_v44, %v4593_v31  ;;  %v1122_v4 = vmul.f32 %v3825_v11, %v1121_v24  ;;  %v986_v31 = vor.u32 1.1754944e-38, %v985_v30  ;;  %v968_v27 = vsel %vm965_vm10, %v967_v14, %v963_v55  ;;  %v6094_v14 = vld [vmem:[#allocation26_spill] sm:$0xff] }
 0x1ab   :  { %v996_v15 = vsub.f32 1.0, %v995_v29  ;;  %vm1000_vm0 = vweird.f32 %v3829_v0  ;;  %v1005_v38 = vand.u32 2147483648, %v4736_v18  ;;  %vm1004_vm3 = vcmp.eq.f32.partialorder %v1003_v50, 8.507059e+37  ;;  %v6096_v29 = vld [vmem:[#allocation29_spill] sm:$0xff]  ;;  %v6114_v50 = vld [vmem:[#allocation47_spill] sm:$0xff] }
 0x1ac   :  { %v4770_v5 = vadd.f32 %v1135_v52, %v1134_v59  ;;  %v1123_v13 = vadd.f32 %v3825_v11, %v1122_v4  ;;  %v987_v56 = vsel %vm984_vm12, %v986_v31, %v982_v61  ;;  %v3831_v52 = vpop.eup %3830  ;;  %vm1001_vm2 = vmor %vm999_vm1, %vm1000_vm0  ;;  %v6092_v61 = vld [vmem:[#allocation25_spill] sm:$0xff]  ;;  %v6093_v31 = vld [vmem:[#allocation27_spill] sm:$0xff] }
 0x1ad   :  { %v1009_v23 = vmul.f32 0.0, %v987_v56  ;;  %v1010_v35 = vmul.f32 %v3831_v52, %v968_v27  ;;  %v997_v44 = vmul.f32 %v3829_v0, %v996_v15  ;;  %v1006_v4 = vor.u32 1.1754944e-38, %v1005_v38  ;;  %v6098_v27 = vld [vmem:[#allocation30_spill] sm:$0xff]  ;;  %v6099_v56 = vld [vmem:[#allocation32_spill] sm:$0xff]  ;;  %v6101_v52 = vld [vmem:[#allocation35_spill] sm:$0xff] }
 0x1ae   :  { %3832 = vtanh.f32 %v4770_v5  ;;  %v1127_v63 = vsel %vm1126_vm14, %v3825_v11, %v1123_v13  ;;  %v6095_v13 = vld [vmem:[#allocation28_spill] sm:$0xff]  ;;  %v6106_v15 = vld [vmem:[#allocation39_spill] sm:$0xff]  ;;  %v6113_v38 = vld [vmem:[#allocation46_spill] sm:$0xff] }
 0x1af   :  { %v1132_v39 = vsel %vm1129_vm15, %v1131_v51, %v1127_v63  ;;  %v4777_v30 = vadd.f32 %v1010_v35, %v1009_v23  ;;  %v998_v11 = vadd.f32 %v3829_v0, %v997_v44  ;;  %v6102_v63 = vld [vmem:[#allocation34_spill] sm:$0xff]  ;;  %v6103_v23 = vld [vmem:[#allocation36_spill] sm:$0xff]  ;;  %v6104_v35 = vld [vmem:[#allocation37_spill] sm:$0xff] }
 0x1b0   :  { %v6105_v51 = vld [vmem:[#allocation38_spill] sm:$0xff]  ;;  %v6111_v44 = vld [vmem:[#allocation44_spill] sm:$0xff] }
 0x1b1   :  { %3834 = vtanh.f32 %v4777_v30  ;;  %v1002_v60 = vsel %vm1001_vm2, %v3829_v0, %v998_v11  ;;  %v6091_v0 = vld [vmem:[#allocation24_spill] sm:$0xff]  ;;  %v6112_v11 = vld [vmem:[#allocation45_spill] sm:$0xff] }
 0x1b2   :  { %v1007_v62 = vsel %vm1004_vm3, %v1006_v4, %v1002_v60  ;;  %v6115_v60 = vld [vmem:[#allocation48_spill] sm:$0xff]  ;;  %v6117_v4 = vld [vmem:[#allocation50_spill] sm:$0xff] }
 0x1b4   :  { %v3833_v47 = vpop.eup %3832 }
 0x1b5   :  { %v1138_v24 = vmul.f32 %v3833_v47, %v1132_v39  ;;  %v6107_v47 = vld [vmem:[#allocation40_spill] sm:$0xff]  ;;  %v6108_v39 = vld [vmem:[#allocation41_spill] sm:$0xff] }
 0x1b7   :  { %v1139_v37 = vpack.c.bf16 %v1138_v24, %v1138_v24  ;;  %v3835_v59 = vpop.eup %3834  ;;  %v6109_v24 = vld [vmem:[#allocation42_spill] sm:$0xff] }
 0x1b8   :  { %v1013_v55 = vmul.f32 %v3835_v59, %v1007_v62  ;;  %v6116_v59 = vld [vmem:[#allocation49_spill] sm:$0xff]  ;;  %v6118_v62 = vld [vmem:[#allocation51_spill] sm:$0xff] }
 0x1b9   :  { %1148 = vmatmul.bf16.vlgmr.msra.gmra.mxu0 %v1139_v37  ;;  %1161 = vmatmul.bf16.vlgmr.msra.gmra.mxu1 %v1139_v37 }
 0x1ba   :  { %1174 = vmatmul.bf16.vlgmr.msra.gmra.mxu2 %v1139_v37  ;;  %1187 = vmatmul.bf16.vlgmr.msra.gmra.mxu3 %v1139_v37  ;;  %v1014_v18 = vpack.c.bf16 %v1013_v55, %v1013_v55  ;;  %v6119_v55 = vld [vmem:[#allocation52_spill] sm:$0xff] }
 0x1bb   :  { %1317 = vmatpush.bf16.msra.mxu0 %v4294_v3  ;;  %1330 = vmatpush.bf16.msra.mxu1 %v4296_v7 }
 0x1bc   :  { %1343 = vmatpush.bf16.msra.mxu2 %v4309_v21  ;;  %1356 = vmatpush.bf16.msra.mxu3 %v4298_v8 }
 0x1bf   :  { %1318 = vmatpush.bf16.msra.mxu0 %v4301_v12  ;;  %1331 = vmatpush.bf16.msra.mxu1 %v4305_v16 }
 0x1c0   :  { %1344 = vmatpush.bf16.msra.mxu2 %v4321_v34  ;;  %1357 = vmatpush.bf16.msra.mxu3 %v4307_v17 }
 0x1c3   :  { %1319 = vmatpush.bf16.msra.mxu0 %v4313_v28  ;;  %1332 = vmatpush.bf16.msra.mxu1 %v4317_v32 }
 0x1c4   :  { %1345 = vmatpush.bf16.msra.mxu2 %v4327_v42  ;;  %1358 = vmatpush.bf16.msra.mxu3 %v4319_v33 }
 0x1c7   :  { %1320 = vmatpush.bf16.msra.mxu0 %v4325_v41  ;;  %1333 = vmatpush.bf16.msra.mxu1 %v4331_v45 }
 0x1c8   :  { %1346 = vmatpush.bf16.msra.mxu2 %v4339_v54  ;;  %1359 = vmatpush.bf16.msra.mxu3 %v4333_v46 }
 0x1c9   :  { %1200 = vmatmul.bf16.vlgmr.msrb.gmra.mxu0 %v1014_v18  ;;  %1213 = vmatmul.bf16.vlgmr.msrb.gmra.mxu1 %v1014_v18 }
 0x1ca   :  { %1226 = vmatmul.bf16.vlgmr.msrb.gmra.mxu2 %v1014_v18  ;;  %1239 = vmatmul.bf16.vlgmr.msrb.gmra.mxu3 %v1014_v18  ;;  %v6120_v18 = vld [vmem:[#allocation53_spill] sm:$0xff] }
 0x1cb   :  { %1321 = vmatpush.bf16.msra.mxu0 %v4337_v53  ;;  %1334 = vmatpush.bf16.msra.mxu1 %v4343_v57 }
 0x1cc   :  { %1347 = vmatpush.bf16.msra.mxu2 %v4351_v2  ;;  %1360 = vmatpush.bf16.msra.mxu3 %v4345_v58 }
 0x1cf   :  { %1322 = vmatpush.bf16.msra.mxu0 %v4349_v1  ;;  %1335 = vmatpush.bf16.msra.mxu1 %v4355_v6 }
 0x1d0   :  { %1348 = vmatpush.bf16.msra.mxu2 %v4363_v20  ;;  %1361 = vmatpush.bf16.msra.mxu3 %v4357_v9 }
 0x1d3   :  { %1323 = vmatpush.bf16.msra.mxu0 %v4361_v19  ;;  %1336 = vmatpush.bf16.msra.mxu1 %v4367_v25 }
 0x1d4   :  { %1349 = vmatpush.bf16.msra.mxu2 %v4375_v43  ;;  %1362 = vmatpush.bf16.msra.mxu3 %v4369_v26 }
 0x1d7   :  { %1324 = vmatpush.bf16.msra.mxu0 %v4373_v40  ;;  %1337 = vmatpush.bf16.msra.mxu1 %v4379_v48 }
 0x1d8   :  { %1350 = vmatpush.bf16.msra.mxu2 %v4393_v10  ;;  %1363 = vmatpush.bf16.msra.mxu3 %v4381_v49 }
 0x1da   :  { %1325 = vmatmul.bf16.vlgmr.msra.gmra.mxu0 %v1139_v37  ;;  %1338 = vmatmul.bf16.vlgmr.msra.gmra.mxu1 %v1139_v37 }
 0x1db   :  { %1437 = vmatpush.bf16.msrb.mxu0 %v6091_v0  ;;  %1450 = vmatpush.bf16.msrb.mxu1 %v6092_v61 }
 0x1dc   :  { %1351 = vmatmul.bf16.vlgmr.msra.gmra.mxu2 %v1139_v37  ;;  %1364 = vmatmul.bf16.vlgmr.msra.gmra.mxu3 %v1139_v37  ;;  %v6110_v37 = vld [vmem:[#allocation43_spill] sm:$0xff] }
 0x1dd   :  { %1463 = vmatpush.bf16.msrb.mxu2 %v6093_v31  ;;  %1476 = vmatpush.bf16.msrb.mxu3 %v6094_v14 }
 0x1df   :  { %1438 = vmatpush.bf16.msrb.mxu0 %v6095_v13  ;;  %1451 = vmatpush.bf16.msrb.mxu1 %v6096_v29 }
 0x1e1   :  { %1464 = vmatpush.bf16.msrb.mxu2 %v6097_v36  ;;  %1477 = vmatpush.bf16.msrb.mxu3 %v6098_v27 }
 0x1e3   :  { %1439 = vmatpush.bf16.msrb.mxu0 %v6099_v56  ;;  %1452 = vmatpush.bf16.msrb.mxu1 %v6100_v22 }
 0x1e5   :  { %1465 = vmatpush.bf16.msrb.mxu2 %v6101_v52  ;;  %1478 = vmatpush.bf16.msrb.mxu3 %v6102_v63 }
 0x1e7   :  { %1440 = vmatpush.bf16.msrb.mxu0 %v6103_v23  ;;  %1453 = vmatpush.bf16.msrb.mxu1 %v6104_v35 }
 0x1e9   :  { %1466 = vmatpush.bf16.msrb.mxu2 %v6105_v51  ;;  %1479 = vmatpush.bf16.msrb.mxu3 %v6106_v15 }
 0x1eb   :  { %1441 = vmatpush.bf16.msrb.mxu0 %v6107_v47  ;;  %1454 = vmatpush.bf16.msrb.mxu1 %v6108_v39 }
 0x1ed   :  { %1467 = vmatpush.bf16.msrb.mxu2 %v6109_v24  ;;  %1480 = vmatpush.bf16.msrb.mxu3 %v6110_v37  ;;  %v6121_v37 = vld [vmem:[#allocation56_spill] sm:$0xff] }
 0x1ef   :  { %1442 = vmatpush.bf16.msrb.mxu0 %v6111_v44  ;;  %1455 = vmatpush.bf16.msrb.mxu1 %v6112_v11  ;;  %v6122_v44 = vld [vmem:[#allocation57_spill] sm:$0xff]  ;;  %v6123_v11 = vld [vmem:[#allocation54_spill] sm:$0xff] }
 0x1f1   :  { %1468 = vmatpush.bf16.msrb.mxu2 %v6113_v38  ;;  %1481 = vmatpush.bf16.msrb.mxu3 %v6114_v50  ;;  %v6124_v38 = vld [vmem:[#allocation55_spill] sm:$0xff]  ;;  %v6125_v50 = vld [vmem:[#allocation58_spill] sm:$0xff] }
 0x1f3   :  { %1443 = vmatpush.bf16.msrb.mxu0 %v6115_v60  ;;  %1456 = vmatpush.bf16.msrb.mxu1 %v6116_v59  ;;  %v6126_v60 = vld [vmem:[#allocation59_spill] sm:$0xff]  ;;  %v6127_v59 = vld [vmem:[#allocation60_spill] sm:$0xff] }
 0x1f5   :  { %1469 = vmatpush.bf16.msrb.mxu2 %v6117_v4  ;;  %1482 = vmatpush.bf16.msrb.mxu3 %v6118_v62  ;;  %v6128_v4 = vld [vmem:[#allocation61_spill] sm:$0xff]  ;;  %v6129_v62 = vld [vmem:[#allocation62_spill] sm:$0xff] }
 0x1f7   :  { %1444 = vmatpush.bf16.msrb.mxu0 %v6119_v55  ;;  %1457 = vmatpush.bf16.msrb.mxu1 %v6120_v18  ;;  %v6130_v55 = vld [vmem:[#allocation63_spill] sm:$0xff]  ;;  %v6131_v18 = vld [vmem:[#allocation64_spill] sm:$0xff] }
 0x1f9   :  { %1470 = vmatpush.bf16.msrb.mxu2 %v6123_v11  ;;  %1483 = vmatpush.bf16.msrb.mxu3 %v6124_v38  ;;  %v6134_v11 = vld [vmem:[#allocation67_spill] sm:$0xff]  ;;  %v6135_v38 = vld [vmem:[#allocation68_spill] sm:$0xff] }
 0x1fb   :  { %1489 = vmatpush.bf16.msra.mxu0 %v6121_v37  ;;  %1502 = vmatpush.bf16.msra.mxu1 %v6122_v44  ;;  %v6132_v37 = vld [vmem:[#allocation65_spill] sm:$0xff]  ;;  %v6133_v44 = vld [vmem:[#allocation66_spill] sm:$0xff] }
 0x1fd   :  { %1515 = vmatpush.bf16.msra.mxu2 %v6125_v50  ;;  %1528 = vmatpush.bf16.msra.mxu3 %v6126_v60  ;;  %v6136_v50 = vld [vmem:[#allocation69_spill] sm:$0xff]  ;;  %v6137_v60 = vld [vmem:[#allocation70_spill] sm:$0xff] }
 0x1ff   :  { %1490 = vmatpush.bf16.msra.mxu0 %v6127_v59  ;;  %1503 = vmatpush.bf16.msra.mxu1 %v6128_v4  ;;  %v6138_v59 = vld [vmem:[#allocation71_spill] sm:$0xff]  ;;  %v6139_v4 = vld [vmem:[#allocation72_spill] sm:$0xff] }
 0x201   :  { %1516 = vmatpush.bf16.msra.mxu2 %v6129_v62  ;;  %1529 = vmatpush.bf16.msra.mxu3 %v6130_v55  ;;  %v6140_v62 = vld [vmem:[#allocation73_spill] sm:$0xff]  ;;  %v6141_v55 = vld [vmem:[#allocation74_spill] sm:$0xff] }
 0x203   :  { %1491 = vmatpush.bf16.msra.mxu0 %v6131_v18  ;;  %1504 = vmatpush.bf16.msra.mxu1 %v6132_v37  ;;  %v6142_v18 = vld [vmem:[#allocation75_spill] sm:$0xff]  ;;  %v6143_v37 = vld [vmem:[#allocation76_spill] sm:$0xff] }
 0x205   :  { %1517 = vmatpush.bf16.msra.mxu2 %v6133_v44  ;;  %1530 = vmatpush.bf16.msra.mxu3 %v6134_v11  ;;  %v6144_v44 = vld [vmem:[#allocation77_spill] sm:$0xff]  ;;  %v6145_v11 = vld [vmem:[#allocation78_spill] sm:$0xff] }
 0x207   :  { %1492 = vmatpush.bf16.msra.mxu0 %v6135_v38  ;;  %1505 = vmatpush.bf16.msra.mxu1 %v6136_v50  ;;  %v6146_v38 = vld [vmem:[#allocation79_spill] sm:$0xff]  ;;  %v6147_v50 = vld [vmem:[#allocation80_spill] sm:$0xff] }
 0x209   :  { %1518 = vmatpush.bf16.msra.mxu2 %v6137_v60  ;;  %1531 = vmatpush.bf16.msra.mxu3 %v6138_v59  ;;  %v6148_v60 = vld [vmem:[#allocation81_spill] sm:$0xff]  ;;  %v6149_v59 = vld [vmem:[#allocation82_spill] sm:$0xff] }
 0x20b   :  { %1493 = vmatpush.bf16.msra.mxu0 %v6139_v4  ;;  %1506 = vmatpush.bf16.msra.mxu1 %v6140_v62  ;;  %v6150_v4 = vld [vmem:[#allocation83_spill] sm:$0xff]  ;;  %v6151_v62 = vld [vmem:[#allocation84_spill] sm:$0xff] }
 0x20d   :  { %1519 = vmatpush.bf16.msra.mxu2 %v6141_v55  ;;  %1532 = vmatpush.bf16.msra.mxu3 %v6142_v18  ;;  %v6152_v55 = vld [vmem:[#allocation85_spill] sm:$0xff]  ;;  %v6153_v18 = vld [vmem:[#allocation86_spill] sm:$0xff] }
 0x20f   :  { %1494 = vmatpush.bf16.msra.mxu0 %v6143_v37  ;;  %1507 = vmatpush.bf16.msra.mxu1 %v6144_v44  ;;  %v6154_v37 = vld [vmem:[#allocation87_spill] sm:$0xff] }
 0x211   :  { %1520 = vmatpush.bf16.msra.mxu2 %v6145_v11  ;;  %1533 = vmatpush.bf16.msra.mxu3 %v6146_v38 }
 0x213   :  { %1495 = vmatpush.bf16.msra.mxu0 %v6147_v50  ;;  %1508 = vmatpush.bf16.msra.mxu1 %v6148_v60 }
 0x215   :  { %1521 = vmatpush.bf16.msra.mxu2 %v6149_v59  ;;  %1534 = vmatpush.bf16.msra.mxu3 %v6150_v4 }
 0x217   :  { %1496 = vmatpush.bf16.msra.mxu0 %v6151_v62  ;;  %1509 = vmatpush.bf16.msra.mxu1 %v6152_v55  ;;  %v6155_v62 = vld [vmem:[#allocation88_spill] sm:$0xff]  ;;  %v6156_v55 = vld [vmem:[#allocation89_spill] sm:$0xff] }
 0x219   :  { %1522 = vmatpush.bf16.msra.mxu2 %v6153_v18  ;;  %1535 = vmatpush.bf16.msra.mxu3 %v6154_v37 }
 0x236   :  { %v1149_v44 = vpop.f32.mrf.mxu0  ;;  %v1162_v11 = vpop.f32.mrf.mxu1 }
 0x23d   :  { %v4879_v24 = vpop.f32.mrf.mxu2  ;;  %v1188_v38 = vpop.f32.mrf.mxu3 }
 0x23e   :  { %v1151_v50 = vpop.f32.mrf.mxu0  ;;  %v1164_v39 = vpop.f32.mrf.mxu1 }
 0x245   :  { %v1177_v60 = vpop.f32.mrf.mxu2  ;;  %v1190_v47 = vpop.f32.mrf.mxu3 }
 0x246   :  { %v1201_v59 = vpop.f32.mrf.mxu0  ;;  %v1214_v15 = vpop.f32.mrf.mxu1  ;;  %v1313_v60 = vld [vmem:[#allocation6 + $0x40] sm:$0xff]  ;;  %v1314_v47 = vld [vmem:[#allocation6 + $0x48] sm:$0xff] }
 0x247   :  { %v1202_v4 = vadd.f32 %v1201_v59, %v1149_v44  ;;  %v1215_v51 = vadd.f32 %v1214_v15, %v1162_v11 }
 0x249   :  { %v1244_v35 = vadd.f32 %v1202_v4, %v6155_v62  ;;  %v1245_v23 = vadd.f32 %v1215_v51, %v6156_v55 }
 0x24b   :  { %v3598_v37 = vmul.f32 -1.442695, %v1244_v35  ;;  %v3599_v56 = vmul.f32 -1.442695, %v1245_v23 }
 0x24d   :  { %v1227_v18 = vpop.f32.mrf.mxu2  ;;  %v1240_v63 = vpop.f32.mrf.mxu3  ;;  %3836 = vpow2.f32 %v3598_v37 }
 0x24e   :  { %v1203_v52 = vpop.f32.mrf.mxu0  ;;  %v1216_v22 = vpop.f32.mrf.mxu1  ;;  %3838 = vpow2.f32 %v3599_v56  ;;  %v1241_v4 = vadd.f32 %v1240_v63, %v1188_v38  ;;  %v6157_v56 = vld [vmem:[#allocation90_spill] sm:$0xff] }
 0x24f   :  { %v1316_v22 = vld [vmem:[#allocation6 + $0x58] sm:$0xff] }
 0x250   :  { %v1247_v23 = vadd.f32 %v1241_v4, %v6157_v56  ;;  %v1315_v4 = vld [vmem:[#allocation6 + $0x50] sm:$0xff] }
 0x253   :  { %v3837_v44 = vpop.eup %3836 }
 0x254   :  { %v3839_v59 = vpop.eup %3838  ;;  %v4883_v62 = vadd.f32 1.0, %v3837_v44 }
 0x255   :  { %v1229_v50 = vpop.f32.mrf.mxu2  ;;  %v1242_v39 = vpop.f32.mrf.mxu3  ;;  %v4885_v52 = vadd.f32 1.0, %v3839_v59 }
 0x256   :  { %v3600_v39 = vmul.f32 -1.442695, %v1247_v23  ;;  %v1261_v29 = vand.u32 2147483647, %v4883_v62  ;;  %vm1257_vm14 = vweird.f32 %v4883_v62 }
 0x257   :  { %v1326_v27 = vpop.f32.mrf.mxu0  ;;  %v1339_v36 = vpop.f32.mrf.mxu1  ;;  %vm1276_vm15 = vweird.f32 %v4885_v52 }
 0x258   :  { %v1369_v15 = vadd.f32 %v1326_v27, %v1313_v60  ;;  %v1370_v11 = vadd.f32 %v1339_v36, %v1314_v47  ;;  %vm1262_vm2 = vcmp.eq.f32.partialorder %v1261_v29, 8.507059e+37 }
 0x25a   :  { %v3601_v51 = vmul.f32 -1.442695, %v1369_v15  ;;  %v3602_v55 = vmul.f32 -1.442695, %v1370_v11 }
 0x25c   :  { %3840 = vpow2.f32 %v3601_v51 }
 0x25d   :  { %3842 = vpow2.f32 %v3602_v55 }
 0x25e   :  { %3844 = vrcp.f32 %v4883_v62 }
 0x25f   :  { %v1352_v35 = vpop.f32.mrf.mxu2  ;;  %v1365_v37 = vpop.f32.mrf.mxu3  ;;  %3846 = vrcp.f32 %v4885_v52 }
 0x260   :  { %v1372_v50 = vadd.f32 %v1365_v37, %v1316_v22  ;;  %v1328_v27 = vpop.f32.mrf.mxu0  ;;  %v1341_v36 = vpop.f32.mrf.mxu1  ;;  %v1228_v37 = vadd.f32 %v1227_v18, %v4879_v24 }
 0x261   :  { %v1371_v36 = vadd.f32 %v1352_v35, %v1315_v4 }
 0x262   :  { %v3603_v63 = vmul.f32 -1.442695, %v1372_v50  ;;  %v3841_v38 = vpop.eup %3840 }
 0x263   :  { %v1376_v60 = vadd.f32 1.0, %v3841_v38  ;;  %v3843_v47 = vpop.eup %3842 }
 0x264   :  { %3848 = vpow2.f32 %v3603_v63  ;;  %v4890_v44 = vpop.eup %3844  ;;  %v1395_v15 = vadd.f32 1.0, %v3843_v47 }
 0x265   :  { %3850 = vrcp.f32 %v1376_v60  ;;  %v4892_v55 = vpop.eup %3846  ;;  %v1253_v22 = vmul.f32 %v4890_v44, %v4883_v62  ;;  %vm1258_vm4 = vweird.f32 %v4890_v44  ;;  %v1388_v18 = vand.u32 2147483648, %v1376_v60 }
 0x266   :  { %3852 = vpow2.f32 %v3600_v39  ;;  %v1272_v23 = vmul.f32 %v4892_v55, %v4885_v52  ;;  %v1407_v31 = vand.u32 2147483648, %v1395_v15  ;;  %vm1382_vm6 = vweird.f32 %v1376_v60  ;;  %vm4921_vm0 = vmor %vm1257_vm14, %vm1258_vm4 }
 0x267   :  { %v1354_v11 = vpop.f32.mrf.mxu2  ;;  %v1367_v59 = vpop.f32.mrf.mxu3  ;;  %3854 = vrcp.f32 %v1395_v15  ;;  %v1254_v47 = vsub.f32 1.0, %v1253_v22  ;;  %vm1277_vm8 = vweird.f32 %v4892_v55  ;;  %vm1401_vm9 = vweird.f32 %v1395_v15 }
 0x268   :  { %v1273_v11 = vsub.f32 1.0, %v1272_v23  ;;  %v6158_v59 = vld [vmem:[#allocation91_spill] sm:$0xff]  ;;  %vm4929_vm1 = vmor %vm1276_vm15, %vm1277_vm8 }
 0x269   :  { %v1246_v56 = vadd.f32 %v1228_v37, %v6158_v59  ;;  %v1255_v23 = vmul.f32 %v4890_v44, %v1254_v47  ;;  %v1405_v59 = vand.u32 2147483647, %v1395_v15 }
 0x26a   :  { %v3849_v51 = vpop.eup %3848  ;;  %v1274_v22 = vmul.f32 %v4892_v55, %v1273_v11 }
 0x26b   :  { %v4899_v50 = vadd.f32 1.0, %v3849_v51  ;;  %v3851_v27 = vpop.eup %3850  ;;  %v1386_v51 = vand.u32 2147483647, %v1376_v60  ;;  %vm1406_vm13 = vcmp.eq.f32.partialorder %v1405_v59, 8.507059e+37 }
 0x26c   :  { %v3853_v63 = vpop.eup %3852  ;;  %v1378_v38 = vmul.f32 %v3851_v27, %v1376_v60  ;;  %vm1383_vm5 = vweird.f32 %v3851_v27  ;;  %v1256_v60 = vadd.f32 %v4890_v44, %v1255_v23  ;;  %v1275_v11 = vadd.f32 %v4892_v55, %v1274_v22 }
 0x26d   :  { %v3855_v39 = vpop.eup %3854  ;;  %3856 = vrcp.f32 %v4899_v50  ;;  %v4905_v24 = vadd.f32 1.0, %v3853_v63  ;;  %vm1384_vm10 = vmor %vm1382_vm6, %vm1383_vm5  ;;  %vm1387_vm11 = vcmp.eq.f32.partialorder %v1386_v51, 8.507059e+37  ;;  %vm1421_vm5 = vweird.f32 %v4899_v50 }
 0x26e   :  { %v1379_v13 = vsub.f32 1.0, %v1378_v38  ;;  %v1397_v14 = vmul.f32 %v3855_v39, %v1395_v15  ;;  %3858 = vtanh.f32 %v1371_v36  ;;  %vm1402_vm7 = vweird.f32 %v3855_v39 }
 0x26f   :  { %3860 = vrcp.f32 %v4905_v24  ;;  %vm1403_vm12 = vmor %vm1401_vm9, %vm1402_vm7  ;;  %v1425_v29 = vand.u32 2147483647, %v4899_v50  ;;  %vm1296_vm9 = vweird.f32 %v4905_v24 }
 0x270   :  { %v1398_v35 = vsub.f32 1.0, %v1397_v14  ;;  %v1380_v4 = vmul.f32 %v3851_v27, %v1379_v13  ;;  %v1389_v14 = vor.u32 1.1754944e-38, %v1388_v18  ;;  %v1282_v18 = vand.u32 2147483648, %v4885_v52 }
 0x271   :  { %3862 = vtanh.f32 %v1246_v56  ;;  %v1427_v56 = vand.u32 2147483648, %v4899_v50  ;;  %vm1426_vm7 = vcmp.eq.f32.partialorder %v1425_v29, 8.507059e+37  ;;  %v6173_v29 = vld [vmem:[#allocation33_spill] sm:$0xff] }
 0x272   :  { %v1399_v37 = vmul.f32 %v3855_v39, %v1398_v35  ;;  %v1381_v38 = vadd.f32 %v3851_v27, %v1380_v4  ;;  %v1408_v35 = vor.u32 1.1754944e-38, %v1407_v31  ;;  %v1280_v31 = vand.u32 2147483647, %v4885_v52 }
 0x273   :  { %v3857_v61 = vpop.eup %3856 }
 0x274   :  { %v1385_v13 = vsel %vm1384_vm10, %v3851_v27, %v1381_v38  ;;  %v1400_v36 = vadd.f32 %v3855_v39, %v1399_v37  ;;  %v1417_v63 = vmul.f32 %v3857_v61, %v4899_v50  ;;  %v3859_v47 = vpop.eup %3858  ;;  %v1263_v27 = vand.u32 2147483648, %v4883_v62 }
 0x275   :  { %v1390_v4 = vsel %vm1387_vm11, %v1389_v14, %v1385_v13  ;;  %v3861_v23 = vpop.eup %3860  ;;  %v1279_v62 = vsel %vm4929_vm1, %v4892_v55, %v1275_v11  ;;  %vm1422_vm3 = vweird.f32 %v3857_v61  ;;  %vm1281_vm4 = vcmp.eq.f32.partialorder %v1280_v31, 8.507059e+37 }
 0x276   :  { %v1404_v0 = vsel %vm1403_vm12, %v3855_v39, %v1400_v36  ;;  %v1432_v49 = vmul.f32 %v3859_v47, %v1390_v4  ;;  %v1418_v15 = vsub.f32 1.0, %v1417_v63  ;;  %v1264_v38 = vor.u32 1.1754944e-38, %v1263_v27  ;;  %vm1423_vm6 = vmor %vm1421_vm5, %vm1422_vm3 }
 0x277   :  { %v1409_v51 = vsel %vm1406_vm13, %v1408_v35, %v1404_v0  ;;  %v1260_v0 = vsel %vm4921_vm0, %v4890_v44, %v1256_v60  ;;  %v1292_v13 = vmul.f32 %v3861_v23, %v4905_v24  ;;  %v1428_v60 = vor.u32 1.1754944e-38, %v1427_v56  ;;  %v6170_v56 = vld [vmem:[#allocation31_spill] sm:$0xff] }
 0x278   :  { %v1431_v39 = vmul.f32 %v1409_v51, %v4770_v5  ;;  %v1419_v59 = vmul.f32 %v3857_v61, %v1418_v15  ;;  %v1283_v5 = vor.u32 1.1754944e-38, %v1282_v18  ;;  %v1265_v36 = vsel %vm1262_vm2, %v1264_v38, %v1260_v0  ;;  %v6164_v0 = vld [vmem:[#allocation24_spill] sm:$0xff]  ;;  %v6167_v38 = vld [vmem:[#allocation26_spill] sm:$0xff] }
 0x279   :  { %v1293_v11 = vsub.f32 1.0, %v1292_v13  ;;  %vm1297_vm8 = vweird.f32 %v3861_v23  ;;  %v1300_v50 = vand.u32 2147483647, %v4905_v24  ;;  %v6169_v13 = vld [vmem:[#allocation29_spill] sm:$0xff] }
 0x27a   :  { %v4939_v52 = vadd.f32 %v1432_v49, %v1431_v39  ;;  %v1420_v14 = vadd.f32 %v3857_v61, %v1419_v59  ;;  %v1284_v44 = vsel %vm1281_vm4, %v1283_v5, %v1279_v62  ;;  %v3863_v49 = vpop.eup %3862  ;;  %vm1298_vm10 = vmor %vm1296_vm9, %vm1297_vm8  ;;  %v6165_v62 = vld [vmem:[#allocation25_spill] sm:$0xff]  ;;  %v6166_v5 = vld [vmem:[#allocation27_spill] sm:$0xff] }
 0x27b   :  { %v1306_v63 = vmul.f32 %v1284_v44, %v4777_v30  ;;  %v1307_v47 = vmul.f32 %v3863_v49, %v1265_v36  ;;  %v1294_v51 = vmul.f32 %v3861_v23, %v1293_v11  ;;  %vm1301_vm11 = vcmp.eq.f32.partialorder %v1300_v50, 8.507059e+37  ;;  %v6171_v36 = vld [vmem:[#allocation30_spill] sm:$0xff]  ;;  %v6172_v44 = vld [vmem:[#allocation32_spill] sm:$0xff]  ;;  %v6174_v49 = vld [vmem:[#allocation35_spill] sm:$0xff] }
 0x27c   :  { %3864 = vtanh.f32 %v4939_v52  ;;  %v1424_v55 = vsel %vm1423_vm6, %v3857_v61, %v1420_v14  ;;  %v1302_v61 = vand.u32 2147483648, %v4905_v24  ;;  %v6168_v14 = vld [vmem:[#allocation28_spill] sm:$0xff]  ;;  %v6179_v11 = vld [vmem:[#allocation39_spill] sm:$0xff] }
 0x27d   :  { %v1429_v4 = vsel %vm1426_vm7, %v1428_v60, %v1424_v55  ;;  %v4947_v18 = vadd.f32 %v1307_v47, %v1306_v63  ;;  %v1295_v30 = vadd.f32 %v3861_v23, %v1294_v51  ;;  %v6175_v55 = vld [vmem:[#allocation34_spill] sm:$0xff]  ;;  %v6176_v63 = vld [vmem:[#allocation36_spill] sm:$0xff]  ;;  %v6177_v47 = vld [vmem:[#allocation37_spill] sm:$0xff] }
 0x27e   :  { %v1303_v39 = vor.u32 1.1754944e-38, %v1302_v61  ;;  %v6178_v60 = vld [vmem:[#allocation38_spill] sm:$0xff]  ;;  %v6184_v51 = vld [vmem:[#allocation44_spill] sm:$0xff]  ;;  %v6187_v50 = vld [vmem:[#allocation47_spill] sm:$0xff] }
 0x27f   :  { %3866 = vtanh.f32 %v4947_v18  ;;  %v1299_v22 = vsel %vm1298_vm10, %v3861_v23, %v1295_v30  ;;  %v6163_v23 = vld [vmem:[#allocation23_spill] sm:$0xff]  ;;  %v6185_v30 = vld [vmem:[#allocation45_spill] sm:$0xff]  ;;  %v6186_v61 = vld [vmem:[#allocation46_spill] sm:$0xff] }
 0x280   :  { %v1304_v59 = vsel %vm1301_vm11, %v1303_v39, %v1299_v22  ;;  %v6188_v22 = vld [vmem:[#allocation48_spill] sm:$0xff]  ;;  %v6190_v39 = vld [vmem:[#allocation50_spill] sm:$0xff] }
 0x282   :  { %v3865_v35 = vpop.eup %3864 }
 0x283   :  { %v1435_v15 = vmul.f32 %v3865_v35, %v1429_v4  ;;  %v6180_v35 = vld [vmem:[#allocation40_spill] sm:$0xff]  ;;  %v6181_v4 = vld [vmem:[#allocation41_spill] sm:$0xff] }
 0x285   :  { %v1436_v27 = vpack.c.bf16 %v1435_v15, %v1435_v15  ;;  %v3867_v31 = vpop.eup %3866  ;;  %v6182_v15 = vld [vmem:[#allocation42_spill] sm:$0xff] }
 0x286   :  { %v1310_v37 = vmul.f32 %v3867_v31, %v1304_v59  ;;  %v6189_v31 = vld [vmem:[#allocation49_spill] sm:$0xff]  ;;  %v6191_v59 = vld [vmem:[#allocation51_spill] sm:$0xff] }
 0x287   :  { %1445 = vmatmul.bf16.vlgmr.msrb.gmra.mxu0 %v1436_v27  ;;  %1458 = vmatmul.bf16.vlgmr.msrb.gmra.mxu1 %v1436_v27 }
 0x288   :  { %1471 = vmatmul.bf16.vlgmr.msrb.gmra.mxu2 %v1436_v27  ;;  %1484 = vmatmul.bf16.vlgmr.msrb.gmra.mxu3 %v1436_v27  ;;  %v1311_v24 = vpack.c.bf16 %v1310_v37, %v1310_v37  ;;  %v6192_v37 = vld [vmem:[#allocation52_spill] sm:$0xff] }
 0x289   :  { %1614 = vmatpush.bf16.msrb.mxu0 %v4294_v3  ;;  %1627 = vmatpush.bf16.msrb.mxu1 %v4296_v7 }
 0x28a   :  { %1640 = vmatpush.bf16.msrb.mxu2 %v4309_v21  ;;  %1653 = vmatpush.bf16.msrb.mxu3 %v4298_v8 }
 0x28d   :  { %1615 = vmatpush.bf16.msrb.mxu0 %v4301_v12  ;;  %1628 = vmatpush.bf16.msrb.mxu1 %v4305_v16 }
 0x28e   :  { %1641 = vmatpush.bf16.msrb.mxu2 %v4321_v34  ;;  %1654 = vmatpush.bf16.msrb.mxu3 %v4307_v17 }
 0x291   :  { %1616 = vmatpush.bf16.msrb.mxu0 %v4313_v28  ;;  %1629 = vmatpush.bf16.msrb.mxu1 %v4317_v32 }
 0x292   :  { %1642 = vmatpush.bf16.msrb.mxu2 %v4327_v42  ;;  %1655 = vmatpush.bf16.msrb.mxu3 %v4319_v33 }
 0x295   :  { %1617 = vmatpush.bf16.msrb.mxu0 %v4325_v41  ;;  %1630 = vmatpush.bf16.msrb.mxu1 %v4331_v45 }
 0x296   :  { %1643 = vmatpush.bf16.msrb.mxu2 %v4339_v54  ;;  %1656 = vmatpush.bf16.msrb.mxu3 %v4333_v46 }
 0x297   :  { %1497 = vmatmul.bf16.vlgmr.msra.gmra.mxu0 %v1311_v24  ;;  %1510 = vmatmul.bf16.vlgmr.msra.gmra.mxu1 %v1311_v24 }
 0x298   :  { %1523 = vmatmul.bf16.vlgmr.msra.gmra.mxu2 %v1311_v24  ;;  %1536 = vmatmul.bf16.vlgmr.msra.gmra.mxu3 %v1311_v24  ;;  %v6193_v24 = vld [vmem:[#allocation53_spill] sm:$0xff] }
 0x299   :  { %1618 = vmatpush.bf16.msrb.mxu0 %v4337_v53  ;;  %1631 = vmatpush.bf16.msrb.mxu1 %v4343_v57 }
 0x29a   :  { %1644 = vmatpush.bf16.msrb.mxu2 %v4351_v2  ;;  %1657 = vmatpush.bf16.msrb.mxu3 %v4345_v58 }
 0x29d   :  { %1619 = vmatpush.bf16.msrb.mxu0 %v4349_v1  ;;  %1632 = vmatpush.bf16.msrb.mxu1 %v4355_v6 }
 0x29e   :  { %1645 = vmatpush.bf16.msrb.mxu2 %v4363_v20  ;;  %1658 = vmatpush.bf16.msrb.mxu3 %v4357_v9 }
 0x2a1   :  { %1620 = vmatpush.bf16.msrb.mxu0 %v4361_v19  ;;  %1633 = vmatpush.bf16.msrb.mxu1 %v4367_v25 }
 0x2a2   :  { %1646 = vmatpush.bf16.msrb.mxu2 %v4375_v43  ;;  %1659 = vmatpush.bf16.msrb.mxu3 %v4369_v26 }
 0x2a5   :  { %1621 = vmatpush.bf16.msrb.mxu0 %v4373_v40  ;;  %1634 = vmatpush.bf16.msrb.mxu1 %v4379_v48 }
 0x2a6   :  { %1647 = vmatpush.bf16.msrb.mxu2 %v4393_v10  ;;  %1660 = vmatpush.bf16.msrb.mxu3 %v6163_v23 }
 0x2a8   :  { %1622 = vmatmul.bf16.vlgmr.msrb.gmra.mxu0 %v1436_v27  ;;  %1635 = vmatmul.bf16.vlgmr.msrb.gmra.mxu1 %v1436_v27 }
 0x2a9   :  { %1734 = vmatpush.bf16.msra.mxu0 %v6164_v0  ;;  %1747 = vmatpush.bf16.msra.mxu1 %v6165_v62 }
 0x2aa   :  { %1648 = vmatmul.bf16.vlgmr.msrb.gmra.mxu2 %v1436_v27  ;;  %1661 = vmatmul.bf16.vlgmr.msrb.gmra.mxu3 %v1436_v27  ;;  %v6183_v27 = vld [vmem:[#allocation43_spill] sm:$0xff] }
 0x2ab   :  { %1760 = vmatpush.bf16.msra.mxu2 %v6166_v5  ;;  %1773 = vmatpush.bf16.msra.mxu3 %v6167_v38 }
 0x2ad   :  { %1735 = vmatpush.bf16.msra.mxu0 %v6168_v14  ;;  %1748 = vmatpush.bf16.msra.mxu1 %v6169_v13 }
 0x2af   :  { %1761 = vmatpush.bf16.msra.mxu2 %v6170_v56  ;;  %1774 = vmatpush.bf16.msra.mxu3 %v6171_v36 }
 0x2b1   :  { %1736 = vmatpush.bf16.msra.mxu0 %v6172_v44  ;;  %1749 = vmatpush.bf16.msra.mxu1 %v6173_v29 }
 0x2b3   :  { %1762 = vmatpush.bf16.msra.mxu2 %v6174_v49  ;;  %1775 = vmatpush.bf16.msra.mxu3 %v6175_v55 }
 0x2b5   :  { %1737 = vmatpush.bf16.msra.mxu0 %v6176_v63  ;;  %1750 = vmatpush.bf16.msra.mxu1 %v6177_v47 }
 0x2b7   :  { %1763 = vmatpush.bf16.msra.mxu2 %v6178_v60  ;;  %1776 = vmatpush.bf16.msra.mxu3 %v6179_v11 }
 0x2b9   :  { %1738 = vmatpush.bf16.msra.mxu0 %v6180_v35  ;;  %1751 = vmatpush.bf16.msra.mxu1 %v6181_v4 }
 0x2bb   :  { %1764 = vmatpush.bf16.msra.mxu2 %v6182_v15  ;;  %1777 = vmatpush.bf16.msra.mxu3 %v6183_v27  ;;  %v6194_v27 = vld [vmem:[#allocation56_spill] sm:$0xff] }
 0x2bd   :  { %1739 = vmatpush.bf16.msra.mxu0 %v6184_v51  ;;  %1752 = vmatpush.bf16.msra.mxu1 %v6185_v30  ;;  %v6195_v51 = vld [vmem:[#allocation57_spill] sm:$0xff]  ;;  %v6196_v30 = vld [vmem:[#allocation54_spill] sm:$0xff] }
 0x2bf   :  { %1765 = vmatpush.bf16.msra.mxu2 %v6186_v61  ;;  %1778 = vmatpush.bf16.msra.mxu3 %v6187_v50  ;;  %v6197_v61 = vld [vmem:[#allocation55_spill] sm:$0xff]  ;;  %v6198_v50 = vld [vmem:[#allocation58_spill] sm:$0xff] }
 0x2c1   :  { %1740 = vmatpush.bf16.msra.mxu0 %v6188_v22  ;;  %1753 = vmatpush.bf16.msra.mxu1 %v6189_v31  ;;  %v6199_v22 = vld [vmem:[#allocation59_spill] sm:$0xff]  ;;  %v6200_v31 = vld [vmem:[#allocation60_spill] sm:$0xff] }
 0x2c3   :  { %1766 = vmatpush.bf16.msra.mxu2 %v6190_v39  ;;  %1779 = vmatpush.bf16.msra.mxu3 %v6191_v59  ;;  %v6201_v39 = vld [vmem:[#allocation61_spill] sm:$0xff]  ;;  %v6202_v59 = vld [vmem:[#allocation62_spill] sm:$0xff] }
 0x2c5   :  { %1741 = vmatpush.bf16.msra.mxu0 %v6192_v37  ;;  %1754 = vmatpush.bf16.msra.mxu1 %v6193_v24  ;;  %v6203_v37 = vld [vmem:[#allocation63_spill] sm:$0xff]  ;;  %v6204_v24 = vld [vmem:[#allocation64_spill] sm:$0xff] }
 0x2c7   :  { %1767 = vmatpush.bf16.msra.mxu2 %v6196_v30  ;;  %1780 = vmatpush.bf16.msra.mxu3 %v6197_v61  ;;  %v6207_v30 = vld [vmem:[#allocation67_spill] sm:$0xff]  ;;  %v6208_v61 = vld [vmem:[#allocation68_spill] sm:$0xff] }
 0x2c9   :  { %1786 = vmatpush.bf16.msrb.mxu0 %v6194_v27  ;;  %1799 = vmatpush.bf16.msrb.mxu1 %v6195_v51  ;;  %v6205_v27 = vld [vmem:[#allocation65_spill] sm:$0xff]  ;;  %v6206_v51 = vld [vmem:[#allocation66_spill] sm:$0xff] }
 0x2cb   :  { %1812 = vmatpush.bf16.msrb.mxu2 %v6198_v50  ;;  %1825 = vmatpush.bf16.msrb.mxu3 %v6199_v22  ;;  %v6209_v50 = vld [vmem:[#allocation69_spill] sm:$0xff]  ;;  %v6210_v22 = vld [vmem:[#allocation70_spill] sm:$0xff] }
 0x2cd   :  { %1787 = vmatpush.bf16.msrb.mxu0 %v6200_v31  ;;  %1800 = vmatpush.bf16.msrb.mxu1 %v6201_v39  ;;  %v6211_v31 = vld [vmem:[#allocation71_spill] sm:$0xff]  ;;  %v6212_v39 = vld [vmem:[#allocation72_spill] sm:$0xff] }
 0x2cf   :  { %1813 = vmatpush.bf16.msrb.mxu2 %v6202_v59  ;;  %1826 = vmatpush.bf16.msrb.mxu3 %v6203_v37  ;;  %v6213_v59 = vld [vmem:[#allocation73_spill] sm:$0xff]  ;;  %v6214_v37 = vld [vmem:[#allocation74_spill] sm:$0xff] }
 0x2d1   :  { %1788 = vmatpush.bf16.msrb.mxu0 %v6204_v24  ;;  %1801 = vmatpush.bf16.msrb.mxu1 %v6205_v27  ;;  %v6215_v24 = vld [vmem:[#allocation75_spill] sm:$0xff]  ;;  %v6216_v27 = vld [vmem:[#allocation76_spill] sm:$0xff] }
 0x2d3   :  { %1814 = vmatpush.bf16.msrb.mxu2 %v6206_v51  ;;  %1827 = vmatpush.bf16.msrb.mxu3 %v6207_v30  ;;  %v6217_v51 = vld [vmem:[#allocation77_spill] sm:$0xff]  ;;  %v6218_v30 = vld [vmem:[#allocation78_spill] sm:$0xff] }
 0x2d5   :  { %1789 = vmatpush.bf16.msrb.mxu0 %v6208_v61  ;;  %1802 = vmatpush.bf16.msrb.mxu1 %v6209_v50  ;;  %v6219_v61 = vld [vmem:[#allocation79_spill] sm:$0xff]  ;;  %v6220_v50 = vld [vmem:[#allocation80_spill] sm:$0xff] }
 0x2d7   :  { %1815 = vmatpush.bf16.msrb.mxu2 %v6210_v22  ;;  %1828 = vmatpush.bf16.msrb.mxu3 %v6211_v31  ;;  %v6221_v22 = vld [vmem:[#allocation81_spill] sm:$0xff]  ;;  %v6222_v31 = vld [vmem:[#allocation82_spill] sm:$0xff] }
 0x2d9   :  { %1790 = vmatpush.bf16.msrb.mxu0 %v6212_v39  ;;  %1803 = vmatpush.bf16.msrb.mxu1 %v6213_v59  ;;  %v6223_v39 = vld [vmem:[#allocation83_spill] sm:$0xff]  ;;  %v6224_v59 = vld [vmem:[#allocation84_spill] sm:$0xff] }
 0x2db   :  { %1816 = vmatpush.bf16.msrb.mxu2 %v6214_v37  ;;  %1829 = vmatpush.bf16.msrb.mxu3 %v6215_v24  ;;  %v6225_v37 = vld [vmem:[#allocation85_spill] sm:$0xff]  ;;  %v6226_v24 = vld [vmem:[#allocation86_spill] sm:$0xff] }
 0x2dd   :  { %1791 = vmatpush.bf16.msrb.mxu0 %v6216_v27  ;;  %1804 = vmatpush.bf16.msrb.mxu1 %v6217_v51  ;;  %v6227_v27 = vld [vmem:[#allocation87_spill] sm:$0xff] }
 0x2df   :  { %1817 = vmatpush.bf16.msrb.mxu2 %v6218_v30  ;;  %1830 = vmatpush.bf16.msrb.mxu3 %v6219_v61 }
 0x2e1   :  { %1792 = vmatpush.bf16.msrb.mxu0 %v6220_v50  ;;  %1805 = vmatpush.bf16.msrb.mxu1 %v6221_v22 }
 0x2e3   :  { %1818 = vmatpush.bf16.msrb.mxu2 %v6222_v31  ;;  %1831 = vmatpush.bf16.msrb.mxu3 %v6223_v39 }
 0x2e5   :  { %1793 = vmatpush.bf16.msrb.mxu0 %v6224_v59  ;;  %1806 = vmatpush.bf16.msrb.mxu1 %v6225_v37  ;;  %v6228_v59 = vld [vmem:[#allocation88_spill] sm:$0xff]  ;;  %v6229_v37 = vld [vmem:[#allocation89_spill] sm:$0xff] }
 0x2e7   :  { %1819 = vmatpush.bf16.msrb.mxu2 %v6226_v24  ;;  %1832 = vmatpush.bf16.msrb.mxu3 %v6227_v27 }
 0x304   :  { %v1446_v51 = vpop.f32.mrf.mxu0  ;;  %v1459_v30 = vpop.f32.mrf.mxu1 }
 0x30b   :  { %v5049_v15 = vpop.f32.mrf.mxu2  ;;  %v1485_v61 = vpop.f32.mrf.mxu3 }
 0x30c   :  { %v1448_v50 = vpop.f32.mrf.mxu0  ;;  %v1461_v4 = vpop.f32.mrf.mxu1 }
 0x313   :  { %v1474_v22 = vpop.f32.mrf.mxu2  ;;  %v1487_v35 = vpop.f32.mrf.mxu3 }
 0x314   :  { %v1498_v31 = vpop.f32.mrf.mxu0  ;;  %v1511_v11 = vpop.f32.mrf.mxu1  ;;  %v1610_v22 = vld [vmem:[#allocation6 + $0x60] sm:$0xff]  ;;  %v1611_v35 = vld [vmem:[#allocation6 + $0x68] sm:$0xff] }
 0x315   :  { %v1499_v39 = vadd.f32 %v1498_v31, %v1446_v51  ;;  %v1512_v60 = vadd.f32 %v1511_v11, %v1459_v30 }
 0x317   :  { %v1541_v47 = vadd.f32 %v1499_v39, %v6228_v59  ;;  %v1542_v63 = vadd.f32 %v1512_v60, %v6229_v37 }
 0x319   :  { %v3604_v27 = vmul.f32 -1.442695, %v1541_v47  ;;  %v3605_v44 = vmul.f32 -1.442695, %v1542_v63 }
 0x31b   :  { %v1524_v24 = vpop.f32.mrf.mxu2  ;;  %v1537_v55 = vpop.f32.mrf.mxu3  ;;  %3868 = vpow2.f32 %v3604_v27 }
 0x31c   :  { %v1500_v49 = vpop.f32.mrf.mxu0  ;;  %v1513_v29 = vpop.f32.mrf.mxu1  ;;  %3870 = vpow2.f32 %v3605_v44  ;;  %v1538_v39 = vadd.f32 %v1537_v55, %v1485_v61  ;;  %v6230_v44 = vld [vmem:[#allocation90_spill] sm:$0xff] }
 0x31d   :  { %v1613_v29 = vld [vmem:[#allocation6 + $0x78] sm:$0xff] }
 0x31e   :  { %v1544_v63 = vadd.f32 %v1538_v39, %v6230_v44  ;;  %v1612_v39 = vld [vmem:[#allocation6 + $0x70] sm:$0xff] }
 0x321   :  { %v3869_v51 = vpop.eup %3868 }
 0x322   :  { %v3871_v31 = vpop.eup %3870  ;;  %v5053_v59 = vadd.f32 1.0, %v3869_v51 }
 0x323   :  { %v1526_v50 = vpop.f32.mrf.mxu2  ;;  %v1539_v4 = vpop.f32.mrf.mxu3  ;;  %v5055_v49 = vadd.f32 1.0, %v3871_v31 }
 0x324   :  { %v3606_v4 = vmul.f32 -1.442695, %v1544_v63  ;;  %v1558_v13 = vand.u32 2147483647, %v5053_v59  ;;  %vm1554_vm6 = vweird.f32 %v5053_v59 }
 0x325   :  { %v1623_v36 = vpop.f32.mrf.mxu0  ;;  %v1636_v56 = vpop.f32.mrf.mxu1  ;;  %vm1573_vm7 = vweird.f32 %v5055_v49 }
 0x326   :  { %v1666_v11 = vadd.f32 %v1623_v36, %v1610_v22  ;;  %v1667_v30 = vadd.f32 %v1636_v56, %v1611_v35  ;;  %vm1559_vm10 = vcmp.eq.f32.partialorder %v1558_v13, 8.507059e+37 }
 0x328   :  { %v3607_v60 = vmul.f32 -1.442695, %v1666_v11  ;;  %v3608_v37 = vmul.f32 -1.442695, %v1667_v30 }
 0x32a   :  { %3872 = vpow2.f32 %v3607_v60 }
 0x32b   :  { %3874 = vpow2.f32 %v3608_v37 }
 0x32c   :  { %3876 = vrcp.f32 %v5053_v59 }
 0x32d   :  { %v1649_v47 = vpop.f32.mrf.mxu2  ;;  %v1662_v27 = vpop.f32.mrf.mxu3  ;;  %3878 = vrcp.f32 %v5055_v49 }
 0x32e   :  { %v1669_v50 = vadd.f32 %v1662_v27, %v1613_v29  ;;  %v1625_v36 = vpop.f32.mrf.mxu0  ;;  %v1638_v56 = vpop.f32.mrf.mxu1  ;;  %v1525_v27 = vadd.f32 %v1524_v24, %v5049_v15 }
 0x32f   :  { %v1668_v56 = vadd.f32 %v1649_v47, %v1612_v39 }
 0x330   :  { %v3609_v55 = vmul.f32 -1.442695, %v1669_v50  ;;  %v3873_v61 = vpop.eup %3872 }
 0x331   :  { %v1673_v22 = vadd.f32 1.0, %v3873_v61  ;;  %v3875_v35 = vpop.eup %3874 }
 0x332   :  { %3880 = vpow2.f32 %v3609_v55  ;;  %v5060_v51 = vpop.eup %3876  ;;  %v1692_v11 = vadd.f32 1.0, %v3875_v35 }
 0x333   :  { %3882 = vrcp.f32 %v1673_v22  ;;  %v5062_v37 = vpop.eup %3878  ;;  %v1550_v29 = vmul.f32 %v5060_v51, %v5053_v59  ;;  %vm1555_vm12 = vweird.f32 %v5060_v51  ;;  %v1685_v24 = vand.u32 2147483648, %v1673_v22 }
 0x334   :  { %3884 = vpow2.f32 %v3606_v4  ;;  %v1569_v63 = vmul.f32 %v5062_v37, %v5055_v49  ;;  %v1704_v5 = vand.u32 2147483648, %v1692_v11  ;;  %vm1679_vm14 = vweird.f32 %v1673_v22  ;;  %vm5091_vm8 = vmor %vm1554_vm6, %vm1555_vm12 }
 0x335   :  { %v1651_v30 = vpop.f32.mrf.mxu2  ;;  %v1664_v31 = vpop.f32.mrf.mxu3  ;;  %3886 = vrcp.f32 %v1692_v11  ;;  %v1551_v35 = vsub.f32 1.0, %v1550_v29  ;;  %vm1574_vm0 = vweird.f32 %v5062_v37  ;;  %vm1698_vm1 = vweird.f32 %v1692_v11 }
 0x336   :  { %v1570_v30 = vsub.f32 1.0, %v1569_v63  ;;  %v6231_v31 = vld [vmem:[#allocation91_spill] sm:$0xff]  ;;  %vm5099_vm9 = vmor %vm1573_vm7, %vm1574_vm0 }
 0x337   :  { %v1543_v44 = vadd.f32 %v1525_v27, %v6231_v31  ;;  %v1552_v63 = vmul.f32 %v5060_v51, %v1551_v35  ;;  %v1702_v31 = vand.u32 2147483647, %v1692_v11 }
 0x338   :  { %v3881_v60 = vpop.eup %3880  ;;  %v1571_v29 = vmul.f32 %v5062_v37, %v1570_v30 }
 0x339   :  { %v5069_v50 = vadd.f32 1.0, %v3881_v60  ;;  %v3883_v36 = vpop.eup %3882  ;;  %v1683_v60 = vand.u32 2147483647, %v1673_v22  ;;  %vm1703_vm5 = vcmp.eq.f32.partialorder %v1702_v31, 8.507059e+37 }
 0x33a   :  { %v3885_v55 = vpop.eup %3884  ;;  %v1675_v61 = vmul.f32 %v3883_v36, %v1673_v22  ;;  %vm1680_vm13 = vweird.f32 %v3883_v36  ;;  %v1553_v22 = vadd.f32 %v5060_v51, %v1552_v63  ;;  %v1572_v30 = vadd.f32 %v5062_v37, %v1571_v29 }
 0x33b   :  { %v3887_v4 = vpop.eup %3886  ;;  %3888 = vrcp.f32 %v5069_v50  ;;  %v5075_v15 = vadd.f32 1.0, %v3885_v55  ;;  %vm1681_vm2 = vmor %vm1679_vm14, %vm1680_vm13  ;;  %vm1684_vm3 = vcmp.eq.f32.partialorder %v1683_v60, 8.507059e+37  ;;  %vm1718_vm13 = vweird.f32 %v5069_v50 }
 0x33c   :  { %v1676_v14 = vsub.f32 1.0, %v1675_v61  ;;  %v1694_v38 = vmul.f32 %v3887_v4, %v1692_v11  ;;  %3890 = vtanh.f32 %v1668_v56  ;;  %vm1699_vm15 = vweird.f32 %v3887_v4 }
 0x33d   :  { %3892 = vrcp.f32 %v5075_v15  ;;  %vm1700_vm4 = vmor %vm1698_vm1, %vm1699_vm15  ;;  %v1722_v13 = vand.u32 2147483647, %v5069_v50  ;;  %vm1593_vm1 = vweird.f32 %v5075_v15 }
 0x33e   :  { %v1695_v47 = vsub.f32 1.0, %v1694_v38  ;;  %v1677_v39 = vmul.f32 %v3883_v36, %v1676_v14  ;;  %v1686_v38 = vor.u32 1.1754944e-38, %v1685_v24  ;;  %v1579_v24 = vand.u32 2147483648, %v5055_v49 }
 0x33f   :  { %3894 = vtanh.f32 %v1543_v44  ;;  %v1724_v44 = vand.u32 2147483648, %v5069_v50  ;;  %vm1723_vm15 = vcmp.eq.f32.partialorder %v1722_v13, 8.507059e+37  ;;  %v6246_v13 = vld [vmem:[#allocation33_spill] sm:$0xff] }
 0x340   :  { %v1696_v27 = vmul.f32 %v3887_v4, %v1695_v47  ;;  %v1678_v61 = vadd.f32 %v3883_v36, %v1677_v39  ;;  %v1705_v47 = vor.u32 1.1754944e-38, %v1704_v5  ;;  %v1577_v5 = vand.u32 2147483647, %v5055_v49 }
 0x341   :  { %v3889_v62 = vpop.eup %3888 }
 0x342   :  { %v1682_v14 = vsel %vm1681_vm2, %v3883_v36, %v1678_v61  ;;  %v1697_v56 = vadd.f32 %v3887_v4, %v1696_v27  ;;  %v1714_v55 = vmul.f32 %v3889_v62, %v5069_v50  ;;  %v3891_v35 = vpop.eup %3890  ;;  %v1560_v36 = vand.u32 2147483648, %v5053_v59 }
 0x343   :  { %v1687_v39 = vsel %vm1684_vm3, %v1686_v38, %v1682_v14  ;;  %v3893_v63 = vpop.eup %3892  ;;  %v1576_v59 = vsel %vm5099_vm9, %v5062_v37, %v1572_v30  ;;  %vm1719_vm11 = vweird.f32 %v3889_v62  ;;  %vm1578_vm12 = vcmp.eq.f32.partialorder %v1577_v5, 8.507059e+37 }
 0x344   :  { %v1701_v0 = vsel %vm1700_vm4, %v3887_v4, %v1697_v56  ;;  %v1729_v23 = vmul.f32 %v3891_v35, %v1687_v39  ;;  %v1715_v11 = vsub.f32 1.0, %v1714_v55  ;;  %v1561_v61 = vor.u32 1.1754944e-38, %v1560_v36  ;;  %vm1720_vm14 = vmor %vm1718_vm13, %vm1719_vm11 }
 0x345   :  { %v1706_v60 = vsel %vm1703_vm5, %v1705_v47, %v1701_v0  ;;  %v1557_v0 = vsel %vm5091_vm8, %v5060_v51, %v1553_v22  ;;  %v1589_v14 = vmul.f32 %v3893_v63, %v5075_v15  ;;  %v1725_v22 = vor.u32 1.1754944e-38, %v1724_v44  ;;  %v6243_v44 = vld [vmem:[#allocation31_spill] sm:$0xff] }
 0x346   :  { %v1728_v4 = vmul.f32 %v1706_v60, %v4939_v52  ;;  %v1716_v31 = vmul.f32 %v3889_v62, %v1715_v11  ;;  %v1580_v52 = vor.u32 1.1754944e-38, %v1579_v24  ;;  %v1562_v56 = vsel %vm1559_vm10, %v1561_v61, %v1557_v0  ;;  %v6237_v0 = vld [vmem:[#allocation24_spill] sm:$0xff]  ;;  %v6240_v61 = vld [vmem:[#allocation26_spill] sm:$0xff] }
 0x347   :  { %v1590_v30 = vsub.f32 1.0, %v1589_v14  ;;  %vm1594_vm0 = vweird.f32 %v3893_v63  ;;  %v1597_v50 = vand.u32 2147483647, %v5075_v15  ;;  %v6242_v14 = vld [vmem:[#allocation29_spill] sm:$0xff] }
 0x348   :  { %v5109_v49 = vadd.f32 %v1729_v23, %v1728_v4  ;;  %v1717_v38 = vadd.f32 %v3889_v62, %v1716_v31  ;;  %v1581_v51 = vsel %vm1578_vm12, %v1580_v52, %v1576_v59  ;;  %v3895_v23 = vpop.eup %3894  ;;  %vm1595_vm2 = vmor %vm1593_vm1, %vm1594_vm0  ;;  %v6238_v59 = vld [vmem:[#allocation25_spill] sm:$0xff]  ;;  %v6239_v52 = vld [vmem:[#allocation27_spill] sm:$0xff] }
 0x349   :  { %v1603_v55 = vmul.f32 %v1581_v51, %v4947_v18  ;;  %v1604_v35 = vmul.f32 %v3895_v23, %v1562_v56  ;;  %v1591_v60 = vmul.f32 %v3893_v63, %v1590_v30  ;;  %vm1598_vm3 = vcmp.eq.f32.partialorder %v1597_v50, 8.507059e+37  ;;  %v6244_v56 = vld [vmem:[#allocation30_spill] sm:$0xff]  ;;  %v6245_v51 = vld [vmem:[#allocation32_spill] sm:$0xff]  ;;  %v6247_v23 = vld [vmem:[#allocation35_spill] sm:$0xff] }
 0x34a   :  { %3896 = vtanh.f32 %v5109_v49  ;;  %v1721_v37 = vsel %vm1720_vm14, %v3889_v62, %v1717_v38  ;;  %v1599_v62 = vand.u32 2147483648, %v5075_v15  ;;  %v6241_v38 = vld [vmem:[#allocation28_spill] sm:$0xff]  ;;  %v6252_v30 = vld [vmem:[#allocation39_spill] sm:$0xff] }
 0x34b   :  { %v1726_v39 = vsel %vm1723_vm15, %v1725_v22, %v1721_v37  ;;  %v5117_v24 = vadd.f32 %v1604_v35, %v1603_v55  ;;  %v1592_v18 = vadd.f32 %v3893_v63, %v1591_v60  ;;  %v6248_v37 = vld [vmem:[#allocation34_spill] sm:$0xff]  ;;  %v6249_v55 = vld [vmem:[#allocation36_spill] sm:$0xff]  ;;  %v6250_v35 = vld [vmem:[#allocation37_spill] sm:$0xff] }
 0x34c   :  { %v1600_v4 = vor.u32 1.1754944e-38, %v1599_v62  ;;  %v6251_v22 = vld [vmem:[#allocation38_spill] sm:$0xff]  ;;  %v6257_v60 = vld [vmem:[#allocation44_spill] sm:$0xff]  ;;  %v6260_v50 = vld [vmem:[#allocation47_spill] sm:$0xff] }
 0x34d   :  { %3898 = vtanh.f32 %v5117_v24  ;;  %v1596_v29 = vsel %vm1595_vm2, %v3893_v63, %v1592_v18  ;;  %v6236_v63 = vld [vmem:[#allocation23_spill] sm:$0xff]  ;;  %v6258_v18 = vld [vmem:[#allocation45_spill] sm:$0xff]  ;;  %v6259_v62 = vld [vmem:[#allocation46_spill] sm:$0xff] }
 0x34e   :  { %v1601_v31 = vsel %vm1598_vm3, %v1600_v4, %v1596_v29  ;;  %v6261_v29 = vld [vmem:[#allocation48_spill] sm:$0xff]  ;;  %v6263_v4 = vld [vmem:[#allocation50_spill] sm:$0xff] }
 0x350   :  { %v3897_v47 = vpop.eup %3896 }
 0x351   :  { %v1732_v11 = vmul.f32 %v3897_v47, %v1726_v39  ;;  %v6253_v47 = vld [vmem:[#allocation40_spill] sm:$0xff]  ;;  %v6254_v39 = vld [vmem:[#allocation41_spill] sm:$0xff] }
 0x353   :  { %v1733_v36 = vpack.c.bf16 %v1732_v11, %v1732_v11  ;;  %v3899_v5 = vpop.eup %3898  ;;  %v6255_v11 = vld [vmem:[#allocation42_spill] sm:$0xff] }
 0x354   :  { %v1607_v27 = vmul.f32 %v3899_v5, %v1601_v31  ;;  %v6262_v5 = vld [vmem:[#allocation49_spill] sm:$0xff]  ;;  %v6264_v31 = vld [vmem:[#allocation51_spill] sm:$0xff] }
 0x355   :  { %1742 = vmatmul.bf16.vlgmr.msra.gmra.mxu0 %v1733_v36  ;;  %1755 = vmatmul.bf16.vlgmr.msra.gmra.mxu1 %v1733_v36 }
 0x356   :  { %1768 = vmatmul.bf16.vlgmr.msra.gmra.mxu2 %v1733_v36  ;;  %1781 = vmatmul.bf16.vlgmr.msra.gmra.mxu3 %v1733_v36  ;;  %v1608_v15 = vpack.c.bf16 %v1607_v27, %v1607_v27  ;;  %v6265_v27 = vld [vmem:[#allocation52_spill] sm:$0xff] }
 0x357   :  { %1911 = vmatpush.bf16.msra.mxu0 %v4294_v3  ;;  %1924 = vmatpush.bf16.msra.mxu1 %v4296_v7 }
 0x358   :  { %1937 = vmatpush.bf16.msra.mxu2 %v4309_v21  ;;  %1950 = vmatpush.bf16.msra.mxu3 %v4298_v8 }
 0x35b   :  { %1912 = vmatpush.bf16.msra.mxu0 %v4301_v12  ;;  %1925 = vmatpush.bf16.msra.mxu1 %v4305_v16 }
 0x35c   :  { %1938 = vmatpush.bf16.msra.mxu2 %v4321_v34  ;;  %1951 = vmatpush.bf16.msra.mxu3 %v4307_v17 }
 0x35f   :  { %1913 = vmatpush.bf16.msra.mxu0 %v4313_v28  ;;  %1926 = vmatpush.bf16.msra.mxu1 %v4317_v32 }
 0x360   :  { %1939 = vmatpush.bf16.msra.mxu2 %v4327_v42  ;;  %1952 = vmatpush.bf16.msra.mxu3 %v4319_v33 }
 0x363   :  { %1914 = vmatpush.bf16.msra.mxu0 %v4325_v41  ;;  %1927 = vmatpush.bf16.msra.mxu1 %v4331_v45 }
 0x364   :  { %1940 = vmatpush.bf16.msra.mxu2 %v4339_v54  ;;  %1953 = vmatpush.bf16.msra.mxu3 %v4333_v46 }
 0x365   :  { %1794 = vmatmul.bf16.vlgmr.msrb.gmra.mxu0 %v1608_v15  ;;  %1807 = vmatmul.bf16.vlgmr.msrb.gmra.mxu1 %v1608_v15 }
 0x366   :  { %1820 = vmatmul.bf16.vlgmr.msrb.gmra.mxu2 %v1608_v15  ;;  %1833 = vmatmul.bf16.vlgmr.msrb.gmra.mxu3 %v1608_v15  ;;  %v6266_v15 = vld [vmem:[#allocation53_spill] sm:$0xff] }
 0x367   :  { %1915 = vmatpush.bf16.msra.mxu0 %v4337_v53  ;;  %1928 = vmatpush.bf16.msra.mxu1 %v4343_v57 }
 0x368   :  { %1941 = vmatpush.bf16.msra.mxu2 %v4351_v2  ;;  %1954 = vmatpush.bf16.msra.mxu3 %v4345_v58 }
 0x36b   :  { %1916 = vmatpush.bf16.msra.mxu0 %v4349_v1  ;;  %1929 = vmatpush.bf16.msra.mxu1 %v4355_v6 }
 0x36c   :  { %1942 = vmatpush.bf16.msra.mxu2 %v4363_v20  ;;  %1955 = vmatpush.bf16.msra.mxu3 %v4357_v9 }
 0x36f   :  { %1917 = vmatpush.bf16.msra.mxu0 %v4361_v19  ;;  %1930 = vmatpush.bf16.msra.mxu1 %v4367_v25 }
 0x370   :  { %1943 = vmatpush.bf16.msra.mxu2 %v4375_v43  ;;  %1956 = vmatpush.bf16.msra.mxu3 %v4369_v26 }
 0x373   :  { %1918 = vmatpush.bf16.msra.mxu0 %v4373_v40  ;;  %1931 = vmatpush.bf16.msra.mxu1 %v4379_v48 }
 0x374   :  { %1944 = vmatpush.bf16.msra.mxu2 %v4393_v10  ;;  %1957 = vmatpush.bf16.msra.mxu3 %v6236_v63 }
 0x376   :  { %1919 = vmatmul.bf16.vlgmr.msra.gmra.mxu0 %v1733_v36  ;;  %1932 = vmatmul.bf16.vlgmr.msra.gmra.mxu1 %v1733_v36 }
 0x377   :  { %2031 = vmatpush.bf16.msrb.mxu0 %v6237_v0  ;;  %2044 = vmatpush.bf16.msrb.mxu1 %v6238_v59 }
 0x378   :  { %1945 = vmatmul.bf16.vlgmr.msra.gmra.mxu2 %v1733_v36  ;;  %1958 = vmatmul.bf16.vlgmr.msra.gmra.mxu3 %v1733_v36  ;;  %v6256_v36 = vld [vmem:[#allocation43_spill] sm:$0xff] }
 0x379   :  { %2057 = vmatpush.bf16.msrb.mxu2 %v6239_v52  ;;  %2070 = vmatpush.bf16.msrb.mxu3 %v6240_v61 }
 0x37b   :  { %2032 = vmatpush.bf16.msrb.mxu0 %v6241_v38  ;;  %2045 = vmatpush.bf16.msrb.mxu1 %v6242_v14 }
 0x37d   :  { %2058 = vmatpush.bf16.msrb.mxu2 %v6243_v44  ;;  %2071 = vmatpush.bf16.msrb.mxu3 %v6244_v56 }
 0x37f   :  { %2033 = vmatpush.bf16.msrb.mxu0 %v6245_v51  ;;  %2046 = vmatpush.bf16.msrb.mxu1 %v6246_v13 }
 0x381   :  { %2059 = vmatpush.bf16.msrb.mxu2 %v6247_v23  ;;  %2072 = vmatpush.bf16.msrb.mxu3 %v6248_v37 }
 0x383   :  { %2034 = vmatpush.bf16.msrb.mxu0 %v6249_v55  ;;  %2047 = vmatpush.bf16.msrb.mxu1 %v6250_v35 }
 0x385   :  { %2060 = vmatpush.bf16.msrb.mxu2 %v6251_v22  ;;  %2073 = vmatpush.bf16.msrb.mxu3 %v6252_v30 }
 0x387   :  { %2035 = vmatpush.bf16.msrb.mxu0 %v6253_v47  ;;  %2048 = vmatpush.bf16.msrb.mxu1 %v6254_v39 }
 0x389   :  { %2061 = vmatpush.bf16.msrb.mxu2 %v6255_v11  ;;  %2074 = vmatpush.bf16.msrb.mxu3 %v6256_v36  ;;  %v6267_v36 = vld [vmem:[#allocation56_spill] sm:$0xff] }
 0x38b   :  { %2036 = vmatpush.bf16.msrb.mxu0 %v6257_v60  ;;  %2049 = vmatpush.bf16.msrb.mxu1 %v6258_v18  ;;  %v6268_v60 = vld [vmem:[#allocation57_spill] sm:$0xff]  ;;  %v6269_v18 = vld [vmem:[#allocation54_spill] sm:$0xff] }
 0x38d   :  { %2062 = vmatpush.bf16.msrb.mxu2 %v6259_v62  ;;  %2075 = vmatpush.bf16.msrb.mxu3 %v6260_v50  ;;  %v6270_v62 = vld [vmem:[#allocation55_spill] sm:$0xff]  ;;  %v6271_v50 = vld [vmem:[#allocation58_spill] sm:$0xff] }
 0x38f   :  { %2037 = vmatpush.bf16.msrb.mxu0 %v6261_v29  ;;  %2050 = vmatpush.bf16.msrb.mxu1 %v6262_v5  ;;  %v6272_v29 = vld [vmem:[#allocation59_spill] sm:$0xff]  ;;  %v6273_v5 = vld [vmem:[#allocation60_spill] sm:$0xff] }
 0x391   :  { %2063 = vmatpush.bf16.msrb.mxu2 %v6263_v4  ;;  %2076 = vmatpush.bf16.msrb.mxu3 %v6264_v31  ;;  %v6274_v4 = vld [vmem:[#allocation61_spill] sm:$0xff]  ;;  %v6275_v31 = vld [vmem:[#allocation62_spill] sm:$0xff] }
 0x393   :  { %2038 = vmatpush.bf16.msrb.mxu0 %v6265_v27  ;;  %2051 = vmatpush.bf16.msrb.mxu1 %v6266_v15  ;;  %v6276_v27 = vld [vmem:[#allocation63_spill] sm:$0xff]  ;;  %v6277_v15 = vld [vmem:[#allocation64_spill] sm:$0xff] }
 0x395   :  { %2064 = vmatpush.bf16.msrb.mxu2 %v6269_v18  ;;  %2077 = vmatpush.bf16.msrb.mxu3 %v6270_v62  ;;  %v6280_v18 = vld [vmem:[#allocation67_spill] sm:$0xff]  ;;  %v6281_v62 = vld [vmem:[#allocation68_spill] sm:$0xff] }
 0x397   :  { %2083 = vmatpush.bf16.msra.mxu0 %v6267_v36  ;;  %2096 = vmatpush.bf16.msra.mxu1 %v6268_v60  ;;  %v6278_v36 = vld [vmem:[#allocation65_spill] sm:$0xff]  ;;  %v6279_v60 = vld [vmem:[#allocation66_spill] sm:$0xff] }
 0x399   :  { %2109 = vmatpush.bf16.msra.mxu2 %v6271_v50  ;;  %2122 = vmatpush.bf16.msra.mxu3 %v6272_v29  ;;  %v6282_v50 = vld [vmem:[#allocation69_spill] sm:$0xff]  ;;  %v6283_v29 = vld [vmem:[#allocation70_spill] sm:$0xff] }
 0x39b   :  { %2084 = vmatpush.bf16.msra.mxu0 %v6273_v5  ;;  %2097 = vmatpush.bf16.msra.mxu1 %v6274_v4  ;;  %v6284_v5 = vld [vmem:[#allocation71_spill] sm:$0xff]  ;;  %v6285_v4 = vld [vmem:[#allocation72_spill] sm:$0xff] }
 0x39d   :  { %2110 = vmatpush.bf16.msra.mxu2 %v6275_v31  ;;  %2123 = vmatpush.bf16.msra.mxu3 %v6276_v27  ;;  %v6286_v31 = vld [vmem:[#allocation73_spill] sm:$0xff]  ;;  %v6287_v27 = vld [vmem:[#allocation74_spill] sm:$0xff] }
 0x39f   :  { %2085 = vmatpush.bf16.msra.mxu0 %v6277_v15  ;;  %2098 = vmatpush.bf16.msra.mxu1 %v6278_v36  ;;  %v6288_v15 = vld [vmem:[#allocation75_spill] sm:$0xff]  ;;  %v6289_v36 = vld [vmem:[#allocation76_spill] sm:$0xff] }
 0x3a1   :  { %2111 = vmatpush.bf16.msra.mxu2 %v6279_v60  ;;  %2124 = vmatpush.bf16.msra.mxu3 %v6280_v18  ;;  %v6290_v60 = vld [vmem:[#allocation77_spill] sm:$0xff]  ;;  %v6291_v18 = vld [vmem:[#allocation78_spill] sm:$0xff] }
 0x3a3   :  { %2086 = vmatpush.bf16.msra.mxu0 %v6281_v62  ;;  %2099 = vmatpush.bf16.msra.mxu1 %v6282_v50  ;;  %v6292_v62 = vld [vmem:[#allocation79_spill] sm:$0xff]  ;;  %v6293_v50 = vld [vmem:[#allocation80_spill] sm:$0xff] }
 0x3a5   :  { %2112 = vmatpush.bf16.msra.mxu2 %v6283_v29  ;;  %2125 = vmatpush.bf16.msra.mxu3 %v6284_v5  ;;  %v6294_v29 = vld [vmem:[#allocation81_spill] sm:$0xff]  ;;  %v6295_v5 = vld [vmem:[#allocation82_spill] sm:$0xff] }
 0x3a7   :  { %2087 = vmatpush.bf16.msra.mxu0 %v6285_v4  ;;  %2100 = vmatpush.bf16.msra.mxu1 %v6286_v31  ;;  %v6296_v4 = vld [vmem:[#allocation83_spill] sm:$0xff]  ;;  %v6297_v31 = vld [vmem:[#allocation84_spill] sm:$0xff] }
 0x3a9   :  { %2113 = vmatpush.bf16.msra.mxu2 %v6287_v27  ;;  %2126 = vmatpush.bf16.msra.mxu3 %v6288_v15  ;;  %v6298_v27 = vld [vmem:[#allocation85_spill] sm:$0xff]  ;;  %v6299_v15 = vld [vmem:[#allocation86_spill] sm:$0xff] }
 0x3ab   :  { %2088 = vmatpush.bf16.msra.mxu0 %v6289_v36  ;;  %2101 = vmatpush.bf16.msra.mxu1 %v6290_v60  ;;  %v6300_v36 = vld [vmem:[#allocation87_spill] sm:$0xff] }
 0x3ad   :  { %2114 = vmatpush.bf16.msra.mxu2 %v6291_v18  ;;  %2127 = vmatpush.bf16.msra.mxu3 %v6292_v62 }
 0x3af   :  { %2089 = vmatpush.bf16.msra.mxu0 %v6293_v50  ;;  %2102 = vmatpush.bf16.msra.mxu1 %v6294_v29 }
 0x3b1   :  { %2115 = vmatpush.bf16.msra.mxu2 %v6295_v5  ;;  %2128 = vmatpush.bf16.msra.mxu3 %v6296_v4 }
 0x3b3   :  { %2090 = vmatpush.bf16.msra.mxu0 %v6297_v31  ;;  %2103 = vmatpush.bf16.msra.mxu1 %v6298_v27  ;;  %v6301_v31 = vld [vmem:[#allocation88_spill] sm:$0xff]  ;;  %v6302_v27 = vld [vmem:[#allocation89_spill] sm:$0xff] }
 0x3b5   :  { %2116 = vmatpush.bf16.msra.mxu2 %v6299_v15  ;;  %2129 = vmatpush.bf16.msra.mxu3 %v6300_v36 }
 0x3d2   :  { %v1743_v60 = vpop.f32.mrf.mxu0  ;;  %v1756_v18 = vpop.f32.mrf.mxu1 }
 0x3d9   :  { %v5219_v11 = vpop.f32.mrf.mxu2  ;;  %v1782_v62 = vpop.f32.mrf.mxu3 }
 0x3da   :  { %v1745_v50 = vpop.f32.mrf.mxu0  ;;  %v1758_v39 = vpop.f32.mrf.mxu1 }
 0x3e1   :  { %v1771_v29 = vpop.f32.mrf.mxu2  ;;  %v1784_v47 = vpop.f32.mrf.mxu3 }
 0x3e2   :  { %v1795_v5 = vpop.f32.mrf.mxu0  ;;  %v1808_v30 = vpop.f32.mrf.mxu1  ;;  %v1907_v29 = vld [vmem:[#allocation6 + $0x80] sm:$0xff]  ;;  %v1908_v47 = vld [vmem:[#allocation6 + $0x88] sm:$0xff] }
 0x3e3   :  { %v1796_v4 = vadd.f32 %v1795_v5, %v1743_v60  ;;  %v1809_v22 = vadd.f32 %v1808_v30, %v1756_v18 }
 0x3e5   :  { %v1838_v35 = vadd.f32 %v1796_v4, %v6301_v31  ;;  %v1839_v55 = vadd.f32 %v1809_v22, %v6302_v27 }
 0x3e7   :  { %v3610_v36 = vmul.f32 -1.442695, %v1838_v35  ;;  %v3611_v51 = vmul.f32 -1.442695, %v1839_v55 }
 0x3e9   :  { %v1821_v15 = vpop.f32.mrf.mxu2  ;;  %v1834_v37 = vpop.f32.mrf.mxu3  ;;  %3900 = vpow2.f32 %v3610_v36 }
 0x3ea   :  { %v1797_v23 = vpop.f32.mrf.mxu0  ;;  %v1810_v13 = vpop.f32.mrf.mxu1  ;;  %3902 = vpow2.f32 %v3611_v51  ;;  %v1835_v4 = vadd.f32 %v1834_v37, %v1782_v62  ;;  %v6303_v51 = vld [vmem:[#allocation90_spill] sm:$0xff] }
 0x3eb   :  { %v1910_v13 = vld [vmem:[#allocation6 + $0x98] sm:$0xff] }
 0x3ec   :  { %v1841_v55 = vadd.f32 %v1835_v4, %v6303_v51  ;;  %v1909_v4 = vld [vmem:[#allocation6 + $0x90] sm:$0xff] }
 0x3ef   :  { %v3901_v60 = vpop.eup %3900 }
 0x3f0   :  { %v3903_v5 = vpop.eup %3902  ;;  %v5223_v31 = vadd.f32 1.0, %v3901_v60 }
 0x3f1   :  { %v1823_v50 = vpop.f32.mrf.mxu2  ;;  %v1836_v39 = vpop.f32.mrf.mxu3  ;;  %v5225_v23 = vadd.f32 1.0, %v3903_v5 }
 0x3f2   :  { %v3612_v39 = vmul.f32 -1.442695, %v1841_v55  ;;  %v1855_v14 = vand.u32 2147483647, %v5223_v31  ;;  %vm1851_vm14 = vweird.f32 %v5223_v31 }
 0x3f3   :  { %v1920_v56 = vpop.f32.mrf.mxu0  ;;  %v1933_v44 = vpop.f32.mrf.mxu1  ;;  %vm1870_vm15 = vweird.f32 %v5225_v23 }
 0x3f4   :  { %v1963_v30 = vadd.f32 %v1920_v56, %v1907_v29  ;;  %v1964_v18 = vadd.f32 %v1933_v44, %v1908_v47  ;;  %vm1856_vm2 = vcmp.eq.f32.partialorder %v1855_v14, 8.507059e+37 }
 0x3f6   :  { %v3613_v22 = vmul.f32 -1.442695, %v1963_v30  ;;  %v3614_v27 = vmul.f32 -1.442695, %v1964_v18 }
 0x3f8   :  { %3904 = vpow2.f32 %v3613_v22 }
 0x3f9   :  { %3906 = vpow2.f32 %v3614_v27 }
 0x3fa   :  { %3908 = vrcp.f32 %v5223_v31 }
 0x3fb   :  { %v1946_v35 = vpop.f32.mrf.mxu2  ;;  %v1959_v36 = vpop.f32.mrf.mxu3  ;;  %3910 = vrcp.f32 %v5225_v23 }
 0x3fc   :  { %v1966_v50 = vadd.f32 %v1959_v36, %v1910_v13  ;;  %v1922_v56 = vpop.f32.mrf.mxu0  ;;  %v1935_v44 = vpop.f32.mrf.mxu1  ;;  %v1822_v36 = vadd.f32 %v1821_v15, %v5219_v11 }
 0x3fd   :  { %v1965_v44 = vadd.f32 %v1946_v35, %v1909_v4 }
 0x3fe   :  { %v3615_v37 = vmul.f32 -1.442695, %v1966_v50  ;;  %v3905_v62 = vpop.eup %3904 }
 0x3ff   :  { %v1970_v29 = vadd.f32 1.0, %v3905_v62  ;;  %v3907_v47 = vpop.eup %3906 }
 0x400   :  { %3912 = vpow2.f32 %v3615_v37  ;;  %v5230_v60 = vpop.eup %3908  ;;  %v1989_v30 = vadd.f32 1.0, %v3907_v47 }
 0x401   :  { %3914 = vrcp.f32 %v1970_v29  ;;  %v5232_v27 = vpop.eup %3910  ;;  %v1847_v13 = vmul.f32 %v5230_v60, %v5223_v31  ;;  %vm1852_vm4 = vweird.f32 %v5230_v60  ;;  %v1982_v15 = vand.u32 2147483648, %v1970_v29 }
 0x402   :  { %3916 = vpow2.f32 %v3612_v39  ;;  %v1866_v55 = vmul.f32 %v5232_v27, %v5225_v23  ;;  %v2001_v52 = vand.u32 2147483648, %v1989_v30  ;;  %vm1976_vm6 = vweird.f32 %v1970_v29  ;;  %vm5261_vm0 = vmor %vm1851_vm14, %vm1852_vm4 }
 0x403   :  { %v1948_v18 = vpop.f32.mrf.mxu2  ;;  %v1961_v5 = vpop.f32.mrf.mxu3  ;;  %3918 = vrcp.f32 %v1989_v30  ;;  %v1848_v47 = vsub.f32 1.0, %v1847_v13  ;;  %vm1871_vm8 = vweird.f32 %v5232_v27  ;;  %vm1995_vm9 = vweird.f32 %v1989_v30 }
 0x404   :  { %v1867_v18 = vsub.f32 1.0, %v1866_v55  ;;  %v6304_v5 = vld [vmem:[#allocation91_spill] sm:$0xff]  ;;  %vm5269_vm1 = vmor %vm1870_vm15, %vm1871_vm8 }
 0x405   :  { %v1840_v51 = vadd.f32 %v1822_v36, %v6304_v5  ;;  %v1849_v55 = vmul.f32 %v5230_v60, %v1848_v47  ;;  %v1999_v5 = vand.u32 2147483647, %v1989_v30 }
 0x406   :  { %v3913_v22 = vpop.eup %3912  ;;  %v1868_v13 = vmul.f32 %v5232_v27, %v1867_v18 }
 0x407   :  { %v5239_v50 = vadd.f32 1.0, %v3913_v22  ;;  %v3915_v56 = vpop.eup %3914  ;;  %v1980_v22 = vand.u32 2147483647, %v1970_v29  ;;  %vm2000_vm13 = vcmp.eq.f32.partialorder %v1999_v5, 8.507059e+37 }
 0x408   :  { %v3917_v37 = vpop.eup %3916  ;;  %v1972_v62 = vmul.f32 %v3915_v56, %v1970_v29  ;;  %vm1977_vm5 = vweird.f32 %v3915_v56  ;;  %v1850_v29 = vadd.f32 %v5230_v60, %v1849_v55  ;;  %v1869_v18 = vadd.f32 %v5232_v27, %v1868_v13 }
 0x409   :  { %v3919_v39 = vpop.eup %3918  ;;  %3920 = vrcp.f32 %v5239_v50  ;;  %v5245_v11 = vadd.f32 1.0, %v3917_v37  ;;  %vm1978_vm10 = vmor %vm1976_vm6, %vm1977_vm5  ;;  %vm1981_vm11 = vcmp.eq.f32.partialorder %v1980_v22, 8.507059e+37  ;;  %vm2015_vm5 = vweird.f32 %v5239_v50 }
 0x40a   :  { %v1973_v38 = vsub.f32 1.0, %v1972_v62  ;;  %v1991_v61 = vmul.f32 %v3919_v39, %v1989_v30  ;;  %3922 = vtanh.f32 %v1965_v44  ;;  %vm1996_vm7 = vweird.f32 %v3919_v39 }
 0x40b   :  { %3924 = vrcp.f32 %v5245_v11  ;;  %vm1997_vm12 = vmor %vm1995_vm9, %vm1996_vm7  ;;  %v2019_v14 = vand.u32 2147483647, %v5239_v50  ;;  %vm1890_vm9 = vweird.f32 %v5245_v11 }
 0x40c   :  { %v1992_v35 = vsub.f32 1.0, %v1991_v61  ;;  %v1974_v4 = vmul.f32 %v3915_v56, %v1973_v38  ;;  %v1983_v61 = vor.u32 1.1754944e-38, %v1982_v15  ;;  %v1876_v15 = vand.u32 2147483648, %v5225_v23 }
 0x40d   :  { %3926 = vtanh.f32 %v1840_v51  ;;  %v2021_v51 = vand.u32 2147483648, %v5239_v50  ;;  %vm2020_vm7 = vcmp.eq.f32.partialorder %v2019_v14, 8.507059e+37  ;;  %v6319_v14 = vld [vmem:[#allocation33_spill] sm:$0xff] }
 0x40e   :  { %v1993_v36 = vmul.f32 %v3919_v39, %v1992_v35  ;;  %v1975_v62 = vadd.f32 %v3915_v56, %v1974_v4  ;;  %v2002_v35 = vor.u32 1.1754944e-38, %v2001_v52  ;;  %v1874_v52 = vand.u32 2147483647, %v5225_v23 }
 0x40f   :  { %v3921_v59 = vpop.eup %3920 }
 0x410   :  { %v1979_v38 = vsel %vm1978_vm10, %v3915_v56, %v1975_v62  ;;  %v1994_v44 = vadd.f32 %v3919_v39, %v1993_v36  ;;  %v2011_v37 = vmul.f32 %v3921_v59, %v5239_v50  ;;  %v3923_v47 = vpop.eup %3922  ;;  %v1857_v56 = vand.u32 2147483648, %v5223_v31 }
 0x411   :  { %v1984_v4 = vsel %vm1981_vm11, %v1983_v61, %v1979_v38  ;;  %v3925_v55 = vpop.eup %3924  ;;  %v1873_v31 = vsel %vm5269_vm1, %v5232_v27, %v1869_v18  ;;  %vm2016_vm3 = vweird.f32 %v3921_v59  ;;  %vm1875_vm4 = vcmp.eq.f32.partialorder %v1874_v52, 8.507059e+37 }
 0x412   :  { %v1998_v0 = vsel %vm1997_vm12, %v3919_v39, %v1994_v44  ;;  %v2026_v63 = vmul.f32 %v3923_v47, %v1984_v4  ;;  %v2012_v30 = vsub.f32 1.0, %v2011_v37  ;;  %v1858_v62 = vor.u32 1.1754944e-38, %v1857_v56  ;;  %vm2017_vm6 = vmor %vm2015_vm5, %vm2016_vm3 }
 0x413   :  { %v2003_v22 = vsel %vm2000_vm13, %v2002_v35, %v1998_v0  ;;  %v1854_v0 = vsel %vm5261_vm0, %v5230_v60, %v1850_v29  ;;  %v1886_v38 = vmul.f32 %v3925_v55, %v5245_v11  ;;  %v2022_v29 = vor.u32 1.1754944e-38, %v2021_v51  ;;  %v6316_v51 = vld [vmem:[#allocation31_spill] sm:$0xff] }
 0x414   :  { %v2025_v39 = vmul.f32 %v2003_v22, %v5109_v49  ;;  %v2013_v5 = vmul.f32 %v3921_v59, %v2012_v30  ;;  %v1877_v49 = vor.u32 1.1754944e-38, %v1876_v15  ;;  %v1859_v44 = vsel %vm1856_vm2, %v1858_v62, %v1854_v0  ;;  %v6310_v0 = vld [vmem:[#allocation24_spill] sm:$0xff]  ;;  %v6313_v62 = vld [vmem:[#allocation26_spill] sm:$0xff] }
 0x415   :  { %v1887_v18 = vsub.f32 1.0, %v1886_v38  ;;  %vm1891_vm8 = vweird.f32 %v3925_v55  ;;  %v1894_v50 = vand.u32 2147483647, %v5245_v11  ;;  %v6315_v38 = vld [vmem:[#allocation29_spill] sm:$0xff] }
 0x416   :  { %v5279_v23 = vadd.f32 %v2026_v63, %v2025_v39  ;;  %v2014_v61 = vadd.f32 %v3921_v59, %v2013_v5  ;;  %v1878_v60 = vsel %vm1875_vm4, %v1877_v49, %v1873_v31  ;;  %v3927_v63 = vpop.eup %3926  ;;  %vm1892_vm10 = vmor %vm1890_vm9, %vm1891_vm8  ;;  %v6311_v31 = vld [vmem:[#allocation25_spill] sm:$0xff]  ;;  %v6312_v49 = vld [vmem:[#allocation27_spill] sm:$0xff] }
 0x417   :  { %v1900_v37 = vmul.f32 %v1878_v60, %v5117_v24  ;;  %v1901_v47 = vmul.f32 %v3927_v63, %v1859_v44  ;;  %v1888_v56 = vmul.f32 %v3925_v55, %v1887_v18  ;;  %vm1895_vm11 = vcmp.eq.f32.partialorder %v1894_v50, 8.507059e+37  ;;  %v6317_v44 = vld [vmem:[#allocation30_spill] sm:$0xff]  ;;  %v6318_v60 = vld [vmem:[#allocation32_spill] sm:$0xff]  ;;  %v6320_v63 = vld [vmem:[#allocation35_spill] sm:$0xff] }
 0x418   :  { %3928 = vtanh.f32 %v5279_v23  ;;  %v2018_v27 = vsel %vm2017_vm6, %v3921_v59, %v2014_v61  ;;  %v1896_v59 = vand.u32 2147483648, %v5245_v11  ;;  %v6314_v61 = vld [vmem:[#allocation28_spill] sm:$0xff]  ;;  %v6325_v18 = vld [vmem:[#allocation39_spill] sm:$0xff] }
 0x419   :  { %v2023_v4 = vsel %vm2020_vm7, %v2022_v29, %v2018_v27  ;;  %v5287_v15 = vadd.f32 %v1901_v47, %v1900_v37  ;;  %v1889_v24 = vadd.f32 %v3925_v55, %v1888_v56  ;;  %v6321_v27 = vld [vmem:[#allocation34_spill] sm:$0xff]  ;;  %v6322_v37 = vld [vmem:[#allocation36_spill] sm:$0xff]  ;;  %v6323_v47 = vld [vmem:[#allocation37_spill] sm:$0xff] }
 0x41a   :  { %v1897_v39 = vor.u32 1.1754944e-38, %v1896_v59  ;;  %v6324_v29 = vld [vmem:[#allocation38_spill] sm:$0xff]  ;;  %v6329_v56 = vld [vmem:[#allocation43_spill] sm:$0xff] }
 0x41b   :  { %3930 = vtanh.f32 %v5287_v15  ;;  %v1893_v13 = vsel %vm1892_vm10, %v3925_v55, %v1889_v24  ;;  %v6309_v55 = vld [vmem:[#allocation23_spill] sm:$0xff]  ;;  %v6331_v24 = vld [vmem:[#allocation45_spill] sm:$0xff]  ;;  %v6332_v59 = vld [vmem:[#allocation46_spill] sm:$0xff] }
 0x41c   :  { %v1898_v5 = vsel %vm1895_vm11, %v1897_v39, %v1893_v13  ;;  %v6333_v50 = vld [vmem:[#allocation47_spill] sm:$0xff]  ;;  %v6334_v13 = vld [vmem:[#allocation48_spill] sm:$0xff]  ;;  %v6336_v39 = vld [vmem:[#allocation50_spill] sm:$0xff] }
 0x41e   :  { %v3929_v35 = vpop.eup %3928 }
 0x41f   :  { %v2029_v30 = vmul.f32 %v3929_v35, %v2023_v4  ;;  %v6326_v35 = vld [vmem:[#allocation40_spill] sm:$0xff]  ;;  %v6327_v4 = vld [vmem:[#allocation41_spill] sm:$0xff] }
 0x421   :  { %v2030_v22 = vpack.c.bf16 %v2029_v30, %v2029_v30  ;;  %v3931_v52 = vpop.eup %3930  ;;  %v6328_v30 = vld [vmem:[#allocation42_spill] sm:$0xff] }
 0x422   :  { %v1904_v36 = vmul.f32 %v3931_v52, %v1898_v5  ;;  %v6335_v52 = vld [vmem:[#allocation49_spill] sm:$0xff]  ;;  %v6337_v5 = vld [vmem:[#allocation51_spill] sm:$0xff] }
 0x423   :  { %2039 = vmatmul.bf16.vlgmr.msrb.gmra.mxu0 %v2030_v22  ;;  %2052 = vmatmul.bf16.vlgmr.msrb.gmra.mxu1 %v2030_v22 }
 0x424   :  { %2065 = vmatmul.bf16.vlgmr.msrb.gmra.mxu2 %v2030_v22  ;;  %2078 = vmatmul.bf16.vlgmr.msrb.gmra.mxu3 %v2030_v22  ;;  %v1905_v11 = vpack.c.bf16 %v1904_v36, %v1904_v36  ;;  %v6338_v36 = vld [vmem:[#allocation52_spill] sm:$0xff] }
 0x425   :  { %2208 = vmatpush.bf16.msrb.mxu0 %v4294_v3  ;;  %2221 = vmatpush.bf16.msrb.mxu1 %v4296_v7 }
 0x426   :  { %2234 = vmatpush.bf16.msrb.mxu2 %v4309_v21  ;;  %2247 = vmatpush.bf16.msrb.mxu3 %v4298_v8 }
 0x429   :  { %2209 = vmatpush.bf16.msrb.mxu0 %v4301_v12  ;;  %2222 = vmatpush.bf16.msrb.mxu1 %v4305_v16 }
 0x42a   :  { %2235 = vmatpush.bf16.msrb.mxu2 %v4321_v34  ;;  %2248 = vmatpush.bf16.msrb.mxu3 %v4307_v17 }
 0x42d   :  { %2210 = vmatpush.bf16.msrb.mxu0 %v4313_v28  ;;  %2223 = vmatpush.bf16.msrb.mxu1 %v4317_v32 }
 0x42e   :  { %2236 = vmatpush.bf16.msrb.mxu2 %v4327_v42  ;;  %2249 = vmatpush.bf16.msrb.mxu3 %v4319_v33 }
 0x431   :  { %2211 = vmatpush.bf16.msrb.mxu0 %v4325_v41  ;;  %2224 = vmatpush.bf16.msrb.mxu1 %v4331_v45 }
 0x432   :  { %2237 = vmatpush.bf16.msrb.mxu2 %v4339_v54  ;;  %2250 = vmatpush.bf16.msrb.mxu3 %v4333_v46 }
 0x433   :  { %2091 = vmatmul.bf16.vlgmr.msra.gmra.mxu0 %v1905_v11  ;;  %2104 = vmatmul.bf16.vlgmr.msra.gmra.mxu1 %v1905_v11 }
 0x434   :  { %2117 = vmatmul.bf16.vlgmr.msra.gmra.mxu2 %v1905_v11  ;;  %2130 = vmatmul.bf16.vlgmr.msra.gmra.mxu3 %v1905_v11  ;;  %v6339_v11 = vld [vmem:[#allocation53_spill] sm:$0xff] }
 0x435   :  { %2212 = vmatpush.bf16.msrb.mxu0 %v4337_v53  ;;  %2225 = vmatpush.bf16.msrb.mxu1 %v4343_v57 }
 0x436   :  { %2238 = vmatpush.bf16.msrb.mxu2 %v4351_v2  ;;  %2251 = vmatpush.bf16.msrb.mxu3 %v4345_v58 }
 0x439   :  { %2213 = vmatpush.bf16.msrb.mxu0 %v4349_v1  ;;  %2226 = vmatpush.bf16.msrb.mxu1 %v4355_v6 }
 0x43a   :  { %2239 = vmatpush.bf16.msrb.mxu2 %v4363_v20  ;;  %2252 = vmatpush.bf16.msrb.mxu3 %v4357_v9 }
 0x43d   :  { %2214 = vmatpush.bf16.msrb.mxu0 %v4361_v19  ;;  %2227 = vmatpush.bf16.msrb.mxu1 %v4367_v25 }
 0x43e   :  { %2240 = vmatpush.bf16.msrb.mxu2 %v4375_v43  ;;  %2253 = vmatpush.bf16.msrb.mxu3 %v4369_v26 }
 0x441   :  { %2215 = vmatpush.bf16.msrb.mxu0 %v4373_v40  ;;  %2228 = vmatpush.bf16.msrb.mxu1 %v4379_v48 }
 0x442   :  { %2241 = vmatpush.bf16.msrb.mxu2 %v4393_v10  ;;  %2254 = vmatpush.bf16.msrb.mxu3 %v6309_v55 }
 0x444   :  { %2216 = vmatmul.bf16.vlgmr.msrb.gmra.mxu0 %v2030_v22  ;;  %2229 = vmatmul.bf16.vlgmr.msrb.gmra.mxu1 %v2030_v22 }
 0x445   :  { %2328 = vmatpush.bf16.msra.mxu0 %v6310_v0  ;;  %2341 = vmatpush.bf16.msra.mxu1 %v6311_v31 }
 0x446   :  { %2242 = vmatmul.bf16.vlgmr.msrb.gmra.mxu2 %v2030_v22  ;;  %2255 = vmatmul.bf16.vlgmr.msrb.gmra.mxu3 %v2030_v22  ;;  %v6330_v22 = vld [vmem:[#allocation44_spill] sm:$0xff] }
 0x447   :  { %2354 = vmatpush.bf16.msra.mxu2 %v6312_v49  ;;  %2367 = vmatpush.bf16.msra.mxu3 %v6313_v62 }
 0x449   :  { %2329 = vmatpush.bf16.msra.mxu0 %v6314_v61  ;;  %2342 = vmatpush.bf16.msra.mxu1 %v6315_v38 }
 0x44b   :  { %2355 = vmatpush.bf16.msra.mxu2 %v6316_v51  ;;  %2368 = vmatpush.bf16.msra.mxu3 %v6317_v44 }
 0x44d   :  { %2330 = vmatpush.bf16.msra.mxu0 %v6318_v60  ;;  %2343 = vmatpush.bf16.msra.mxu1 %v6319_v14 }
 0x44f   :  { %2356 = vmatpush.bf16.msra.mxu2 %v6320_v63  ;;  %2369 = vmatpush.bf16.msra.mxu3 %v6321_v27 }
 0x451   :  { %2331 = vmatpush.bf16.msra.mxu0 %v6322_v37  ;;  %2344 = vmatpush.bf16.msra.mxu1 %v6323_v47 }
 0x453   :  { %2357 = vmatpush.bf16.msra.mxu2 %v6324_v29  ;;  %2370 = vmatpush.bf16.msra.mxu3 %v6325_v18 }
 0x455   :  { %2332 = vmatpush.bf16.msra.mxu0 %v6326_v35  ;;  %2345 = vmatpush.bf16.msra.mxu1 %v6327_v4 }
 0x457   :  { %2358 = vmatpush.bf16.msra.mxu2 %v6328_v30  ;;  %2371 = vmatpush.bf16.msra.mxu3 %v6329_v56  ;;  %v6340_v56 = vld [vmem:[#allocation56_spill] sm:$0xff] }
 0x459   :  { %2333 = vmatpush.bf16.msra.mxu0 %v6330_v22  ;;  %2346 = vmatpush.bf16.msra.mxu1 %v6331_v24  ;;  %v6341_v22 = vld [vmem:[#allocation57_spill] sm:$0xff]  ;;  %v6342_v24 = vld [vmem:[#allocation54_spill] sm:$0xff] }
 0x45b   :  { %2359 = vmatpush.bf16.msra.mxu2 %v6332_v59  ;;  %2372 = vmatpush.bf16.msra.mxu3 %v6333_v50  ;;  %v6343_v59 = vld [vmem:[#allocation55_spill] sm:$0xff]  ;;  %v6344_v50 = vld [vmem:[#allocation58_spill] sm:$0xff] }
 0x45d   :  { %2334 = vmatpush.bf16.msra.mxu0 %v6334_v13  ;;  %2347 = vmatpush.bf16.msra.mxu1 %v6335_v52  ;;  %v6345_v13 = vld [vmem:[#allocation59_spill] sm:$0xff]  ;;  %v6346_v52 = vld [vmem:[#allocation60_spill] sm:$0xff] }
 0x45f   :  { %2360 = vmatpush.bf16.msra.mxu2 %v6336_v39  ;;  %2373 = vmatpush.bf16.msra.mxu3 %v6337_v5  ;;  %v6347_v39 = vld [vmem:[#allocation61_spill] sm:$0xff]  ;;  %v6348_v5 = vld [vmem:[#allocation62_spill] sm:$0xff] }
 0x461   :  { %2335 = vmatpush.bf16.msra.mxu0 %v6338_v36  ;;  %2348 = vmatpush.bf16.msra.mxu1 %v6339_v11  ;;  %v6349_v36 = vld [vmem:[#allocation63_spill] sm:$0xff]  ;;  %v6350_v11 = vld [vmem:[#allocation64_spill] sm:$0xff] }
 0x463   :  { %2361 = vmatpush.bf16.msra.mxu2 %v6342_v24  ;;  %2374 = vmatpush.bf16.msra.mxu3 %v6343_v59  ;;  %v6353_v24 = vld [vmem:[#allocation67_spill] sm:$0xff]  ;;  %v6354_v59 = vld [vmem:[#allocation68_spill] sm:$0xff] }
 0x465   :  { %2380 = vmatpush.bf16.msrb.mxu0 %v6340_v56  ;;  %2393 = vmatpush.bf16.msrb.mxu1 %v6341_v22  ;;  %v6351_v56 = vld [vmem:[#allocation65_spill] sm:$0xff]  ;;  %v6352_v22 = vld [vmem:[#allocation66_spill] sm:$0xff] }
 0x467   :  { %2406 = vmatpush.bf16.msrb.mxu2 %v6344_v50  ;;  %2419 = vmatpush.bf16.msrb.mxu3 %v6345_v13  ;;  %v6355_v50 = vld [vmem:[#allocation69_spill] sm:$0xff]  ;;  %v6356_v13 = vld [vmem:[#allocation70_spill] sm:$0xff] }
 0x469   :  { %2381 = vmatpush.bf16.msrb.mxu0 %v6346_v52  ;;  %2394 = vmatpush.bf16.msrb.mxu1 %v6347_v39  ;;  %v6357_v52 = vld [vmem:[#allocation71_spill] sm:$0xff]  ;;  %v6358_v39 = vld [vmem:[#allocation72_spill] sm:$0xff] }
 0x46b   :  { %2407 = vmatpush.bf16.msrb.mxu2 %v6348_v5  ;;  %2420 = vmatpush.bf16.msrb.mxu3 %v6349_v36  ;;  %v6359_v5 = vld [vmem:[#allocation73_spill] sm:$0xff]  ;;  %v6360_v36 = vld [vmem:[#allocation74_spill] sm:$0xff] }
 0x46d   :  { %2382 = vmatpush.bf16.msrb.mxu0 %v6350_v11  ;;  %2395 = vmatpush.bf16.msrb.mxu1 %v6351_v56  ;;  %v6361_v11 = vld [vmem:[#allocation75_spill] sm:$0xff]  ;;  %v6362_v56 = vld [vmem:[#allocation76_spill] sm:$0xff] }
 0x46f   :  { %2408 = vmatpush.bf16.msrb.mxu2 %v6352_v22  ;;  %2421 = vmatpush.bf16.msrb.mxu3 %v6353_v24  ;;  %v6363_v22 = vld [vmem:[#allocation77_spill] sm:$0xff]  ;;  %v6364_v24 = vld [vmem:[#allocation78_spill] sm:$0xff] }
 0x471   :  { %2383 = vmatpush.bf16.msrb.mxu0 %v6354_v59  ;;  %2396 = vmatpush.bf16.msrb.mxu1 %v6355_v50  ;;  %v6365_v59 = vld [vmem:[#allocation79_spill] sm:$0xff]  ;;  %v6366_v50 = vld [vmem:[#allocation80_spill] sm:$0xff] }
 0x473   :  { %2409 = vmatpush.bf16.msrb.mxu2 %v6356_v13  ;;  %2422 = vmatpush.bf16.msrb.mxu3 %v6357_v52  ;;  %v6367_v13 = vld [vmem:[#allocation81_spill] sm:$0xff]  ;;  %v6368_v52 = vld [vmem:[#allocation82_spill] sm:$0xff] }
 0x475   :  { %2384 = vmatpush.bf16.msrb.mxu0 %v6358_v39  ;;  %2397 = vmatpush.bf16.msrb.mxu1 %v6359_v5  ;;  %v6369_v39 = vld [vmem:[#allocation83_spill] sm:$0xff]  ;;  %v6370_v5 = vld [vmem:[#allocation84_spill] sm:$0xff] }
 0x477   :  { %2410 = vmatpush.bf16.msrb.mxu2 %v6360_v36  ;;  %2423 = vmatpush.bf16.msrb.mxu3 %v6361_v11  ;;  %v6371_v36 = vld [vmem:[#allocation85_spill] sm:$0xff]  ;;  %v6372_v11 = vld [vmem:[#allocation86_spill] sm:$0xff] }
 0x479   :  { %2385 = vmatpush.bf16.msrb.mxu0 %v6362_v56  ;;  %2398 = vmatpush.bf16.msrb.mxu1 %v6363_v22  ;;  %v6373_v56 = vld [vmem:[#allocation87_spill] sm:$0xff] }
 0x47b   :  { %2411 = vmatpush.bf16.msrb.mxu2 %v6364_v24  ;;  %2424 = vmatpush.bf16.msrb.mxu3 %v6365_v59 }
 0x47d   :  { %2386 = vmatpush.bf16.msrb.mxu0 %v6366_v50  ;;  %2399 = vmatpush.bf16.msrb.mxu1 %v6367_v13 }
 0x47f   :  { %2412 = vmatpush.bf16.msrb.mxu2 %v6368_v52  ;;  %2425 = vmatpush.bf16.msrb.mxu3 %v6369_v39 }
 0x481   :  { %2387 = vmatpush.bf16.msrb.mxu0 %v6370_v5  ;;  %2400 = vmatpush.bf16.msrb.mxu1 %v6371_v36  ;;  %v6374_v5 = vld [vmem:[#allocation88_spill] sm:$0xff]  ;;  %v6375_v36 = vld [vmem:[#allocation89_spill] sm:$0xff] }
 0x483   :  { %2413 = vmatpush.bf16.msrb.mxu2 %v6372_v11  ;;  %2426 = vmatpush.bf16.msrb.mxu3 %v6373_v56 }
 0x4a0   :  { %v2040_v22 = vpop.f32.mrf.mxu0  ;;  %v2053_v24 = vpop.f32.mrf.mxu1 }
 0x4a7   :  { %v5389_v30 = vpop.f32.mrf.mxu2  ;;  %v2079_v59 = vpop.f32.mrf.mxu3 }
 0x4a8   :  { %v2042_v50 = vpop.f32.mrf.mxu0  ;;  %v2055_v4 = vpop.f32.mrf.mxu1 }
 0x4af   :  { %v2068_v13 = vpop.f32.mrf.mxu2  ;;  %v2081_v35 = vpop.f32.mrf.mxu3 }
 0x4b0   :  { %v2092_v52 = vpop.f32.mrf.mxu0  ;;  %v2105_v18 = vpop.f32.mrf.mxu1  ;;  %v2204_v13 = vld [vmem:[#allocation6 + $0xa0] sm:$0xff]  ;;  %v2205_v35 = vld [vmem:[#allocation6 + $0xa8] sm:$0xff] }
 0x4b1   :  { %v2093_v39 = vadd.f32 %v2092_v52, %v2040_v22  ;;  %v2106_v29 = vadd.f32 %v2105_v18, %v2053_v24 }
 0x4b3   :  { %v2135_v47 = vadd.f32 %v2093_v39, %v6374_v5  ;;  %v2136_v37 = vadd.f32 %v2106_v29, %v6375_v36 }
 0x4b5   :  { %v3616_v56 = vmul.f32 -1.442695, %v2135_v47  ;;  %v3617_v60 = vmul.f32 -1.442695, %v2136_v37 }
 0x4b7   :  { %v2118_v11 = vpop.f32.mrf.mxu2  ;;  %v2131_v27 = vpop.f32.mrf.mxu3  ;;  %3932 = vpow2.f32 %v3616_v56 }
 0x4b8   :  { %v2094_v63 = vpop.f32.mrf.mxu0  ;;  %v2107_v14 = vpop.f32.mrf.mxu1  ;;  %3934 = vpow2.f32 %v3617_v60  ;;  %v2132_v39 = vadd.f32 %v2131_v27, %v2079_v59  ;;  %v6376_v60 = vld [vmem:[#allocation90_spill] sm:$0xff] }
 0x4b9   :  { %v2207_v14 = vld [vmem:[#allocation6 + $0xb8] sm:$0xff] }
 0x4ba   :  { %v2138_v37 = vadd.f32 %v2132_v39, %v6376_v60  ;;  %v2206_v39 = vld [vmem:[#allocation6 + $0xb0] sm:$0xff] }
 0x4bd   :  { %v3933_v22 = vpop.eup %3932 }
 0x4be   :  { %v3935_v52 = vpop.eup %3934  ;;  %v5393_v5 = vadd.f32 1.0, %v3933_v22 }
 0x4bf   :  { %v2120_v50 = vpop.f32.mrf.mxu2  ;;  %v2133_v4 = vpop.f32.mrf.mxu3  ;;  %v5395_v63 = vadd.f32 1.0, %v3935_v52 }
 0x4c0   :  { %v3618_v4 = vmul.f32 -1.442695, %v2138_v37  ;;  %v2152_v38 = vand.u32 2147483647, %v5393_v5  ;;  %vm2148_vm6 = vweird.f32 %v5393_v5 }
 0x4c1   :  { %v2217_v44 = vpop.f32.mrf.mxu0  ;;  %v2230_v51 = vpop.f32.mrf.mxu1  ;;  %vm2167_vm7 = vweird.f32 %v5395_v63 }
 0x4c2   :  { %v2260_v18 = vadd.f32 %v2217_v44, %v2204_v13  ;;  %v2261_v24 = vadd.f32 %v2230_v51, %v2205_v35  ;;  %vm2153_vm10 = vcmp.eq.f32.partialorder %v2152_v38, 8.507059e+37 }
 0x4c4   :  { %v3619_v29 = vmul.f32 -1.442695, %v2260_v18  ;;  %v3620_v36 = vmul.f32 -1.442695, %v2261_v24 }
 0x4c6   :  { %3936 = vpow2.f32 %v3619_v29 }
 0x4c7   :  { %3938 = vpow2.f32 %v3620_v36 }
 0x4c8   :  { %3940 = vrcp.f32 %v5393_v5 }
 0x4c9   :  { %v2243_v47 = vpop.f32.mrf.mxu2  ;;  %v2256_v56 = vpop.f32.mrf.mxu3  ;;  %3942 = vrcp.f32 %v5395_v63 }
 0x4ca   :  { %v2263_v50 = vadd.f32 %v2256_v56, %v2207_v14  ;;  %v2219_v44 = vpop.f32.mrf.mxu0  ;;  %v2232_v51 = vpop.f32.mrf.mxu1  ;;  %v2119_v56 = vadd.f32 %v2118_v11, %v5389_v30 }
 0x4cb   :  { %v2262_v51 = vadd.f32 %v2243_v47, %v2206_v39 }
 0x4cc   :  { %v3621_v27 = vmul.f32 -1.442695, %v2263_v50  ;;  %v3937_v59 = vpop.eup %3936 }
 0x4cd   :  { %v2267_v13 = vadd.f32 1.0, %v3937_v59  ;;  %v3939_v35 = vpop.eup %3938 }
 0x4ce   :  { %3944 = vpow2.f32 %v3621_v27  ;;  %v5400_v22 = vpop.eup %3940  ;;  %v2286_v18 = vadd.f32 1.0, %v3939_v35 }
 0x4cf   :  { %3946 = vrcp.f32 %v2267_v13  ;;  %v5402_v36 = vpop.eup %3942  ;;  %v2144_v14 = vmul.f32 %v5400_v22, %v5393_v5  ;;  %vm2149_vm12 = vweird.f32 %v5400_v22  ;;  %v2279_v11 = vand.u32 2147483648, %v2267_v13 }
 0x4d0   :  { %3948 = vpow2.f32 %v3618_v4  ;;  %v2163_v37 = vmul.f32 %v5402_v36, %v5395_v63  ;;  %v2298_v49 = vand.u32 2147483648, %v2286_v18  ;;  %vm2273_vm14 = vweird.f32 %v2267_v13  ;;  %vm5431_vm8 = vmor %vm2148_vm6, %vm2149_vm12 }
 0x4d1   :  { %v2245_v24 = vpop.f32.mrf.mxu2  ;;  %v2258_v52 = vpop.f32.mrf.mxu3  ;;  %3950 = vrcp.f32 %v2286_v18  ;;  %v2145_v35 = vsub.f32 1.0, %v2144_v14  ;;  %vm2168_vm0 = vweird.f32 %v5402_v36  ;;  %vm2292_vm1 = vweird.f32 %v2286_v18 }
 0x4d2   :  { %v2164_v24 = vsub.f32 1.0, %v2163_v37  ;;  %v6377_v52 = vld [vmem:[#allocation91_spill] sm:$0xff]  ;;  %vm5439_vm9 = vmor %vm2167_vm7, %vm2168_vm0 }
 0x4d3   :  { %v2137_v60 = vadd.f32 %v2119_v56, %v6377_v52  ;;  %v2146_v37 = vmul.f32 %v5400_v22, %v2145_v35  ;;  %v2296_v52 = vand.u32 2147483647, %v2286_v18 }
 0x4d4   :  { %v3945_v29 = vpop.eup %3944  ;;  %v2165_v14 = vmul.f32 %v5402_v36, %v2164_v24 }
 0x4d5   :  { %v5409_v50 = vadd.f32 1.0, %v3945_v29  ;;  %v3947_v44 = vpop.eup %3946  ;;  %v2277_v29 = vand.u32 2147483647, %v2267_v13  ;;  %vm2297_vm5 = vcmp.eq.f32.partialorder %v2296_v52, 8.507059e+37 }
 0x4d6   :  { %v3949_v27 = vpop.eup %3948  ;;  %v2269_v59 = vmul.f32 %v3947_v44, %v2267_v13  ;;  %vm2274_vm13 = vweird.f32 %v3947_v44  ;;  %v2147_v13 = vadd.f32 %v5400_v22, %v2146_v37  ;;  %v2166_v24 = vadd.f32 %v5402_v36, %v2165_v14 }
 0x4d7   :  { %v3951_v4 = vpop.eup %3950  ;;  %3952 = vrcp.f32 %v5409_v50  ;;  %v5415_v30 = vadd.f32 1.0, %v3949_v27  ;;  %vm2275_vm2 = vmor %vm2273_vm14, %vm2274_vm13  ;;  %vm2278_vm3 = vcmp.eq.f32.partialorder %v2277_v29, 8.507059e+37  ;;  %vm2312_vm13 = vweird.f32 %v5409_v50 }
 0x4d8   :  { %v2270_v61 = vsub.f32 1.0, %v2269_v59  ;;  %v2288_v62 = vmul.f32 %v3951_v4, %v2286_v18  ;;  %3954 = vtanh.f32 %v2262_v51  ;;  %vm2293_vm15 = vweird.f32 %v3951_v4 }
 0x4d9   :  { %3956 = vrcp.f32 %v5415_v30  ;;  %vm2294_vm4 = vmor %vm2292_vm1, %vm2293_vm15  ;;  %v2316_v38 = vand.u32 2147483647, %v5409_v50  ;;  %vm2187_vm1 = vweird.f32 %v5415_v30 }
 0x4da   :  { %v2289_v47 = vsub.f32 1.0, %v2288_v62  ;;  %v2271_v39 = vmul.f32 %v3947_v44, %v2270_v61  ;;  %v2280_v62 = vor.u32 1.1754944e-38, %v2279_v11  ;;  %v2173_v11 = vand.u32 2147483648, %v5395_v63 }
 0x4db   :  { %3958 = vtanh.f32 %v2137_v60  ;;  %v2318_v60 = vand.u32 2147483648, %v5409_v50  ;;  %vm2317_vm15 = vcmp.eq.f32.partialorder %v2316_v38, 8.507059e+37  ;;  %v6392_v38 = vld [vmem:[#allocation33_spill] sm:$0xff] }
 0x4dc   :  { %v2290_v56 = vmul.f32 %v3951_v4, %v2289_v47  ;;  %v2272_v59 = vadd.f32 %v3947_v44, %v2271_v39  ;;  %v2299_v47 = vor.u32 1.1754944e-38, %v2298_v49  ;;  %v2171_v49 = vand.u32 2147483647, %v5395_v63 }
 0x4dd   :  { %v3953_v31 = vpop.eup %3952 }
 0x4de   :  { %v2276_v61 = vsel %vm2275_vm2, %v3947_v44, %v2272_v59  ;;  %v2291_v51 = vadd.f32 %v3951_v4, %v2290_v56  ;;  %v2308_v27 = vmul.f32 %v3953_v31, %v5409_v50  ;;  %v3955_v35 = vpop.eup %3954  ;;  %v2154_v44 = vand.u32 2147483648, %v5393_v5 }
 0x4df   :  { %v2281_v39 = vsel %vm2278_vm3, %v2280_v62, %v2276_v61  ;;  %v3957_v37 = vpop.eup %3956  ;;  %v2170_v5 = vsel %vm5439_vm9, %v5402_v36, %v2166_v24  ;;  %vm2313_vm11 = vweird.f32 %v3953_v31  ;;  %vm2172_vm12 = vcmp.eq.f32.partialorder %v2171_v49, 8.507059e+37 }
 0x4e0   :  { %v2295_v0 = vsel %vm2294_vm4, %v3951_v4, %v2291_v51  ;;  %v2323_v55 = vmul.f32 %v3955_v35, %v2281_v39  ;;  %v2309_v18 = vsub.f32 1.0, %v2308_v27  ;;  %v2155_v59 = vor.u32 1.1754944e-38, %v2154_v44  ;;  %vm2314_vm14 = vmor %vm2312_vm13, %vm2313_vm11 }
 0x4e1   :  { %v2300_v29 = vsel %vm2297_vm5, %v2299_v47, %v2295_v0  ;;  %v2151_v0 = vsel %vm5431_vm8, %v5400_v22, %v2147_v13  ;;  %v2183_v61 = vmul.f32 %v3957_v37, %v5415_v30  ;;  %v2319_v13 = vor.u32 1.1754944e-38, %v2318_v60  ;;  %v6389_v60 = vld [vmem:[#allocation31_spill] sm:$0xff] }
 0x4e2   :  { %v2322_v4 = vmul.f32 %v2300_v29, %v5279_v23  ;;  %v2310_v52 = vmul.f32 %v3953_v31, %v2309_v18  ;;  %v2174_v23 = vor.u32 1.1754944e-38, %v2173_v11  ;;  %v2156_v51 = vsel %vm2153_vm10, %v2155_v59, %v2151_v0  ;;  %v6383_v0 = vld [vmem:[#allocation24_spill] sm:$0xff]  ;;  %v6386_v59 = vld [vmem:[#allocation26_spill] sm:$0xff] }
 0x4e3   :  { %v2184_v24 = vsub.f32 1.0, %v2183_v61  ;;  %vm2188_vm0 = vweird.f32 %v3957_v37  ;;  %v2191_v50 = vand.u32 2147483647, %v5415_v30  ;;  %v6388_v61 = vld [vmem:[#allocation29_spill] sm:$0xff] }
 0x4e4   :  { %v5449_v63 = vadd.f32 %v2323_v55, %v2322_v4  ;;  %v2311_v62 = vadd.f32 %v3953_v31, %v2310_v52  ;;  %v2175_v22 = vsel %vm2172_vm12, %v2174_v23, %v2170_v5  ;;  %v3959_v55 = vpop.eup %3958  ;;  %vm2189_vm2 = vmor %vm2187_vm1, %vm2188_vm0  ;;  %v6384_v5 = vld [vmem:[#allocation25_spill] sm:$0xff]  ;;  %v6385_v23 = vld [vmem:[#allocation27_spill] sm:$0xff] }
 0x4e5   :  { %v2197_v27 = vmul.f32 %v2175_v22, %v5287_v15  ;;  %v2198_v35 = vmul.f32 %v3959_v55, %v2156_v51  ;;  %v2185_v44 = vmul.f32 %v3957_v37, %v2184_v24  ;;  %vm2192_vm3 = vcmp.eq.f32.partialorder %v2191_v50, 8.507059e+37  ;;  %v6390_v51 = vld [vmem:[#allocation30_spill] sm:$0xff]  ;;  %v6391_v22 = vld [vmem:[#allocation32_spill] sm:$0xff]  ;;  %v6393_v55 = vld [vmem:[#allocation35_spill] sm:$0xff] }
 0x4e6   :  { %3960 = vtanh.f32 %v5449_v63  ;;  %v2315_v36 = vsel %vm2314_vm14, %v3953_v31, %v2311_v62  ;;  %v2193_v31 = vand.u32 2147483648, %v5415_v30  ;;  %v6387_v62 = vld [vmem:[#allocation28_spill] sm:$0xff]  ;;  %v6398_v24 = vld [vmem:[#allocation39_spill] sm:$0xff] }
 0x4e7   :  { %v2320_v39 = vsel %vm2317_vm15, %v2319_v13, %v2315_v36  ;;  %v5457_v11 = vadd.f32 %v2198_v35, %v2197_v27  ;;  %v2186_v15 = vadd.f32 %v3957_v37, %v2185_v44  ;;  %v6394_v36 = vld [vmem:[#allocation34_spill] sm:$0xff]  ;;  %v6395_v27 = vld [vmem:[#allocation36_spill] sm:$0xff]  ;;  %v6396_v35 = vld [vmem:[#allocation37_spill] sm:$0xff] }
 0x4e8   :  { %v2194_v4 = vor.u32 1.1754944e-38, %v2193_v31  ;;  %v6397_v13 = vld [vmem:[#allocation38_spill] sm:$0xff]  ;;  %v6402_v44 = vld [vmem:[#allocation43_spill] sm:$0xff] }
 0x4e9   :  { %3962 = vtanh.f32 %v5457_v11  ;;  %v2190_v14 = vsel %vm2189_vm2, %v3957_v37, %v2186_v15  ;;  %v6382_v37 = vld [vmem:[#allocation23_spill] sm:$0xff]  ;;  %v6404_v15 = vld [vmem:[#allocation45_spill] sm:$0xff]  ;;  %v6405_v31 = vld [vmem:[#allocation46_spill] sm:$0xff] }
 0x4ea   :  { %v2195_v52 = vsel %vm2192_vm3, %v2194_v4, %v2190_v14  ;;  %v6406_v50 = vld [vmem:[#allocation47_spill] sm:$0xff]  ;;  %v6407_v14 = vld [vmem:[#allocation48_spill] sm:$0xff]  ;;  %v6409_v4 = vld [vmem:[#allocation50_spill] sm:$0xff] }
 0x4ec   :  { %v3961_v47 = vpop.eup %3960 }
 0x4ed   :  { %v2326_v18 = vmul.f32 %v3961_v47, %v2320_v39  ;;  %v6399_v47 = vld [vmem:[#allocation40_spill] sm:$0xff]  ;;  %v6400_v39 = vld [vmem:[#allocation41_spill] sm:$0xff] }
 0x4ef   :  { %v2327_v29 = vpack.c.bf16 %v2326_v18, %v2326_v18  ;;  %v3963_v49 = vpop.eup %3962  ;;  %v6401_v18 = vld [vmem:[#allocation42_spill] sm:$0xff] }
 0x4f0   :  { %v2201_v56 = vmul.f32 %v3963_v49, %v2195_v52  ;;  %v6408_v49 = vld [vmem:[#allocation49_spill] sm:$0xff]  ;;  %v6410_v52 = vld [vmem:[#allocation51_spill] sm:$0xff] }
 0x4f1   :  { %2336 = vmatmul.bf16.vlgmr.msra.gmra.mxu0 %v2327_v29  ;;  %2349 = vmatmul.bf16.vlgmr.msra.gmra.mxu1 %v2327_v29 }
 0x4f2   :  { %2362 = vmatmul.bf16.vlgmr.msra.gmra.mxu2 %v2327_v29  ;;  %2375 = vmatmul.bf16.vlgmr.msra.gmra.mxu3 %v2327_v29  ;;  %v2202_v30 = vpack.c.bf16 %v2201_v56, %v2201_v56  ;;  %v6411_v56 = vld [vmem:[#allocation52_spill] sm:$0xff] }
 0x4f3   :  { %2505 = vmatpush.bf16.msra.mxu0 %v4294_v3  ;;  %2518 = vmatpush.bf16.msra.mxu1 %v4296_v7 }
 0x4f4   :  { %2531 = vmatpush.bf16.msra.mxu2 %v4309_v21  ;;  %2544 = vmatpush.bf16.msra.mxu3 %v4298_v8 }
 0x4f7   :  { %2506 = vmatpush.bf16.msra.mxu0 %v4301_v12  ;;  %2519 = vmatpush.bf16.msra.mxu1 %v4305_v16 }
 0x4f8   :  { %2532 = vmatpush.bf16.msra.mxu2 %v4321_v34  ;;  %2545 = vmatpush.bf16.msra.mxu3 %v4307_v17 }
 0x4fb   :  { %2507 = vmatpush.bf16.msra.mxu0 %v4313_v28  ;;  %2520 = vmatpush.bf16.msra.mxu1 %v4317_v32 }
 0x4fc   :  { %2533 = vmatpush.bf16.msra.mxu2 %v4327_v42  ;;  %2546 = vmatpush.bf16.msra.mxu3 %v4319_v33 }
 0x4ff   :  { %2508 = vmatpush.bf16.msra.mxu0 %v4325_v41  ;;  %2521 = vmatpush.bf16.msra.mxu1 %v4331_v45 }
 0x500   :  { %2534 = vmatpush.bf16.msra.mxu2 %v4339_v54  ;;  %2547 = vmatpush.bf16.msra.mxu3 %v4333_v46 }
 0x501   :  { %2388 = vmatmul.bf16.vlgmr.msrb.gmra.mxu0 %v2202_v30  ;;  %2401 = vmatmul.bf16.vlgmr.msrb.gmra.mxu1 %v2202_v30 }
 0x502   :  { %2414 = vmatmul.bf16.vlgmr.msrb.gmra.mxu2 %v2202_v30  ;;  %2427 = vmatmul.bf16.vlgmr.msrb.gmra.mxu3 %v2202_v30  ;;  %v6412_v30 = vld [vmem:[#allocation53_spill] sm:$0xff] }
 0x503   :  { %2509 = vmatpush.bf16.msra.mxu0 %v4337_v53  ;;  %2522 = vmatpush.bf16.msra.mxu1 %v4343_v57 }
 0x504   :  { %2535 = vmatpush.bf16.msra.mxu2 %v4351_v2  ;;  %2548 = vmatpush.bf16.msra.mxu3 %v4345_v58 }
 0x507   :  { %2510 = vmatpush.bf16.msra.mxu0 %v4349_v1  ;;  %2523 = vmatpush.bf16.msra.mxu1 %v4355_v6 }
 0x508   :  { %2536 = vmatpush.bf16.msra.mxu2 %v4363_v20  ;;  %2549 = vmatpush.bf16.msra.mxu3 %v4357_v9 }
 0x50b   :  { %2511 = vmatpush.bf16.msra.mxu0 %v4361_v19  ;;  %2524 = vmatpush.bf16.msra.mxu1 %v4367_v25 }
 0x50c   :  { %2537 = vmatpush.bf16.msra.mxu2 %v4375_v43  ;;  %2550 = vmatpush.bf16.msra.mxu3 %v4369_v26 }
 0x50f   :  { %2512 = vmatpush.bf16.msra.mxu0 %v4373_v40  ;;  %2525 = vmatpush.bf16.msra.mxu1 %v4379_v48 }
 0x510   :  { %2538 = vmatpush.bf16.msra.mxu2 %v4393_v10  ;;  %2551 = vmatpush.bf16.msra.mxu3 %v6382_v37 }
 0x512   :  { %2513 = vmatmul.bf16.vlgmr.msra.gmra.mxu0 %v2327_v29  ;;  %2526 = vmatmul.bf16.vlgmr.msra.gmra.mxu1 %v2327_v29 }
 0x513   :  { %2625 = vmatpush.bf16.msrb.mxu0 %v6383_v0  ;;  %2638 = vmatpush.bf16.msrb.mxu1 %v6384_v5 }
 0x514   :  { %2539 = vmatmul.bf16.vlgmr.msra.gmra.mxu2 %v2327_v29  ;;  %2552 = vmatmul.bf16.vlgmr.msra.gmra.mxu3 %v2327_v29  ;;  %v6403_v29 = vld [vmem:[#allocation44_spill] sm:$0xff] }
 0x515   :  { %2651 = vmatpush.bf16.msrb.mxu2 %v6385_v23  ;;  %2664 = vmatpush.bf16.msrb.mxu3 %v6386_v59 }
 0x517   :  { %2626 = vmatpush.bf16.msrb.mxu0 %v6387_v62  ;;  %2639 = vmatpush.bf16.msrb.mxu1 %v6388_v61 }
 0x519   :  { %2652 = vmatpush.bf16.msrb.mxu2 %v6389_v60  ;;  %2665 = vmatpush.bf16.msrb.mxu3 %v6390_v51 }
 0x51b   :  { %2627 = vmatpush.bf16.msrb.mxu0 %v6391_v22  ;;  %2640 = vmatpush.bf16.msrb.mxu1 %v6392_v38 }
 0x51d   :  { %2653 = vmatpush.bf16.msrb.mxu2 %v6393_v55  ;;  %2666 = vmatpush.bf16.msrb.mxu3 %v6394_v36 }
 0x51f   :  { %2628 = vmatpush.bf16.msrb.mxu0 %v6395_v27  ;;  %2641 = vmatpush.bf16.msrb.mxu1 %v6396_v35 }
 0x521   :  { %2654 = vmatpush.bf16.msrb.mxu2 %v6397_v13  ;;  %2667 = vmatpush.bf16.msrb.mxu3 %v6398_v24 }
 0x523   :  { %2629 = vmatpush.bf16.msrb.mxu0 %v6399_v47  ;;  %2642 = vmatpush.bf16.msrb.mxu1 %v6400_v39 }
 0x525   :  { %2655 = vmatpush.bf16.msrb.mxu2 %v6401_v18  ;;  %2668 = vmatpush.bf16.msrb.mxu3 %v6402_v44  ;;  %v6413_v44 = vld [vmem:[#allocation56_spill] sm:$0xff] }
 0x527   :  { %2630 = vmatpush.bf16.msrb.mxu0 %v6403_v29  ;;  %2643 = vmatpush.bf16.msrb.mxu1 %v6404_v15  ;;  %v6414_v29 = vld [vmem:[#allocation57_spill] sm:$0xff]  ;;  %v6415_v15 = vld [vmem:[#allocation54_spill] sm:$0xff] }
 0x529   :  { %2656 = vmatpush.bf16.msrb.mxu2 %v6405_v31  ;;  %2669 = vmatpush.bf16.msrb.mxu3 %v6406_v50  ;;  %v6416_v31 = vld [vmem:[#allocation55_spill] sm:$0xff]  ;;  %v6417_v50 = vld [vmem:[#allocation58_spill] sm:$0xff] }
 0x52b   :  { %2631 = vmatpush.bf16.msrb.mxu0 %v6407_v14  ;;  %2644 = vmatpush.bf16.msrb.mxu1 %v6408_v49  ;;  %v6418_v14 = vld [vmem:[#allocation59_spill] sm:$0xff]  ;;  %v6419_v49 = vld [vmem:[#allocation60_spill] sm:$0xff] }
 0x52d   :  { %2657 = vmatpush.bf16.msrb.mxu2 %v6409_v4  ;;  %2670 = vmatpush.bf16.msrb.mxu3 %v6410_v52  ;;  %v6420_v4 = vld [vmem:[#allocation61_spill] sm:$0xff]  ;;  %v6421_v52 = vld [vmem:[#allocation62_spill] sm:$0xff] }
 0x52f   :  { %2632 = vmatpush.bf16.msrb.mxu0 %v6411_v56  ;;  %2645 = vmatpush.bf16.msrb.mxu1 %v6412_v30  ;;  %v6422_v56 = vld [vmem:[#allocation63_spill] sm:$0xff]  ;;  %v6423_v30 = vld [vmem:[#allocation64_spill] sm:$0xff] }
 0x531   :  { %2658 = vmatpush.bf16.msrb.mxu2 %v6415_v15  ;;  %2671 = vmatpush.bf16.msrb.mxu3 %v6416_v31  ;;  %v6426_v15 = vld [vmem:[#allocation67_spill] sm:$0xff]  ;;  %v6427_v31 = vld [vmem:[#allocation68_spill] sm:$0xff] }
 0x533   :  { %2677 = vmatpush.bf16.msra.mxu0 %v6413_v44  ;;  %2690 = vmatpush.bf16.msra.mxu1 %v6414_v29  ;;  %v6424_v44 = vld [vmem:[#allocation65_spill] sm:$0xff]  ;;  %v6425_v29 = vld [vmem:[#allocation66_spill] sm:$0xff] }
 0x535   :  { %2703 = vmatpush.bf16.msra.mxu2 %v6417_v50  ;;  %2716 = vmatpush.bf16.msra.mxu3 %v6418_v14  ;;  %v6428_v50 = vld [vmem:[#allocation69_spill] sm:$0xff]  ;;  %v6429_v14 = vld [vmem:[#allocation70_spill] sm:$0xff] }
 0x537   :  { %2678 = vmatpush.bf16.msra.mxu0 %v6419_v49  ;;  %2691 = vmatpush.bf16.msra.mxu1 %v6420_v4  ;;  %v6430_v49 = vld [vmem:[#allocation71_spill] sm:$0xff]  ;;  %v6431_v4 = vld [vmem:[#allocation72_spill] sm:$0xff] }
 0x539   :  { %2704 = vmatpush.bf16.msra.mxu2 %v6421_v52  ;;  %2717 = vmatpush.bf16.msra.mxu3 %v6422_v56  ;;  %v6432_v52 = vld [vmem:[#allocation73_spill] sm:$0xff]  ;;  %v6433_v56 = vld [vmem:[#allocation74_spill] sm:$0xff] }
 0x53b   :  { %2679 = vmatpush.bf16.msra.mxu0 %v6423_v30  ;;  %2692 = vmatpush.bf16.msra.mxu1 %v6424_v44  ;;  %v6434_v30 = vld [vmem:[#allocation75_spill] sm:$0xff]  ;;  %v6435_v44 = vld [vmem:[#allocation76_spill] sm:$0xff] }
 0x53d   :  { %2705 = vmatpush.bf16.msra.mxu2 %v6425_v29  ;;  %2718 = vmatpush.bf16.msra.mxu3 %v6426_v15  ;;  %v6436_v29 = vld [vmem:[#allocation77_spill] sm:$0xff]  ;;  %v6437_v15 = vld [vmem:[#allocation78_spill] sm:$0xff] }
 0x53f   :  { %2680 = vmatpush.bf16.msra.mxu0 %v6427_v31  ;;  %2693 = vmatpush.bf16.msra.mxu1 %v6428_v50  ;;  %v6438_v31 = vld [vmem:[#allocation79_spill] sm:$0xff]  ;;  %v6439_v50 = vld [vmem:[#allocation80_spill] sm:$0xff] }
 0x541   :  { %2706 = vmatpush.bf16.msra.mxu2 %v6429_v14  ;;  %2719 = vmatpush.bf16.msra.mxu3 %v6430_v49  ;;  %v6440_v14 = vld [vmem:[#allocation81_spill] sm:$0xff]  ;;  %v6441_v49 = vld [vmem:[#allocation82_spill] sm:$0xff] }
 0x543   :  { %2681 = vmatpush.bf16.msra.mxu0 %v6431_v4  ;;  %2694 = vmatpush.bf16.msra.mxu1 %v6432_v52  ;;  %v6442_v4 = vld [vmem:[#allocation83_spill] sm:$0xff]  ;;  %v6443_v52 = vld [vmem:[#allocation84_spill] sm:$0xff] }
 0x545   :  { %2707 = vmatpush.bf16.msra.mxu2 %v6433_v56  ;;  %2720 = vmatpush.bf16.msra.mxu3 %v6434_v30  ;;  %v6444_v56 = vld [vmem:[#allocation85_spill] sm:$0xff]  ;;  %v6445_v30 = vld [vmem:[#allocation86_spill] sm:$0xff] }
 0x547   :  { %2682 = vmatpush.bf16.msra.mxu0 %v6435_v44  ;;  %2695 = vmatpush.bf16.msra.mxu1 %v6436_v29  ;;  %v6446_v44 = vld [vmem:[#allocation87_spill] sm:$0xff] }
 0x549   :  { %2708 = vmatpush.bf16.msra.mxu2 %v6437_v15  ;;  %2721 = vmatpush.bf16.msra.mxu3 %v6438_v31 }
 0x54b   :  { %2683 = vmatpush.bf16.msra.mxu0 %v6439_v50  ;;  %2696 = vmatpush.bf16.msra.mxu1 %v6440_v14 }
 0x54d   :  { %2709 = vmatpush.bf16.msra.mxu2 %v6441_v49  ;;  %2722 = vmatpush.bf16.msra.mxu3 %v6442_v4 }
 0x54f   :  { %2684 = vmatpush.bf16.msra.mxu0 %v6443_v52  ;;  %2697 = vmatpush.bf16.msra.mxu1 %v6444_v56  ;;  %v6447_v52 = vld [vmem:[#allocation88_spill] sm:$0xff]  ;;  %v6448_v56 = vld [vmem:[#allocation89_spill] sm:$0xff] }
 0x551   :  { %2710 = vmatpush.bf16.msra.mxu2 %v6445_v30  ;;  %2723 = vmatpush.bf16.msra.mxu3 %v6446_v44 }
 0x56e   :  { %v2337_v29 = vpop.f32.mrf.mxu0  ;;  %v2350_v15 = vpop.f32.mrf.mxu1 }
 0x575   :  { %v5559_v18 = vpop.f32.mrf.mxu2  ;;  %v2376_v31 = vpop.f32.mrf.mxu3 }
 0x576   :  { %v2339_v50 = vpop.f32.mrf.mxu0  ;;  %v2352_v39 = vpop.f32.mrf.mxu1 }
 0x57d   :  { %v2365_v14 = vpop.f32.mrf.mxu2  ;;  %v2378_v47 = vpop.f32.mrf.mxu3 }
 0x57e   :  { %v2389_v49 = vpop.f32.mrf.mxu0  ;;  %v2402_v24 = vpop.f32.mrf.mxu1  ;;  %v2501_v14 = vld [vmem:[#allocation6 + $0xc0] sm:$0xff]  ;;  %v2502_v47 = vld [vmem:[#allocation6 + $0xc8] sm:$0xff] }
 0x57f   :  { %v2390_v4 = vadd.f32 %v2389_v49, %v2337_v29  ;;  %v2403_v13 = vadd.f32 %v2402_v24, %v2350_v15 }
 0x581   :  { %v2432_v35 = vadd.f32 %v2390_v4, %v6447_v52  ;;  %v2433_v27 = vadd.f32 %v2403_v13, %v6448_v56 }
 0x583   :  { %v3622_v44 = vmul.f32 -1.442695, %v2432_v35  ;;  %v3623_v22 = vmul.f32 -1.442695, %v2433_v27 }
 0x585   :  { %v2415_v30 = vpop.f32.mrf.mxu2  ;;  %v2428_v36 = vpop.f32.mrf.mxu3  ;;  %3964 = vpow2.f32 %v3622_v44 }
 0x586   :  { %v2391_v55 = vpop.f32.mrf.mxu0  ;;  %v2404_v38 = vpop.f32.mrf.mxu1  ;;  %3966 = vpow2.f32 %v3623_v22  ;;  %v2429_v4 = vadd.f32 %v2428_v36, %v2376_v31  ;;  %v6449_v22 = vld [vmem:[#allocation90_spill] sm:$0xff] }
 0x587   :  { %v2504_v38 = vld [vmem:[#allocation6 + $0xd8] sm:$0xff] }
 0x588   :  { %v2435_v27 = vadd.f32 %v2429_v4, %v6449_v22  ;;  %v2503_v4 = vld [vmem:[#allocation6 + $0xd0] sm:$0xff] }
 0x58b   :  { %v3965_v29 = vpop.eup %3964 }
 0x58c   :  { %v3967_v49 = vpop.eup %3966  ;;  %v5563_v52 = vadd.f32 1.0, %v3965_v29 }
 0x58d   :  { %v2417_v50 = vpop.f32.mrf.mxu2  ;;  %v2430_v39 = vpop.f32.mrf.mxu3  ;;  %v5565_v55 = vadd.f32 1.0, %v3967_v49 }
 0x58e   :  { %v3624_v39 = vmul.f32 -1.442695, %v2435_v27  ;;  %v2449_v61 = vand.u32 2147483647, %v5563_v52  ;;  %vm2445_vm14 = vweird.f32 %v5563_v52 }
 0x58f   :  { %v2514_v51 = vpop.f32.mrf.mxu0  ;;  %v2527_v60 = vpop.f32.mrf.mxu1  ;;  %vm2464_vm15 = vweird.f32 %v5565_v55 }
 0x590   :  { %v2557_v24 = vadd.f32 %v2514_v51, %v2501_v14  ;;  %v2558_v15 = vadd.f32 %v2527_v60, %v2502_v47  ;;  %vm2450_vm2 = vcmp.eq.f32.partialorder %v2449_v61, 8.507059e+37 }
 0x592   :  { %v3625_v13 = vmul.f32 -1.442695, %v2557_v24  ;;  %v3626_v56 = vmul.f32 -1.442695, %v2558_v15 }
 0x594   :  { %3968 = vpow2.f32 %v3625_v13 }
 0x595   :  { %3970 = vpow2.f32 %v3626_v56 }
 0x596   :  { %3972 = vrcp.f32 %v5563_v52 }
 0x597   :  { %v2540_v35 = vpop.f32.mrf.mxu2  ;;  %v2553_v44 = vpop.f32.mrf.mxu3  ;;  %3974 = vrcp.f32 %v5565_v55 }
 0x598   :  { %v2560_v50 = vadd.f32 %v2553_v44, %v2504_v38  ;;  %v2516_v51 = vpop.f32.mrf.mxu0  ;;  %v2529_v60 = vpop.f32.mrf.mxu1  ;;  %v2416_v44 = vadd.f32 %v2415_v30, %v5559_v18 }
 0x599   :  { %v2559_v60 = vadd.f32 %v2540_v35, %v2503_v4 }
 0x59a   :  { %v3627_v36 = vmul.f32 -1.442695, %v2560_v50  ;;  %v3969_v31 = vpop.eup %3968 }
 0x59b   :  { %v2564_v14 = vadd.f32 1.0, %v3969_v31  ;;  %v3971_v47 = vpop.eup %3970 }
 0x59c   :  { %3976 = vpow2.f32 %v3627_v36  ;;  %v5570_v29 = vpop.eup %3972  ;;  %v2583_v24 = vadd.f32 1.0, %v3971_v47 }
 0x59d   :  { %3978 = vrcp.f32 %v2564_v14  ;;  %v5572_v56 = vpop.eup %3974  ;;  %v2441_v38 = vmul.f32 %v5570_v29, %v5563_v52  ;;  %vm2446_vm4 = vweird.f32 %v5570_v29  ;;  %v2576_v30 = vand.u32 2147483648, %v2564_v14 }
 0x59e   :  { %3980 = vpow2.f32 %v3624_v39  ;;  %v2460_v27 = vmul.f32 %v5572_v56, %v5565_v55  ;;  %v2595_v23 = vand.u32 2147483648, %v2583_v24  ;;  %vm2570_vm6 = vweird.f32 %v2564_v14  ;;  %vm5601_vm0 = vmor %vm2445_vm14, %vm2446_vm4 }
 0x59f   :  { %v2542_v15 = vpop.f32.mrf.mxu2  ;;  %v2555_v49 = vpop.f32.mrf.mxu3  ;;  %3982 = vrcp.f32 %v2583_v24  ;;  %v2442_v47 = vsub.f32 1.0, %v2441_v38  ;;  %vm2465_vm8 = vweird.f32 %v5572_v56  ;;  %vm2589_vm9 = vweird.f32 %v2583_v24 }
 0x5a0   :  { %v2461_v15 = vsub.f32 1.0, %v2460_v27  ;;  %v6450_v49 = vld [vmem:[#allocation91_spill] sm:$0xff]  ;;  %vm5609_vm1 = vmor %vm2464_vm15, %vm2465_vm8 }
 0x5a1   :  { %v2434_v22 = vadd.f32 %v2416_v44, %v6450_v49  ;;  %v2443_v27 = vmul.f32 %v5570_v29, %v2442_v47  ;;  %v2593_v49 = vand.u32 2147483647, %v2583_v24 }
 0x5a2   :  { %v3977_v13 = vpop.eup %3976  ;;  %v2462_v38 = vmul.f32 %v5572_v56, %v2461_v15 }
 0x5a3   :  { %v5579_v50 = vadd.f32 1.0, %v3977_v13  ;;  %v3979_v51 = vpop.eup %3978  ;;  %v2574_v13 = vand.u32 2147483647, %v2564_v14  ;;  %vm2594_vm13 = vcmp.eq.f32.partialorder %v2593_v49, 8.507059e+37 }
 0x5a4   :  { %v3981_v36 = vpop.eup %3980  ;;  %v2566_v31 = vmul.f32 %v3979_v51, %v2564_v14  ;;  %vm2571_vm5 = vweird.f32 %v3979_v51  ;;  %v2444_v14 = vadd.f32 %v5570_v29, %v2443_v27  ;;  %v2463_v15 = vadd.f32 %v5572_v56, %v2462_v38 }
 0x5a5   :  { %v3983_v39 = vpop.eup %3982  ;;  %3984 = vrcp.f32 %v5579_v50  ;;  %v5585_v18 = vadd.f32 1.0, %v3981_v36  ;;  %vm2572_vm10 = vmor %vm2570_vm6, %vm2571_vm5  ;;  %vm2575_vm11 = vcmp.eq.f32.partialorder %v2574_v13, 8.507059e+37  ;;  %vm2609_vm5 = vweird.f32 %v5579_v50 }
 0x5a6   :  { %v2567_v62 = vsub.f32 1.0, %v2566_v31  ;;  %v2585_v59 = vmul.f32 %v3983_v39, %v2583_v24  ;;  %3986 = vtanh.f32 %v2559_v60  ;;  %vm2590_vm7 = vweird.f32 %v3983_v39 }
 0x5a7   :  { %3988 = vrcp.f32 %v5585_v18  ;;  %vm2591_vm12 = vmor %vm2589_vm9, %vm2590_vm7  ;;  %v2613_v61 = vand.u32 2147483647, %v5579_v50  ;;  %vm2484_vm9 = vweird.f32 %v5585_v18 }
 0x5a8   :  { %v2586_v35 = vsub.f32 1.0, %v2585_v59  ;;  %v2568_v4 = vmul.f32 %v3979_v51, %v2567_v62  ;;  %v2577_v59 = vor.u32 1.1754944e-38, %v2576_v30  ;;  %v2470_v30 = vand.u32 2147483648, %v5565_v55 }
 0x5a9   :  { %3990 = vtanh.f32 %v2434_v22  ;;  %v2615_v22 = vand.u32 2147483648, %v5579_v50  ;;  %vm2614_vm7 = vcmp.eq.f32.partialorder %v2613_v61, 8.507059e+37  ;;  %v6496_v61 = vld [vmem:[#allocation64_spill] sm:$0xff] }
 0x5aa   :  { %v2587_v44 = vmul.f32 %v3983_v39, %v2586_v35  ;;  %v2569_v31 = vadd.f32 %v3979_v51, %v2568_v4  ;;  %v2596_v35 = vor.u32 1.1754944e-38, %v2595_v23  ;;  %v2468_v23 = vand.u32 2147483647, %v5565_v55 }
 0x5ab   :  { %v3985_v5 = vpop.eup %3984 }
 0x5ac   :  { %v2573_v62 = vsel %vm2572_vm10, %v3979_v51, %v2569_v31  ;;  %v2588_v60 = vadd.f32 %v3983_v39, %v2587_v44  ;;  %v2605_v36 = vmul.f32 %v3985_v5, %v5579_v50  ;;  %v3987_v47 = vpop.eup %3986  ;;  %v2451_v51 = vand.u32 2147483648, %v5563_v52  ;;  %v6486_v44 = vld [vmem:[#allocation56_spill] sm:$0xff] }
 0x5ad   :  { %v2578_v4 = vsel %vm2575_vm11, %v2577_v59, %v2573_v62  ;;  %v3989_v27 = vpop.eup %3988  ;;  %v2467_v52 = vsel %vm5609_vm1, %v5572_v56, %v2463_v15  ;;  %vm2610_vm3 = vweird.f32 %v3985_v5  ;;  %vm2469_vm4 = vcmp.eq.f32.partialorder %v2468_v23, 8.507059e+37  ;;  %v6482_v23 = vld [vmem:[#allocation50_spill] sm:$0xff] }
 0x5ae   :  { %v2592_v0 = vsel %vm2591_vm12, %v3983_v39, %v2588_v60  ;;  %v2620_v37 = vmul.f32 %v3987_v47, %v2578_v4  ;;  %v2606_v24 = vsub.f32 1.0, %v2605_v36  ;;  %v2452_v31 = vor.u32 1.1754944e-38, %v2451_v51  ;;  %vm2611_vm6 = vmor %vm2609_vm5, %vm2610_vm3 }
 0x5af   :  { %v2597_v13 = vsel %vm2594_vm13, %v2596_v35, %v2592_v0  ;;  %v2448_v0 = vsel %vm5601_vm0, %v5570_v29, %v2444_v14  ;;  %v2480_v62 = vmul.f32 %v3989_v27, %v5585_v18  ;;  %v2616_v14 = vor.u32 1.1754944e-38, %v2615_v22  ;;  %v6493_v22 = vld [vmem:[#allocation61_spill] sm:$0xff] }
 0x5b0   :  { %v2619_v39 = vmul.f32 %v2597_v13, %v5449_v63  ;;  %v2607_v49 = vmul.f32 %v3985_v5, %v2606_v24  ;;  %v2471_v63 = vor.u32 1.1754944e-38, %v2470_v30  ;;  %v2453_v60 = vsel %vm2450_vm2, %v2452_v31, %v2448_v0  ;;  %v6487_v0 = vld [vmem:[#allocation57_spill] sm:$0xff]  ;;  %v6490_v31 = vld [vmem:[#allocation58_spill] sm:$0xff] }
 0x5b1   :  { %v2481_v15 = vsub.f32 1.0, %v2480_v62  ;;  %vm2485_vm8 = vweird.f32 %v3989_v27  ;;  %v2488_v50 = vand.u32 2147483647, %v5585_v18  ;;  %v6492_v62 = vld [vmem:[#allocation60_spill] sm:$0xff] }
 0x5b2   :  { %v5619_v55 = vadd.f32 %v2620_v37, %v2619_v39  ;;  %v2608_v59 = vadd.f32 %v3985_v5, %v2607_v49  ;;  %v2472_v29 = vsel %vm2469_vm4, %v2471_v63, %v2467_v52  ;;  %v3991_v37 = vpop.eup %3990  ;;  %vm2486_vm10 = vmor %vm2484_vm9, %vm2485_vm8  ;;  %v6483_v39 = vld [vmem:[#allocation51_spill] sm:$0xff]  ;;  %v6484_v49 = vld [vmem:[#allocation52_spill] sm:$0xff] }
 0x5b3   :  { %v2494_v36 = vmul.f32 %v2472_v29, %v5457_v11  ;;  %v2495_v47 = vmul.f32 %v3991_v37, %v2453_v60  ;;  %v2482_v51 = vmul.f32 %v3989_v27, %v2481_v15  ;;  %vm2489_vm11 = vcmp.eq.f32.partialorder %v2488_v50, 8.507059e+37  ;;  %v6488_v52 = vld [vmem:[#allocation54_spill] sm:$0xff]  ;;  %v6489_v63 = vld [vmem:[#allocation55_spill] sm:$0xff]  ;;  %v6497_v37 = vld [vmem:[#allocation65_spill] sm:$0xff] }
 0x5b4   :  { %3992 = vtanh.f32 %v5619_v55  ;;  %v2612_v56 = vsel %vm2611_vm6, %v3985_v5, %v2608_v59  ;;  %v2490_v5 = vand.u32 2147483648, %v5585_v18  ;;  %v6481_v18 = vld [vmem:[#allocation49_spill] sm:$0xff]  ;;  %v6491_v59 = vld [vmem:[#allocation59_spill] sm:$0xff]  ;;  %v6494_v60 = vld [vmem:[#allocation62_spill] sm:$0xff] }
 0x5b5   :  { %v2617_v4 = vsel %vm2614_vm7, %v2616_v14, %v2612_v56  ;;  %v5627_v30 = vadd.f32 %v2495_v47, %v2494_v36  ;;  %v2483_v11 = vadd.f32 %v3989_v27, %v2482_v51  ;;  %v6495_v29 = vld [vmem:[#allocation63_spill] sm:$0xff]  ;;  %v6498_v56 = vld [vmem:[#allocation66_spill] sm:$0xff]  ;;  %v6500_v47 = vld [vmem:[#allocation68_spill] sm:$0xff] }
 0x5b6   :  { %v6499_v36 = vld [vmem:[#allocation67_spill] sm:$0xff]  ;;  %v6501_v14 = vld [vmem:[#allocation69_spill] sm:$0xff]  ;;  %v6502_v15 = vld [vmem:[#allocation70_spill] sm:$0xff] }
 0x5b7   :  { %3994 = vtanh.f32 %v5627_v30  ;;  %v6506_v51 = vld [vmem:[#allocation74_spill] sm:$0xff] }
 0x5b8   :  { %v6510_v50 = vld [vmem:[#allocation78_spill] sm:$0xff] }
 0x5ba   :  { %v3993_v35 = vpop.eup %3992 }
 0x5bb   :  { %v2623_v24 = vmul.f32 %v3993_v35, %v2617_v4  ;;  %v6503_v35 = vld [vmem:[#allocation71_spill] sm:$0xff]  ;;  %v6504_v4 = vld [vmem:[#allocation72_spill] sm:$0xff] }
 0x5bd   :  { %v2624_v13 = vpack.c.bf16 %v2623_v24, %v2623_v24  ;;  %v3995_v38 = vpop.eup %3994  ;;  %v6505_v24 = vld [vmem:[#allocation73_spill] sm:$0xff] }
 0x5bf   :  { %2633 = vmatmul.bf16.vlgmr.msrb.gmra.mxu0 %v2624_v13  ;;  %2646 = vmatmul.bf16.vlgmr.msrb.gmra.mxu1 %v2624_v13 }
 0x5c0   :  { %2659 = vmatmul.bf16.vlgmr.msrb.gmra.mxu2 %v2624_v13  ;;  %2672 = vmatmul.bf16.vlgmr.msrb.gmra.mxu3 %v2624_v13 }
 0x5c1   :  { %2802 = vmatpush.bf16.msrb.mxu0 %v4294_v3  ;;  %2815 = vmatpush.bf16.msrb.mxu1 %v4296_v7  ;;  %v2487_v3 = vsel %vm2486_vm10, %v3989_v27, %v2483_v11  ;;  %v2491_v7 = vor.u32 1.1754944e-38, %v2490_v5  ;;  %v6485_v27 = vld [vmem:[#allocation53_spill] sm:$0xff]  ;;  %v6508_v11 = vld [vmem:[#allocation76_spill] sm:$0xff] }
 0x5c2   :  { %2828 = vmatpush.bf16.msrb.mxu2 %v4309_v21  ;;  %2841 = vmatpush.bf16.msrb.mxu3 %v4298_v8  ;;  %v6509_v5 = vld [vmem:[#allocation77_spill] sm:$0xff] }
 0x5c3   :  { %v2492_v21 = vsel %vm2489_vm11, %v2491_v7, %v2487_v3  ;;  %v6511_v3 = vld [vmem:[#allocation79_spill] sm:$0xff]  ;;  %v6513_v7 = vld [vmem:[#allocation81_spill] sm:$0xff] }
 0x5c4   :  { %v2498_v8 = vmul.f32 %v3995_v38, %v2492_v21  ;;  %v6512_v38 = vld [vmem:[#allocation80_spill] sm:$0xff]  ;;  %v6514_v21 = vld [vmem:[#allocation82_spill] sm:$0xff] }
 0x5c5   :  { %2803 = vmatpush.bf16.msrb.mxu0 %v4301_v12  ;;  %2816 = vmatpush.bf16.msrb.mxu1 %v4305_v16  ;;  %v6455_v16 = vld [vmem:[#allocation23_spill] sm:$0xff] }
 0x5c6   :  { %2829 = vmatpush.bf16.msrb.mxu2 %v4321_v34  ;;  %2842 = vmatpush.bf16.msrb.mxu3 %v4307_v17  ;;  %v2499_v12 = vpack.c.bf16 %v2498_v8, %v2498_v8  ;;  %v6456_v17 = vld [vmem:[#allocation24_spill] sm:$0xff]  ;;  %v6515_v8 = vld [vmem:[#allocation83_spill] sm:$0xff] }
 0x5c7   :  { %v6460_v34 = vld [vmem:[#allocation28_spill] sm:$0xff] }
 0x5c9   :  { %2804 = vmatpush.bf16.msrb.mxu0 %v4313_v28  ;;  %2817 = vmatpush.bf16.msrb.mxu1 %v4317_v32  ;;  %v6457_v28 = vld [vmem:[#allocation25_spill] sm:$0xff]  ;;  %v6458_v32 = vld [vmem:[#allocation27_spill] sm:$0xff] }
 0x5ca   :  { %2830 = vmatpush.bf16.msrb.mxu2 %v4327_v42  ;;  %2843 = vmatpush.bf16.msrb.mxu3 %v4319_v33  ;;  %v6459_v33 = vld [vmem:[#allocation26_spill] sm:$0xff]  ;;  %v6462_v42 = vld [vmem:[#allocation31_spill] sm:$0xff] }
 0x5cd   :  { %2805 = vmatpush.bf16.msrb.mxu0 %v4325_v41  ;;  %2818 = vmatpush.bf16.msrb.mxu1 %v4331_v45  ;;  %v6461_v41 = vld [vmem:[#allocation29_spill] sm:$0xff]  ;;  %v6463_v45 = vld [vmem:[#allocation30_spill] sm:$0xff] }
 0x5ce   :  { %2831 = vmatpush.bf16.msrb.mxu2 %v4339_v54  ;;  %2844 = vmatpush.bf16.msrb.mxu3 %v4333_v46  ;;  %v6464_v46 = vld [vmem:[#allocation32_spill] sm:$0xff]  ;;  %v6466_v54 = vld [vmem:[#allocation35_spill] sm:$0xff] }
 0x5cf   :  { %2685 = vmatmul.bf16.vlgmr.msra.gmra.mxu0 %v2499_v12  ;;  %2698 = vmatmul.bf16.vlgmr.msra.gmra.mxu1 %v2499_v12 }
 0x5d0   :  { %2711 = vmatmul.bf16.vlgmr.msra.gmra.mxu2 %v2499_v12  ;;  %2724 = vmatmul.bf16.vlgmr.msra.gmra.mxu3 %v2499_v12  ;;  %v6516_v12 = vld [vmem:[#allocation84_spill] sm:$0xff] }
 0x5d1   :  { %2806 = vmatpush.bf16.msrb.mxu0 %v4337_v53  ;;  %2819 = vmatpush.bf16.msrb.mxu1 %v4343_v57  ;;  %v6465_v53 = vld [vmem:[#allocation33_spill] sm:$0xff]  ;;  %v6467_v57 = vld [vmem:[#allocation34_spill] sm:$0xff] }
 0x5d2   :  { %2832 = vmatpush.bf16.msrb.mxu2 %v4351_v2  ;;  %2845 = vmatpush.bf16.msrb.mxu3 %v4345_v58  ;;  %v6468_v58 = vld [vmem:[#allocation36_spill] sm:$0xff]  ;;  %v6470_v2 = vld [vmem:[#allocation38_spill] sm:$0xff] }
 0x5d5   :  { %2807 = vmatpush.bf16.msrb.mxu0 %v4349_v1  ;;  %2820 = vmatpush.bf16.msrb.mxu1 %v4355_v6  ;;  %v6469_v1 = vld [vmem:[#allocation37_spill] sm:$0xff]  ;;  %v6471_v6 = vld [vmem:[#allocation39_spill] sm:$0xff] }
 0x5d6   :  { %2833 = vmatpush.bf16.msrb.mxu2 %v4363_v20  ;;  %2846 = vmatpush.bf16.msrb.mxu3 %v4357_v9  ;;  %v6472_v9 = vld [vmem:[#allocation40_spill] sm:$0xff]  ;;  %v6474_v20 = vld [vmem:[#allocation42_spill] sm:$0xff] }
 0x5d9   :  { %2808 = vmatpush.bf16.msrb.mxu0 %v4361_v19  ;;  %2821 = vmatpush.bf16.msrb.mxu1 %v4367_v25  ;;  %v6473_v19 = vld [vmem:[#allocation41_spill] sm:$0xff]  ;;  %v6475_v25 = vld [vmem:[#allocation43_spill] sm:$0xff] }
 0x5da   :  { %2834 = vmatpush.bf16.msrb.mxu2 %v4375_v43  ;;  %2847 = vmatpush.bf16.msrb.mxu3 %v4369_v26  ;;  %v6476_v26 = vld [vmem:[#allocation44_spill] sm:$0xff]  ;;  %v6478_v43 = vld [vmem:[#allocation46_spill] sm:$0xff] }
 0x5dd   :  { %2809 = vmatpush.bf16.msrb.mxu0 %v4373_v40  ;;  %2822 = vmatpush.bf16.msrb.mxu1 %v4379_v48  ;;  %v6477_v40 = vld [vmem:[#allocation45_spill] sm:$0xff]  ;;  %v6479_v48 = vld [vmem:[#allocation47_spill] sm:$0xff] }
 0x5de   :  { %2835 = vmatpush.bf16.msrb.mxu2 %v4393_v10  ;;  %2848 = vmatpush.bf16.msrb.mxu3 %v6455_v16  ;;  %v6480_v10 = vld [vmem:[#allocation48_spill] sm:$0xff]  ;;  %v6517_v16 = vld [vmem:[#allocation85_spill] sm:$0xff] }
 0x5e0   :  { %2810 = vmatmul.bf16.vlgmr.msrb.gmra.mxu0 %v2624_v13  ;;  %2823 = vmatmul.bf16.vlgmr.msrb.gmra.mxu1 %v2624_v13 }
 0x5e1   :  { %2922 = vmatpush.bf16.msra.mxu0 %v6456_v17  ;;  %2935 = vmatpush.bf16.msra.mxu1 %v6457_v28  ;;  %v6518_v17 = vld [vmem:[#allocation86_spill] sm:$0xff]  ;;  %v6519_v28 = vld [vmem:[#allocation87_spill] sm:$0xff] }
 0x5e2   :  { %2836 = vmatmul.bf16.vlgmr.msrb.gmra.mxu2 %v2624_v13  ;;  %2849 = vmatmul.bf16.vlgmr.msrb.gmra.mxu3 %v2624_v13  ;;  %v6507_v13 = vld [vmem:[#allocation75_spill] sm:$0xff] }
 0x5e3   :  { %2948 = vmatpush.bf16.msra.mxu2 %v6458_v32  ;;  %2961 = vmatpush.bf16.msra.mxu3 %v6459_v33 }
 0x5e5   :  { %2923 = vmatpush.bf16.msra.mxu0 %v6460_v34  ;;  %2936 = vmatpush.bf16.msra.mxu1 %v6461_v41 }
 0x5e7   :  { %2949 = vmatpush.bf16.msra.mxu2 %v6462_v42  ;;  %2962 = vmatpush.bf16.msra.mxu3 %v6463_v45 }
 0x5e9   :  { %2924 = vmatpush.bf16.msra.mxu0 %v6464_v46  ;;  %2937 = vmatpush.bf16.msra.mxu1 %v6465_v53 }
 0x5eb   :  { %2950 = vmatpush.bf16.msra.mxu2 %v6466_v54  ;;  %2963 = vmatpush.bf16.msra.mxu3 %v6467_v57 }
 0x5ed   :  { %2925 = vmatpush.bf16.msra.mxu0 %v6468_v58  ;;  %2938 = vmatpush.bf16.msra.mxu1 %v6469_v1 }
 0x5ef   :  { %2951 = vmatpush.bf16.msra.mxu2 %v6470_v2  ;;  %2964 = vmatpush.bf16.msra.mxu3 %v6471_v6  ;;  %v6520_v2 = vld [vmem:[#allocation88_spill] sm:$0xff] }
 0x5f1   :  { %2926 = vmatpush.bf16.msra.mxu0 %v6472_v9  ;;  %2939 = vmatpush.bf16.msra.mxu1 %v6473_v19  ;;  %v6521_v9 = vld [vmem:[#allocation89_spill] sm:$0xff] }
 0x5f3   :  { %2952 = vmatpush.bf16.msra.mxu2 %v6474_v20  ;;  %2965 = vmatpush.bf16.msra.mxu3 %v6475_v25 }
 0x5f5   :  { %2927 = vmatpush.bf16.msra.mxu0 %v6476_v26  ;;  %2940 = vmatpush.bf16.msra.mxu1 %v6477_v40 }
 0x5f7   :  { %2953 = vmatpush.bf16.msra.mxu2 %v6478_v43  ;;  %2966 = vmatpush.bf16.msra.mxu3 %v6479_v48 }
 0x5f9   :  { %2928 = vmatpush.bf16.msra.mxu0 %v6480_v10  ;;  %2941 = vmatpush.bf16.msra.mxu1 %v6481_v18 }
 0x5fb   :  { %2954 = vmatpush.bf16.msra.mxu2 %v6482_v23  ;;  %2967 = vmatpush.bf16.msra.mxu3 %v6483_v39  ;;  %v2798_v23 = vld [vmem:[#allocation6 + $0xe0] sm:$0xff]  ;;  %v2799_v39 = vld [vmem:[#allocation6 + $0xe8] sm:$0xff] }
 0x5fd   :  { %2929 = vmatpush.bf16.msra.mxu0 %v6484_v49  ;;  %2942 = vmatpush.bf16.msra.mxu1 %v6485_v27 }
 0x5ff   :  { %2955 = vmatpush.bf16.msra.mxu2 %v6488_v52  ;;  %2968 = vmatpush.bf16.msra.mxu3 %v6489_v63 }
 0x601   :  { %2974 = vmatpush.bf16.msrb.mxu0 %v6486_v44  ;;  %2987 = vmatpush.bf16.msrb.mxu1 %v6487_v0 }
 0x603   :  { %3000 = vmatpush.bf16.msrb.mxu2 %v6490_v31  ;;  %3013 = vmatpush.bf16.msrb.mxu3 %v6491_v59 }
 0x605   :  { %2975 = vmatpush.bf16.msrb.mxu0 %v6492_v62  ;;  %2988 = vmatpush.bf16.msrb.mxu1 %v6493_v22 }
 0x607   :  { %3001 = vmatpush.bf16.msrb.mxu2 %v6494_v60  ;;  %3014 = vmatpush.bf16.msrb.mxu3 %v6495_v29  ;;  %v2801_v29 = vld [vmem:[#allocation6 + $0xf8] sm:$0xff] }
 0x609   :  { %2976 = vmatpush.bf16.msrb.mxu0 %v6496_v61  ;;  %2989 = vmatpush.bf16.msrb.mxu1 %v6497_v37  ;;  %v6522_v61 = vld [vmem:[#allocation90_spill] sm:$0xff] }
 0x60b   :  { %3002 = vmatpush.bf16.msrb.mxu2 %v6498_v56  ;;  %3015 = vmatpush.bf16.msrb.mxu3 %v6499_v36 }
 0x60d   :  { %2977 = vmatpush.bf16.msrb.mxu0 %v6500_v47  ;;  %2990 = vmatpush.bf16.msrb.mxu1 %v6501_v14 }
 0x60f   :  { %3003 = vmatpush.bf16.msrb.mxu2 %v6502_v15  ;;  %3016 = vmatpush.bf16.msrb.mxu3 %v6503_v35 }
 0x611   :  { %2978 = vmatpush.bf16.msrb.mxu0 %v6504_v4  ;;  %2991 = vmatpush.bf16.msrb.mxu1 %v6505_v24 }
 0x613   :  { %3004 = vmatpush.bf16.msrb.mxu2 %v6506_v51  ;;  %3017 = vmatpush.bf16.msrb.mxu3 %v6507_v13 }
 0x615   :  { %2979 = vmatpush.bf16.msrb.mxu0 %v6508_v11  ;;  %2992 = vmatpush.bf16.msrb.mxu1 %v6509_v5 }
 0x617   :  { %3005 = vmatpush.bf16.msrb.mxu2 %v6510_v50  ;;  %3018 = vmatpush.bf16.msrb.mxu3 %v6511_v3 }
 0x619   :  { %2980 = vmatpush.bf16.msrb.mxu0 %v6512_v38  ;;  %2993 = vmatpush.bf16.msrb.mxu1 %v6513_v7  ;;  %v2800_v7 = vld [vmem:[#allocation6 + $0xf0] sm:$0xff] }
 0x61b   :  { %3006 = vmatpush.bf16.msrb.mxu2 %v6514_v21  ;;  %3019 = vmatpush.bf16.msrb.mxu3 %v6515_v8 }
 0x61d   :  { %2981 = vmatpush.bf16.msrb.mxu0 %v6516_v12  ;;  %2994 = vmatpush.bf16.msrb.mxu1 %v6517_v16 }
 0x61f   :  { %3007 = vmatpush.bf16.msrb.mxu2 %v6518_v17  ;;  %3020 = vmatpush.bf16.msrb.mxu3 %v6519_v28 }
 0x63c   :  { %v2634_v32 = vpop.f32.mrf.mxu0  ;;  %v2647_v33 = vpop.f32.mrf.mxu1 }
 0x643   :  { %v5729_v34 = vpop.f32.mrf.mxu2  ;;  %v2673_v41 = vpop.f32.mrf.mxu3 }
 0x644   :  { %v2636_v42 = vpop.f32.mrf.mxu0  ;;  %v2649_v45 = vpop.f32.mrf.mxu1 }
 0x64b   :  { %v2662_v46 = vpop.f32.mrf.mxu2  ;;  %v2675_v53 = vpop.f32.mrf.mxu3 }
 0x64c   :  { %v2686_v54 = vpop.f32.mrf.mxu0  ;;  %v2699_v57 = vpop.f32.mrf.mxu1  ;;  %v6523_v53 = vld [vmem:[#allocation91_spill] sm:$0xff] }
 0x64d   :  { %v2687_v58 = vadd.f32 %v2686_v54, %v2634_v32  ;;  %v2700_v1 = vadd.f32 %v2699_v57, %v2647_v33 }
 0x64f   :  { %v2729_v6 = vadd.f32 %v2687_v58, %v6520_v2  ;;  %v2730_v19 = vadd.f32 %v2700_v1, %v6521_v9 }
 0x651   :  { %v3628_v26 = vmul.f32 -1.442695, %v2729_v6  ;;  %v3629_v48 = vmul.f32 -1.442695, %v2730_v19 }
 0x653   :  { %v2712_v20 = vpop.f32.mrf.mxu2  ;;  %v2725_v25 = vpop.f32.mrf.mxu3  ;;  %3996 = vpow2.f32 %v3628_v26 }
 0x654   :  { %v2688_v40 = vpop.f32.mrf.mxu0  ;;  %v2701_v43 = vpop.f32.mrf.mxu1  ;;  %3998 = vpow2.f32 %v3629_v48  ;;  %v2726_v31 = vadd.f32 %v2725_v25, %v2673_v41  ;;  %v2713_v16 = vadd.f32 %v2712_v20, %v5729_v34 }
 0x656   :  { %v2732_v37 = vadd.f32 %v2726_v31, %v6522_v61  ;;  %v2731_v54 = vadd.f32 %v2713_v16, %v6523_v53 }
 0x658   :  { %v3630_v24 = vmul.f32 -1.442695, %v2732_v37 }
 0x659   :  { %v3997_v44 = vpop.eup %3996 }
 0x65a   :  { %v3999_v63 = vpop.eup %3998  ;;  %v5733_v22 = vadd.f32 1.0, %v3997_v44 }
 0x65b   :  { %v2714_v10 = vpop.f32.mrf.mxu2  ;;  %v2727_v18 = vpop.f32.mrf.mxu3  ;;  %v5735_v60 = vadd.f32 1.0, %v3999_v63 }
 0x65c   :  { %v2746_v57 = vand.u32 2147483647, %v5733_v22  ;;  %vm2742_vm6 = vweird.f32 %v5733_v22 }
 0x65d   :  { %v2811_v49 = vpop.f32.mrf.mxu0  ;;  %v2824_v27 = vpop.f32.mrf.mxu1  ;;  %vm2761_vm7 = vweird.f32 %v5735_v60 }
 0x65e   :  { %v2854_v0 = vadd.f32 %v2811_v49, %v2798_v23  ;;  %v2855_v52 = vadd.f32 %v2824_v27, %v2799_v39  ;;  %vm2747_vm10 = vcmp.eq.f32.partialorder %v2746_v57, 8.507059e+37 }
 0x660   :  { %v3631_v59 = vmul.f32 -1.442695, %v2854_v0  ;;  %v3632_v62 = vmul.f32 -1.442695, %v2855_v52 }
 0x662   :  { %4000 = vpow2.f32 %v3631_v59 }
 0x663   :  { %4002 = vpow2.f32 %v3632_v62 }
 0x664   :  { %4004 = vrcp.f32 %v5733_v22 }
 0x665   :  { %v2837_v56 = vpop.f32.mrf.mxu2  ;;  %v2850_v36 = vpop.f32.mrf.mxu3  ;;  %4006 = vrcp.f32 %v5735_v60 }
 0x666   :  { %v2857_v47 = vadd.f32 %v2850_v36, %v2801_v29  ;;  %v2813_v14 = vpop.f32.mrf.mxu0  ;;  %v2826_v15 = vpop.f32.mrf.mxu1  ;;  %v2856_v32 = vadd.f32 %v2837_v56, %v2800_v7  ;;  %v2767_v56 = vand.u32 2147483648, %v5735_v60  ;;  %v2748_v36 = vand.u32 2147483648, %v5733_v22 }
 0x667   :  { %v2765_v15 = vand.u32 2147483647, %v5735_v60 }
 0x668   :  { %v3633_v35 = vmul.f32 -1.442695, %v2857_v47  ;;  %v4001_v4 = vpop.eup %4000 }
 0x669   :  { %v2861_v51 = vadd.f32 1.0, %v4001_v4  ;;  %v4003_v13 = vpop.eup %4002 }
 0x66a   :  { %4008 = vpow2.f32 %v3633_v35  ;;  %v5740_v11 = vpop.eup %4004  ;;  %v2880_v5 = vadd.f32 1.0, %v4003_v13 }
 0x66b   :  { %4010 = vrcp.f32 %v2861_v51  ;;  %v5742_v50 = vpop.eup %4006  ;;  %v2738_v8 = vmul.f32 %v5740_v11, %v5733_v22  ;;  %vm2743_vm12 = vweird.f32 %v5740_v11  ;;  %v2873_v6 = vand.u32 2147483648, %v2861_v51 }
 0x66c   :  { %4012 = vpow2.f32 %v3630_v24  ;;  %v2757_v12 = vmul.f32 %v5742_v50, %v5735_v60  ;;  %v2871_v25 = vand.u32 2147483647, %v2861_v51  ;;  %v2892_v43 = vand.u32 2147483648, %v2880_v5  ;;  %vm5771_vm8 = vmor %vm2742_vm6, %vm2743_vm12 }
 0x66d   :  { %v2839_v3 = vpop.f32.mrf.mxu2  ;;  %v2852_v38 = vpop.f32.mrf.mxu3  ;;  %4014 = vrcp.f32 %v2880_v5  ;;  %v2739_v45 = vsub.f32 1.0, %v2738_v8  ;;  %vm2867_vm14 = vweird.f32 %v2861_v51  ;;  %v2890_v18 = vand.u32 2147483647, %v2880_v5 }
 0x66e   :  { %v2758_v46 = vsub.f32 1.0, %v2757_v12  ;;  %vm2762_vm0 = vweird.f32 %v5742_v50  ;;  %vm2886_vm1 = vweird.f32 %v2880_v5  ;;  %v2874_v39 = vor.u32 1.1754944e-38, %v2873_v6 }
 0x66f   :  { %v2740_v40 = vmul.f32 %v5740_v11, %v2739_v45  ;;  %vm2872_vm3 = vcmp.eq.f32.partialorder %v2871_v25, 8.507059e+37  ;;  %v2893_v31 = vor.u32 1.1754944e-38, %v2892_v43  ;;  %vm2891_vm5 = vcmp.eq.f32.partialorder %v2890_v18, 8.507059e+37  ;;  %vm5779_vm9 = vmor %vm2761_vm7, %vm2762_vm0 }
 0x670   :  { %v4009_v21 = vpop.eup %4008  ;;  %v2759_v26 = vmul.f32 %v5742_v50, %v2758_v46  ;;  %vm2766_vm12 = vcmp.eq.f32.partialorder %v2765_v15, 8.507059e+37 }
 0x671   :  { %v5749_v17 = vadd.f32 1.0, %v4009_v21  ;;  %v4011_v28 = vpop.eup %4010  ;;  %v2741_v52 = vadd.f32 %v5740_v11, %v2740_v40 }
 0x672   :  { %v4013_v33 = vpop.eup %4012  ;;  %v2863_v41 = vmul.f32 %v4011_v28, %v2861_v51  ;;  %vm2868_vm13 = vweird.f32 %v4011_v28  ;;  %v2760_v63 = vadd.f32 %v5742_v50, %v2759_v26 }
 0x673   :  { %v4015_v42 = vpop.eup %4014  ;;  %4016 = vrcp.f32 %v5749_v17  ;;  %v5755_v34 = vadd.f32 1.0, %v4013_v33  ;;  %vm2869_vm2 = vmor %vm2867_vm14, %vm2868_vm13  ;;  %v2745_v22 = vsel %vm5771_vm8, %v5740_v11, %v2741_v52  ;;  %v2912_v7 = vand.u32 2147483648, %v5749_v17 }
 0x674   :  { %v2864_v58 = vsub.f32 1.0, %v2863_v41  ;;  %v2882_v1 = vmul.f32 %v4015_v42, %v2880_v5  ;;  %4018 = vtanh.f32 %v2856_v32  ;;  %vm2887_vm15 = vweird.f32 %v4015_v42 }
 0x675   :  { %4020 = vrcp.f32 %v5755_v34  ;;  %vm2888_vm4 = vmor %vm2886_vm1, %vm2887_vm15  ;;  %v2764_v60 = vsel %vm5779_vm9, %v5742_v50, %v2760_v63  ;;  %v2749_v5 = vor.u32 1.1754944e-38, %v2748_v36  ;;  %vm2906_vm13 = vweird.f32 %v5749_v17 }
 0x676   :  { %v2883_v19 = vsub.f32 1.0, %v2882_v1  ;;  %v2865_v20 = vmul.f32 %v4011_v28, %v2864_v58  ;;  %4022 = vtanh.f32 %v2731_v54  ;;  %v2910_v11 = vand.u32 2147483647, %v5749_v17 }
 0x677   :  { %v2750_v21 = vsel %vm2747_vm10, %v2749_v5, %v2745_v22  ;;  %v2913_v32 = vor.u32 1.1754944e-38, %v2912_v7  ;;  %vm2781_vm1 = vweird.f32 %v5755_v34  ;;  %v2785_v58 = vand.u32 2147483647, %v5755_v34 }
 0x678   :  { %v2884_v48 = vmul.f32 %v4015_v42, %v2883_v19  ;;  %v2866_v10 = vadd.f32 %v4011_v28, %v2865_v20  ;;  %vm2911_vm15 = vcmp.eq.f32.partialorder %v2910_v11, 8.507059e+37 }
 0x679   :  { %v4017_v23 = vpop.eup %4016 }
 0x67a   :  { %v2870_v49 = vsel %vm2869_vm2, %v4011_v28, %v2866_v10  ;;  %v2885_v27 = vadd.f32 %v4015_v42, %v2884_v48  ;;  %v2902_v44 = vmul.f32 %v4017_v23, %v5749_v17  ;;  %v4019_v0 = vpop.eup %4018  ;;  %vm2907_vm11 = vweird.f32 %v4017_v23  ;;  %v3772_v48 = vld [vmem:[#allocation15 + $0x38] sm:$0xff]  ;;  %v3771_v10 = vld [vmem:[#allocation15 + $0x30] sm:$0xff] }
 0x67b   :  { %v2875_v59 = vsel %vm2872_vm3, %v2874_v39, %v2870_v49  ;;  %v4021_v24 = vpop.eup %4020  ;;  %vm2908_vm14 = vmor %vm2906_vm13, %vm2907_vm11  ;;  %vm2786_vm3 = vcmp.eq.f32.partialorder %v2785_v58, 8.507059e+37  ;;  %v3770_v49 = vld [vmem:[#allocation15 + $0x28] sm:$0xff] }
 0x67c   :  { %v2889_v62 = vsel %vm2888_vm4, %v4015_v42, %v2885_v27  ;;  %v2917_v29 = vmul.f32 %v4019_v0, %v2875_v59  ;;  %v2903_v37 = vsub.f32 1.0, %v2902_v44  ;;  %v2777_v38 = vmul.f32 %v4021_v24, %v5755_v34  ;;  %v4023_v12 = vpop.eup %4022  ;;  %v3769_v27 = vld [vmem:[#allocation15 + $0x20] sm:$0xff] }
 0x67d   :  { %v2894_v47 = vsel %vm2891_vm5, %v2893_v31, %v2889_v62  ;;  %v2792_v28 = vmul.f32 %v4023_v12, %v2750_v21  ;;  %vm2782_vm0 = vweird.f32 %v4021_v24  ;;  %v3768_v62 = vld [vmem:[#allocation15 + $0x18] sm:$0xff] }
 0x67e   :  { %v2916_v35 = vmul.f32 %v2894_v47, %v5619_v55  ;;  %v2904_v4 = vmul.f32 %v4017_v23, %v2903_v37  ;;  %v2768_v55 = vor.u32 1.1754944e-38, %v2767_v56  ;;  %v2778_v33 = vsub.f32 1.0, %v2777_v38  ;;  %vm2783_vm2 = vmor %vm2781_vm1, %vm2782_vm0  ;;  %v3767_v47 = vld [vmem:[#allocation15 + $0x10] sm:$0xff] }
 0x680   :  { %v2918_v13 = vadd.f32 %v2917_v29, %v2916_v35  ;;  %v2905_v3 = vadd.f32 %v4017_v23, %v2904_v4  ;;  %v2769_v8 = vsel %vm2766_vm12, %v2768_v55, %v2764_v60  ;;  %v2779_v54 = vmul.f32 %v4021_v24, %v2778_v33  ;;  %v3766_v35 = vld [vmem:[#allocation15 + $0x8] sm:$0xff]  ;;  %v3765_v60 = vld [vmem:[#allocation15] sm:$0xff] }
 0x681   :  { %v2791_v16 = vmul.f32 %v2769_v8, %v5627_v30  ;;  %v2787_v30 = vand.u32 2147483648, %v5755_v34 }
 0x682   :  { %4024 = vtanh.f32 %v2918_v13  ;;  %v2909_v50 = vsel %vm2908_vm14, %v4017_v23, %v2905_v3  ;;  %v2780_v17 = vadd.f32 %v4021_v24, %v2779_v54 }
 0x683   :  { %v2914_v42 = vsel %vm2911_vm15, %v2913_v32, %v2909_v50  ;;  %v5794_v46 = vadd.f32 %v2792_v28, %v2791_v16  ;;  %v2788_v19 = vor.u32 1.1754944e-38, %v2787_v30 }
 0x684   :  { %v2784_v1 = vsel %vm2783_vm2, %v4021_v24, %v2780_v17 }
 0x685   :  { %4026 = vtanh.f32 %v5794_v46  ;;  %v2789_v20 = vsel %vm2786_vm3, %v2788_v19, %v2784_v1 }
 0x688   :  { %v4025_v41 = vpop.eup %4024 }
 0x689   :  { %v2920_v45 = vmul.f32 %v4025_v41, %v2914_v42 }
 0x68b   :  { %v2921_v57 = vpack.c.bf16 %v2920_v45, %v2920_v45  ;;  %v4027_v6 = vpop.eup %4026 }
 0x68c   :  { %v2795_v25 = vmul.f32 %v4027_v6, %v2789_v20 }
 0x68d   :  { %2930 = vmatmul.bf16.vlgmr.msra.gmra.mxu0 %v2921_v57  ;;  %2943 = vmatmul.bf16.vlgmr.msra.gmra.mxu1 %v2921_v57 }
 0x68e   :  { %2956 = vmatmul.bf16.vlgmr.msra.gmra.mxu2 %v2921_v57  ;;  %2969 = vmatmul.bf16.vlgmr.msra.gmra.mxu3 %v2921_v57  ;;  %v2796_v26 = vpack.c.bf16 %v2795_v25, %v2795_v25 }
 0x68f   :  { %3171 = vmatpush.bf16.msra.mxu0 %v3772_v48 }
 0x693   :  { %3172 = vmatpush.bf16.msra.mxu0 %v3771_v10 }
 0x697   :  { %3173 = vmatpush.bf16.msra.mxu0 %v3770_v49 }
 0x69b   :  { %3174 = vmatpush.bf16.msra.mxu0 %v3769_v27 }
 0x69d   :  { %2982 = vmatmul.bf16.vlgmr.msrb.gmra.mxu0 %v2796_v26  ;;  %2995 = vmatmul.bf16.vlgmr.msrb.gmra.mxu1 %v2796_v26 }
 0x69e   :  { %3008 = vmatmul.bf16.vlgmr.msrb.gmra.mxu2 %v2796_v26  ;;  %3021 = vmatmul.bf16.vlgmr.msrb.gmra.mxu3 %v2796_v26 }
 0x69f   :  { %3175 = vmatpush.bf16.msra.mxu0 %v3768_v62 }
 0x6a3   :  { %3176 = vmatpush.bf16.msra.mxu0 %v3767_v47 }
 0x6a7   :  { %3177 = vmatpush.bf16.msra.mxu0 %v3766_v35 }
 0x6ab   :  { %3178 = vmatpush.bf16.msra.mxu0 %v3765_v60 }
 0x70a   :  { %v2931_v40 = vpop.f32.mrf.mxu0  ;;  %v2944_v43 = vpop.f32.mrf.mxu1 }
 0x711   :  { %v2957_v18 = vpop.f32.mrf.mxu2  ;;  %v2970_v23 = vpop.f32.mrf.mxu3 }
 0x712   :  { %v2933_v34 = vpop.f32.mrf.mxu0  ;;  %v2946_v39 = vpop.f32.mrf.mxu1 }
 0x719   :  { %v2959_v44 = vpop.f32.mrf.mxu2  ;;  %v2972_v0 = vpop.f32.mrf.mxu3 }
 0x71a   :  { %v2983_v52 = vpop.f32.mrf.mxu0  ;;  %v2996_v63 = vpop.f32.mrf.mxu1 }
 0x71b   :  { %v2984_v31 = vadd.f32 %v2983_v52, %v2931_v40  ;;  %v2997_v59 = vadd.f32 %v2996_v63, %v2944_v43 }
 0x71d   :  { %v3026_v29 = vadd.f32 %v2984_v31, %v6520_v2  ;;  %v3027_v37 = vadd.f32 %v2997_v59, %v6521_v9 }
 0x71f   :  { %v3634_v56 = vmul.f32 -1.442695, %v3026_v29  ;;  %v3635_v36 = vmul.f32 -1.442695, %v3027_v37 }
 0x721   :  { %4028 = vpow2.f32 %v3634_v56  ;;  %v3009_v14 = vpop.f32.mrf.mxu2  ;;  %v3022_v15 = vpop.f32.mrf.mxu3 }
 0x722   :  { %4030 = vpow2.f32 %v3635_v36  ;;  %v3023_v4 = vadd.f32 %v3022_v15, %v2970_v23  ;;  %v2985_v24 = vpop.f32.mrf.mxu0  ;;  %v2998_v51 = vpop.f32.mrf.mxu1  ;;  %v3010_v7 = vadd.f32 %v3009_v14, %v2957_v18 }
 0x724   :  { %v3029_v22 = vadd.f32 %v3023_v4, %v6522_v61  ;;  %v3028_v12 = vadd.f32 %v3010_v7, %v6523_v53 }
 0x726   :  { %v3636_v2 = vmul.f32 -1.442695, %v3029_v22 }
 0x727   :  { %v4029_v13 = vpop.eup %4028 }
 0x728   :  { %v4031_v9 = vpop.eup %4030  ;;  %v3033_v55 = vadd.f32 1.0, %v4029_v13  ;;  %4032 = vpow2.f32 %v3636_v2 }
 0x729   :  { %v3052_v5 = vadd.f32 1.0, %v4031_v9  ;;  %v3011_v3 = vpop.f32.mrf.mxu2  ;;  %v3024_v38 = vpop.f32.mrf.mxu3 }
 0x72a   :  { %4034 = vrcp.f32 %v3033_v55  ;;  %v3045_v33 = vand.u32 2147483648, %v3033_v55  ;;  %v3043_v45 = vand.u32 2147483647, %v3033_v55  ;;  %vm3039_vm6 = vweird.f32 %v3033_v55 }
 0x72b   :  { %4036 = vrcp.f32 %v3052_v5  ;;  %v3064_v41 = vand.u32 2147483648, %v3052_v5  ;;  %v3062_v57 = vand.u32 2147483647, %v3052_v5  ;;  %vm3058_vm7 = vweird.f32 %v3052_v5 }
 0x72c   :  { %v3046_v53 = vor.u32 1.1754944e-38, %v3045_v33  ;;  %vm3044_vm10 = vcmp.eq.f32.partialorder %v3043_v45, 8.507059e+37 }
 0x72d   :  { %v3065_v6 = vor.u32 1.1754944e-38, %v3064_v41  ;;  %vm3063_vm11 = vcmp.eq.f32.partialorder %v3062_v57, 8.507059e+37 }
 0x72e   :  { %v4033_v21 = vpop.eup %4032 }
 0x72f   :  { %v3072_v8 = vadd.f32 1.0, %v4033_v21 }
 0x730   :  { %v4035_v11 = vpop.eup %4034 }
 0x731   :  { %v4037_v61 = vpop.eup %4036  ;;  %v3035_v50 = vmul.f32 %v4035_v11, %v3033_v55  ;;  %4038 = vrcp.f32 %v3072_v8  ;;  %vm3040_vm4 = vweird.f32 %v4035_v11  ;;  %v3084_v39 = vand.u32 2147483648, %v3072_v8 }
 0x732   :  { %v3054_v16 = vmul.f32 %v4037_v61, %v3052_v5  ;;  %4040 = vtanh.f32 %v3028_v12  ;;  %vm3059_vm5 = vweird.f32 %v4037_v61  ;;  %vm3041_vm8 = vmor %vm3039_vm6, %vm3040_vm4  ;;  %vm3078_vm13 = vweird.f32 %v3072_v8 }
 0x733   :  { %v3036_v28 = vsub.f32 1.0, %v3035_v50  ;;  %vm3060_vm9 = vmor %vm3058_vm7, %vm3059_vm5  ;;  %v3082_v49 = vand.u32 2147483647, %v3072_v8  ;;  %v3085_v44 = vor.u32 1.1754944e-38, %v3084_v39 }
 0x734   :  { %v3055_v32 = vsub.f32 1.0, %v3054_v16 }
 0x735   :  { %v3037_v42 = vmul.f32 %v4035_v11, %v3036_v28  ;;  %vm3083_vm15 = vcmp.eq.f32.partialorder %v3082_v49, 8.507059e+37 }
 0x736   :  { %v3056_v54 = vmul.f32 %v4037_v61, %v3055_v32 }
 0x737   :  { %v4039_v17 = vpop.eup %4038  ;;  %v3038_v30 = vadd.f32 %v4035_v11, %v3037_v42 }
 0x738   :  { %v3057_v58 = vadd.f32 %v4037_v61, %v3056_v54  ;;  %v3074_v1 = vmul.f32 %v4039_v17, %v3072_v8  ;;  %v4041_v20 = vpop.eup %4040  ;;  %vm3079_vm12 = vweird.f32 %v4039_v17 }
 0x739   :  { %v3042_v19 = vsel %vm3041_vm8, %v4035_v11, %v3038_v30  ;;  %vm3080_vm14 = vmor %vm3078_vm13, %vm3079_vm12 }
 0x73a   :  { %v3047_v25 = vsel %vm3044_vm10, %v3046_v53, %v3042_v19  ;;  %v3061_v26 = vsel %vm3060_vm9, %v4037_v61, %v3057_v58  ;;  %v3075_v40 = vsub.f32 1.0, %v3074_v1 }
 0x73b   :  { %v3066_v43 = vsel %vm3063_vm11, %v3065_v6, %v3061_v26  ;;  %v3089_v48 = vmul.f32 %v4041_v20, %v3047_v25 }
 0x73c   :  { %v3088_v10 = vmul.f32 %v3066_v43, %v5794_v46  ;;  %v3076_v18 = vmul.f32 %v4039_v17, %v3075_v40  ;;  %v3787_v46 = vld [vmem:[%s5817_s6] ss:$0 sm:$0xff] }
 0x73e   :  { %v3090_v23 = vadd.f32 %v3089_v48, %v3088_v10  ;;  %v3077_v34 = vadd.f32 %v4039_v17, %v3076_v18 }
 0x740   :  { %4042 = vtanh.f32 %v3090_v23  ;;  %v3081_v27 = vsel %vm3080_vm14, %v4039_v17, %v3077_v34 }
 0x741   :  { %v3086_v52 = vsel %vm3083_vm15, %v3085_v44, %v3081_v27 }
 0x746   :  { %v4043_v0 = vpop.eup %4042 }
 0x747   :  { %v3092_v63 = vmul.f32 %v4043_v0, %v3086_v52 }
 0x749   :  { %v3093_v31 = vpack.c.bf16 %v3092_v63, %v3092_v63 }
 0x74b   :  { %3179 = vmatmul.bf16.vlgmr.msra.gmra.mxu0 %v3093_v31 }
 0x7c8   :  { %v3180_v59 = vpop.f32.mrf.mxu0 }
 0x7c9   :  { %v3181_v62 = vadd.f32 %v3787_v46, %v3180_v59 }
 0x7cb   :  { %3184 = vst [vmem:[#allocation17] sm:$0xff] %v3181_v62 }
 0x7cc   :  { %3195 = dma.vmem_to_hbm [thread:$0]  %s3191_s10, 128, %s3193_s14, [#allocation8]  }
 0x7d0   :  { %v3182_v29 = vpop.f32.mrf.mxu0 }
 0x7d1   :  { %4220 = dma.done.wait [#allocation8], 128  }
 0x7d2   :  { %4221 = vsyncadd [#allocation8], 4294967168 }
 0x7d3   :  { %3200 = vsyncpa [#allocation7], 1 }
 0x7d4   :  { %3201 = vsyncpa [#allocation10], 1 }
 0x7d5   :  { %3202 = vsyncpa [#allocation13], 1 }
 0x7d6   :  { %3203 = vsyncpa [#allocation16], 1 }
 0x7d7   :  { %3204 = vsyncpa [#allocation8], 1 }

</bundles_post_ra>
